<compile_context>
chip_gen: v6e
topology: v6e:2x2x1
jax: 0.10.0
libtpu: 0.0.40
codegen_flags: <defaults>
</compile_context>

<pallas_src>
import jax
import jax.numpy as jnp
import numpy as np
from jax import lax
from jax.experimental import pallas as pl
from jax.experimental.pallas import tpu as pltpu

LANE = 128  # lane-padded channel-block width for all conv matmul outputs


# ---------------------------------------------------------------------------
# Fused per-batch-block kernel.  One grid step processes B_blk images.
#
# Input layout (prepared in net_forward):
#   x8_ref[t][(i*B + b), :] = image row (4*i + t) of image b,  t in 0..7, i in 0..5
# Stage-1 scratch:
#   P_e[(i*B + b), px*10+co] = relu(maxpool(conv1+bias))[b, co, row=2*i+e, col=px]
# Stage-2 rows are ordered (py2, b); head rows are ordered (b).
# ---------------------------------------------------------------------------
def _net_fused_kernel(x8_ref, w1_ref, b1_ref, w2_ref, b2_ref,
                      wfc1_ref, bfc1_ref, wfc2_ref, bfc2_ref,
                      o_ref, p0_ref, p1_ref):
    bb = x8_ref.shape[1] // 6          # images per grid step (static)
    b1 = b1_ref[...]                   # (1, 128) f32
    b2 = b2_ref[...]                   # (1, 128) f32

    # -------- stage 1: conv1 + bias + 2x2 maxpool + ReLU --> P_e scratch --------
    xs = [x8_ref[t].astype(jnp.bfloat16) for t in range(8)]      # (6*bb, 28) each
    p_refs = (p0_ref, p1_ref)
    for e in range(2):                 # pooled-row parity
        pooled = None
        for sy in range(2):            # vertical pool tap
            u = 2 * e + sy
            acc = jnp.dot(xs[u], w1_ref[0], preferred_element_type=jnp.float32)
            for ky in range(1, 5):
                acc = acc + jnp.dot(xs[u + ky], w1_ref[ky],
                                    preferred_element_type=jnp.float32)
            half = jnp.maximum(acc[:, :LANE], acc[:, LANE:])     # horizontal taps
            pooled = half if pooled is None else jnp.maximum(pooled, half)
        # bias is constant across pool taps, so adding it after the max is exact
        p_refs[e][...] = jnp.maximum(pooled + b1, 0.0)           # (6*bb, 128)

    # -------- stage 2: conv2 + bias + 2x2 maxpool + ReLU --------
    # TODO(synk): nn.Dropout2d before this pool is stochastic only in training;
    # eval mode is the identity, which is what is implemented here.
    p0 = p0_ref[...]
    p1 = p1_ref[...]
    hs = []                            # conv2 needs pooled rows 2*py2 + t, t = sy + ky
    for t in range(6):
        src = p0 if t % 2 == 0 else p1
        q = (t // 2) * bb              # sublane-aligned (bb is a multiple of 8)
        hs.append(src[q:q + 4 * bb, :].astype(jnp.bfloat16))     # (4*bb, 128)
    pooled2 = None
    for sy in range(2):
        acc = jnp.dot(hs[sy], w2_ref[0], preferred_element_type=jnp.float32)
        for ky in range(1, 5):
            acc = acc + jnp.dot(hs[sy + ky], w2_ref[ky],
                                preferred_element_type=jnp.float32)
        half = jnp.maximum(acc[:, :LANE], acc[:, LANE:])
        pooled2 = half if pooled2 is None else jnp.maximum(pooled2, half)
    h2 = jnp.maximum(pooled2 + b2, 0.0)          # (4*bb, 128), rows (py2, b)

    # -------- head: NCHW flatten + fc1 + ReLU + fc2 + log_softmax --------
    # torch's x.view(-1, 320) is folded into the host-side permutation of wfc1,
    # so fc1 is 4 M=bb matmuls (== one (bb,512)@(512,64) pass split per pooled row).
    acc1 = jnp.dot(h2[0:bb, :].astype(jnp.bfloat16), wfc1_ref[0],
                   preferred_element_type=jnp.float32)
    for py in range(1, 4):
        acc1 = acc1 + jnp.dot(h2[py * bb:(py + 1) * bb, :].astype(jnp.bfloat16),
                              wfc1_ref[py], preferred_element_type=jnp.float32)
    hfc = jnp.maximum(acc1 + bfc1_ref[...], 0.0)  # (bb, 64); cols >= 50 are zero
    # TODO(synk): F.dropout(training=self.training) is identity in eval mode.

    logits = jnp.dot(hfc.astype(jnp.bfloat16), wfc2_ref[...],
                     preferred_element_type=jnp.float32) + bfc2_ref[...]  # (bb, 128)
    # Only the first 10 lanes are real classes; mask the 128-lane padding out of
    # the softmax statistics, keep the store lane-dense, slice in the wrapper.
    lane = lax.broadcasted_iota(jnp.int32, logits.shape, 1)
    valid = lane < 10
    neg = jnp.full_like(logits, -1e30)
    m = jnp.max(jnp.where(valid, logits, neg), axis=-1, keepdims=True)
    s = jnp.sum(jnp.where(valid, jnp.exp(logits - m), 0.0), axis=-1, keepdims=True)
    o_ref[...] = (logits - (m + jnp.log(s))).astype(o_ref.dtype)


# ---------------- pallas_call wrapper ----------------

def _net_fused(x8, p, n_pad, block_b):
    c3 = lambda g: (0, 0, 0)
    c2 = lambda g: (0, 0)
    return pl.pallas_call(
        _net_fused_kernel,
        grid=(n_pad // block_b,),
        in_specs=[
            pl.BlockSpec((8, 6 * block_b, 28), lambda g: (0, g, 0)),   # input slabs
            pl.BlockSpec((5, 28, 2 * LANE), c3),                       # w1_band
            pl.BlockSpec((1, LANE), c2),                               # b1_band
            pl.BlockSpec((5, LANE, 2 * LANE), c3),                     # w2_band
            pl.BlockSpec((1, LANE), c2),                               # b2_band
            pl.BlockSpec((4, LANE, 64), c3),                           # wfc1
            pl.BlockSpec((1, 64), c2),                                 # bfc1
            pl.BlockSpec((64, LANE), c2),                              # wfc2
            pl.BlockSpec((1, LANE), c2),                               # bfc2
        ],
        out_specs=pl.BlockSpec((block_b, LANE), lambda g: (g, 0)),
        out_shape=jax.ShapeDtypeStruct((n_pad, LANE), jnp.float32),
        scratch_shapes=[pltpu.VMEM((6 * block_b, LANE), jnp.float32),  # P_0
                        pltpu.VMEM((6 * block_b, LANE), jnp.float32)], # P_1
        compiler_params=pltpu.CompilerParams(
            dimension_semantics=("parallel",)),
    )(x8, p["w1_band"], p["b1_band"], p["w2_band"], p["b2_band"],
      p["wfc1"], p["bfc1"], p["wfc2"], p["bfc2"])


# ---------------- one-time host-side parameter preparation ----------------

def _band_conv_weight(w, out_cols, row_pad):
    """Banded (Toeplitz) conv weight: for each kernel row ky, map an input row
    (lanes = col*CI + ci) to the conv output at the pooled columns of both
    horizontal pool taps (lanes = sx*LANE + px*CO + co)."""
    co_n, ci_n, kh, kw = w.shape
    out = np.zeros((kh, row_pad, 2 * LANE), np.float32)
    for ky in range(kh):
        for sx in range(2):
            for px in range(out_cols):
                for kx in range(kw):
                    c = 2 * px + sx + kx            # input column index
                    r0 = c * ci_n
                    c0 = sx * LANE + px * co_n
                    out[ky, r0:r0 + ci_n, c0:c0 + co_n] = w[:, :, ky, kx].T
    return out


def prepare_params(params):
    """Fold all weight transposes / banding / flatten-permutation / padding /
    bf16 casts into a single host-side step (run once, outside jit)."""
    g = lambda a: np.asarray(jax.device_get(a), dtype=np.float32)
    c1w, c1b = g(params["conv1_w"]), g(params["conv1_b"])
    c2w, c2b = g(params["conv2_w"]), g(params["conv2_b"])
    f1w, f1b = g(params["fc1_w"]), g(params["fc1_b"])
    f2w, f2b = g(params["fc2_w"]), g(params["fc2_b"])

    w1_band = _band_conv_weight(c1w, out_cols=12, row_pad=28)    # (5, 28, 256)
    w2_band = _band_conv_weight(c2w, out_cols=4, row_pad=LANE)   # (5, 128, 256)

    b1_band = np.zeros((1, LANE), np.float32)
    for px in range(12):
        b1_band[0, px * 10:px * 10 + 10] = c1b
    b2_band = np.zeros((1, LANE), np.float32)
    for px in range(4):
        b2_band[0, px * 20:px * 20 + 20] = c2b

    # fc1 weight: torch's NCHW flatten index j = co*16 + py*4 + px folded into a
    # per-pooled-row block (rows = px*20 + co), output padded 50 -> 64 lanes.
    wfc1 = np.zeros((4, LANE, 64), np.float32)
    for py in range(4):
        for px in range(4):
            for co in range(20):
                wfc1[py, px * 20 + co, :50] = f1w[:, co * 16 + py * 4 + px]
    bfc1 = np.zeros((1, 64), np.float32)
    bfc1[0, :50] = f1b

    # fc2 padded to (64, 128); padded rows/cols are zero (softmax masks lanes >= 10).
    wfc2 = np.zeros((64, LANE), np.float32)
    wfc2[:50, :10] = f2w.T
    bfc2 = np.zeros((1, LANE), np.float32)
    bfc2[0, :10] = f2b

    return {
        "w1_band": jnp.asarray(w1_band, jnp.bfloat16),
        "b1_band": jnp.asarray(b1_band, jnp.float32),
        "w2_band": jnp.asarray(w2_band, jnp.bfloat16),
        "b2_band": jnp.asarray(b2_band, jnp.float32),
        "wfc1": jnp.asarray(wfc1, jnp.bfloat16),
        "bfc1": jnp.asarray(bfc1, jnp.float32),
        "wfc2": jnp.asarray(wfc2, jnp.bfloat16),
        "bfc2": jnp.asarray(bfc2, jnp.float32),
    }


# ---------------- forward pass ----------------

def net_forward(prepared, x, block_b=32):
    """x: (N, 1, 28, 28) f32 -> (N, 10) log-probabilities."""
    n = x.shape[0]
    bb = block_b if n >= block_b else max(8, -(-n // 8) * 8)
    assert bb % 8 == 0
    n_pad = -(-n // bb) * bb

    x2d = x[:, 0, :, :].astype(jnp.float32)                 # (N, 28, 28), CI = 1
    if n_pad != n:
        x2d = jnp.pad(x2d, ((0, n_pad - n), (0, 0), (0, 0)))

    # Row-polyphase slabs, laid out so each grid step's slab x8_ref[t] is the
    # (6*B_blk, 28) matmul LHS directly (row order inside a block = (i, b)).
    slabs = jnp.stack([x2d[:, t:t + 21:4, :] for t in range(8)], axis=0)  # (8,NP,6,28)
    g = n_pad // bb
    x8 = (slabs.reshape(8, g, bb, 6, 28)
               .transpose(0, 1, 3, 2, 4)
               .reshape(8, 6 * n_pad, 28))

    out = _net_fused(x8, prepared, n_pad, bb)               # (NP, 128) lane-dense
    return out[:n, :10]


# ---------------- init + pure-XLA reference (for validation) ----------------

def init_params(key):
    ks = jax.random.split(key, 8)

    def u(k, shape, fan_in):
        bound = 1.0 / jnp.sqrt(jnp.float32(fan_in))
        return jax.random.uniform(k, shape, jnp.float32, -bound, bound)

    return {
        "conv1_w": u(ks[0], (10, 1, 5, 5), 1 * 5 * 5),
        "conv1_b": u(ks[1], (10,), 1 * 5 * 5),
        "conv2_w": u(ks[2], (20, 10, 5, 5), 10 * 5 * 5),
        "conv2_b": u(ks[3], (20,), 10 * 5 * 5),
        "fc1_w": u(ks[4], (50, 320), 320),
        "fc1_b": u(ks[5], (50,), 320),
        "fc2_w": u(ks[6], (10, 50), 50),
        "fc2_b": u(ks[7], (10,), 50),
    }


def _reference_forward(params, x):
    dn = ("NCHW", "OIHW", "NCHW")
    hp = lax.Precision.HIGHEST
    y = lax.conv_general_dilated(x, params["conv1_w"], (1, 1), "VALID",
                                 dimension_numbers=dn, precision=hp)
    y = y + params["conv1_b"][None, :, None, None]
    y = lax.reduce_window(y, -jnp.inf, lax.max, (1, 1, 2, 2), (1, 1, 2, 2), "VALID")
    y = jnp.maximum(y, 0.0)
    y = lax.conv_general_dilated(y, params["conv2_w"], (1, 1), "VALID",
                                 dimension_numbers=dn, precision=hp)
    y = y + params["conv2_b"][None, :, None, None]
    y = lax.reduce_window(y, -jnp.inf, lax.max, (1, 1, 2, 2), (1, 1, 2, 2), "VALID")
    y = jnp.maximum(y, 0.0)
    flat = y.reshape(y.shape[0], -1)                 # torch NCHW view(-1, 320)
    h = jnp.maximum(flat @ params["fc1_w"].T + params["fc1_b"], 0.0)
    logits = h @ params["fc2_w"].T + params["fc2_b"]
    return jax.nn.log_softmax(logits, axis=-1)


if __name__ == "__main__":
    key = jax.random.PRNGKey(0)
    pkey, xkey = jax.random.split(key)
    params = init_params(pkey)
    prepared = prepare_params(params)

    # MNIST-shaped input: the conv/pool/fc arithmetic requires 1x28x28.
    x = jax.random.normal(xkey, (2, 1, 28, 28), jnp.float32)

    fwd = jax.jit(net_forward)
    out = jax.block_until_ready(fwd(prepared, x))
    assert out.shape == (2, 10)
    # log_softmax rows must exponentiate to a probability distribution
    assert bool(jnp.allclose(jnp.exp(out).sum(axis=1), 1.0, atol=1e-4))
    ref = _reference_forward(params, x)
    err = float(jnp.max(jnp.abs(out - ref)))
    assert err < 1e-1, f"mismatch vs reference: {err}"

    # Multi-grid-step check: exercises batch padding, the (i, b) row layout
    # across blocks, and the "parallel" batch-block grid.
    x_big = jax.random.normal(jax.random.split(xkey)[0], (20, 1, 28, 28), jnp.float32)
    fwd8 = jax.jit(lambda p, xx: net_forward(p, xx, block_b=8))
    out_big = jax.block_until_ready(fwd8(prepared, x_big))
    assert out_big.shape == (20, 10)
    ref_big = _reference_forward(params, x_big)
    err_big = float(jnp.max(jnp.abs(out_big - ref_big)))
    assert err_big < 1e-1, f"mismatch vs reference (multi-block): {err_big}"

    print("KERNEL_OK")
</pallas_src>

<mosaic_0001>
module attributes {stable_mosaic.version = 11 : i64} {
  func.func @_net_fused_kernel(%arg0: i32, %arg1: memref<8x48x28xf32, #tpu.memory_space<vmem>>, %arg2: memref<5x28x256xbf16, #tpu.memory_space<vmem>>, %arg3: memref<1x128xf32, #tpu.memory_space<vmem>>, %arg4: memref<5x128x256xbf16, #tpu.memory_space<vmem>>, %arg5: memref<1x128xf32, #tpu.memory_space<vmem>>, %arg6: memref<4x128x64xbf16, #tpu.memory_space<vmem>>, %arg7: memref<1x64xf32, #tpu.memory_space<vmem>>, %arg8: memref<64x128xbf16, #tpu.memory_space<vmem>>, %arg9: memref<1x128xf32, #tpu.memory_space<vmem>>, %arg10: memref<8x128xf32, #tpu.memory_space<vmem>>, %arg11: memref<48x128xf32, #tpu.memory_space<vmem>>, %arg12: memref<48x128xf32, #tpu.memory_space<vmem>>) attributes {dimension_semantics = [#tpu.dimension_semantics<parallel>], iteration_bounds = array<i64: 1>, scalar_prefetch = 0 : i64, scratch_operands = 2 : i64, tpu.core_type = #tpu.core_type<tc>, window_params = [{transform_indices = @transform_0, window_bounds = array<i64: 8, 48, 28>}, {pipeline_mode = #tpu.pipeline_mode<synchronous>, transform_indices = @transform_1, window_bounds = array<i64: 5, 28, 256>}, {pipeline_mode = #tpu.pipeline_mode<synchronous>, transform_indices = @transform_2, window_bounds = array<i64: 1, 128>}, {pipeline_mode = #tpu.pipeline_mode<synchronous>, transform_indices = @transform_3, window_bounds = array<i64: 5, 128, 256>}, {pipeline_mode = #tpu.pipeline_mode<synchronous>, transform_indices = @transform_4, window_bounds = array<i64: 1, 128>}, {pipeline_mode = #tpu.pipeline_mode<synchronous>, transform_indices = @transform_5, window_bounds = array<i64: 4, 128, 64>}, {pipeline_mode = #tpu.pipeline_mode<synchronous>, transform_indices = @transform_6, window_bounds = array<i64: 1, 64>}, {pipeline_mode = #tpu.pipeline_mode<synchronous>, transform_indices = @transform_7, window_bounds = array<i64: 64, 128>}, {pipeline_mode = #tpu.pipeline_mode<synchronous>, transform_indices = @transform_8, window_bounds = array<i64: 1, 128>}, {transform_indices = @transform_9, window_bounds = array<i64: 8, 128>}]} {
    %c0 = arith.constant 0 : index
    %c0_0 = arith.constant 0 : index
    %0 = vector.load %arg3[%c0, %c0_0] : memref<1x128xf32, #tpu.memory_space<vmem>>, vector<1x128xf32>
    %c0_1 = arith.constant 0 : index
    %c0_2 = arith.constant 0 : index
    %1 = vector.load %arg5[%c0_1, %c0_2] : memref<1x128xf32, #tpu.memory_space<vmem>>, vector<1x128xf32>
    %c0_3 = arith.constant 0 : index
    %c0_4 = arith.constant 0 : index
    %c0_5 = arith.constant 0 : index
    %2 = vector.load %arg1[%c0_3, %c0_4, %c0_5] : memref<8x48x28xf32, #tpu.memory_space<vmem>>, vector<1x48x28xf32>
    %3 = vector.shape_cast %2 : vector<1x48x28xf32> to vector<48x28xf32>
    %4 = arith.truncf %3 : vector<48x28xf32> to vector<48x28xbf16>
    %c1 = arith.constant 1 : index
    %c0_6 = arith.constant 0 : index
    %c0_7 = arith.constant 0 : index
    %5 = vector.load %arg1[%c1, %c0_6, %c0_7] : memref<8x48x28xf32, #tpu.memory_space<vmem>>, vector<1x48x28xf32>
    %6 = vector.shape_cast %5 : vector<1x48x28xf32> to vector<48x28xf32>
    %7 = arith.truncf %6 : vector<48x28xf32> to vector<48x28xbf16>
    %c2 = arith.constant 2 : index
    %c0_8 = arith.constant 0 : index
    %c0_9 = arith.constant 0 : index
    %8 = vector.load %arg1[%c2, %c0_8, %c0_9] : memref<8x48x28xf32, #tpu.memory_space<vmem>>, vector<1x48x28xf32>
    %9 = vector.shape_cast %8 : vector<1x48x28xf32> to vector<48x28xf32>
    %10 = arith.truncf %9 : vector<48x28xf32> to vector<48x28xbf16>
    %c3 = arith.constant 3 : index
    %c0_10 = arith.constant 0 : index
    %c0_11 = arith.constant 0 : index
    %11 = vector.load %arg1[%c3, %c0_10, %c0_11] : memref<8x48x28xf32, #tpu.memory_space<vmem>>, vector<1x48x28xf32>
    %12 = vector.shape_cast %11 : vector<1x48x28xf32> to vector<48x28xf32>
    %13 = arith.truncf %12 : vector<48x28xf32> to vector<48x28xbf16>
    %c4 = arith.constant 4 : index
    %c0_12 = arith.constant 0 : index
    %c0_13 = arith.constant 0 : index
    %14 = vector.load %arg1[%c4, %c0_12, %c0_13] : memref<8x48x28xf32, #tpu.memory_space<vmem>>, vector<1x48x28xf32>
    %15 = vector.shape_cast %14 : vector<1x48x28xf32> to vector<48x28xf32>
    %16 = arith.truncf %15 : vector<48x28xf32> to vector<48x28xbf16>
    %c5 = arith.constant 5 : index
    %c0_14 = arith.constant 0 : index
    %c0_15 = arith.constant 0 : index
    %17 = vector.load %arg1[%c5, %c0_14, %c0_15] : memref<8x48x28xf32, #tpu.memory_space<vmem>>, vector<1x48x28xf32>
    %18 = vector.shape_cast %17 : vector<1x48x28xf32> to vector<48x28xf32>
    %19 = arith.truncf %18 : vector<48x28xf32> to vector<48x28xbf16>
    %c6 = arith.constant 6 : index
    %c0_16 = arith.constant 0 : index
    %c0_17 = arith.constant 0 : index
    %20 = vector.load %arg1[%c6, %c0_16, %c0_17] : memref<8x48x28xf32, #tpu.memory_space<vmem>>, vector<1x48x28xf32>
    %21 = vector.shape_cast %20 : vector<1x48x28xf32> to vector<48x28xf32>
    %22 = arith.truncf %21 : vector<48x28xf32> to vector<48x28xbf16>
    %c7 = arith.constant 7 : index
    %c0_18 = arith.constant 0 : index
    %c0_19 = arith.constant 0 : index
    %23 = vector.load %arg1[%c7, %c0_18, %c0_19] : memref<8x48x28xf32, #tpu.memory_space<vmem>>, vector<1x48x28xf32>
    %24 = vector.shape_cast %23 : vector<1x48x28xf32> to vector<48x28xf32>
    %25 = arith.truncf %24 : vector<48x28xf32> to vector<48x28xbf16>
    %c0_20 = arith.constant 0 : index
    %c0_21 = arith.constant 0 : index
    %c0_22 = arith.constant 0 : index
    %26 = vector.load %arg2[%c0_20, %c0_21, %c0_22] : memref<5x28x256xbf16, #tpu.memory_space<vmem>>, vector<1x28x256xbf16>
    %27 = vector.shape_cast %26 : vector<1x28x256xbf16> to vector<28x256xbf16>
    %cst = arith.constant dense<0.000000e+00> : vector<48x256xf32>
    %28 = tpu.matmul %4, %27, %cst {dimension_numbers = #tpu.dot_dimension_numbers<[1], [0], [0], [1], [0, 0, 1, 1], [], []>} : vector<48x28xbf16>, vector<28x256xbf16>, vector<48x256xf32> -> vector<48x256xf32>
    %c1_23 = arith.constant 1 : index
    %c0_24 = arith.constant 0 : index
    %c0_25 = arith.constant 0 : index
    %29 = vector.load %arg2[%c1_23, %c0_24, %c0_25] : memref<5x28x256xbf16, #tpu.memory_space<vmem>>, vector<1x28x256xbf16>
    %30 = vector.shape_cast %29 : vector<1x28x256xbf16> to vector<28x256xbf16>
    %cst_26 = arith.constant dense<0.000000e+00> : vector<48x256xf32>
    %31 = tpu.matmul %7, %30, %cst_26 {dimension_numbers = #tpu.dot_dimension_numbers<[1], [0], [0], [1], [0, 0, 1, 1], [], []>} : vector<48x28xbf16>, vector<28x256xbf16>, vector<48x256xf32> -> vector<48x256xf32>
    %32 = arith.addf %28, %31 : vector<48x256xf32>
    %c2_27 = arith.constant 2 : index
    %c0_28 = arith.constant 0 : index
    %c0_29 = arith.constant 0 : index
    %33 = vector.load %arg2[%c2_27, %c0_28, %c0_29] : memref<5x28x256xbf16, #tpu.memory_space<vmem>>, vector<1x28x256xbf16>
    %34 = vector.shape_cast %33 : vector<1x28x256xbf16> to vector<28x256xbf16>
    %cst_30 = arith.constant dense<0.000000e+00> : vector<48x256xf32>
    %35 = tpu.matmul %10, %34, %cst_30 {dimension_numbers = #tpu.dot_dimension_numbers<[1], [0], [0], [1], [0, 0, 1, 1], [], []>} : vector<48x28xbf16>, vector<28x256xbf16>, vector<48x256xf32> -> vector<48x256xf32>
    %36 = arith.addf %32, %35 : vector<48x256xf32>
    %c3_31 = arith.constant 3 : index
    %c0_32 = arith.constant 0 : index
    %c0_33 = arith.constant 0 : index
    %37 = vector.load %arg2[%c3_31, %c0_32, %c0_33] : memref<5x28x256xbf16, #tpu.memory_space<vmem>>, vector<1x28x256xbf16>
    %38 = vector.shape_cast %37 : vector<1x28x256xbf16> to vector<28x256xbf16>
    %cst_34 = arith.constant dense<0.000000e+00> : vector<48x256xf32>
    %39 = tpu.matmul %13, %38, %cst_34 {dimension_numbers = #tpu.dot_dimension_numbers<[1], [0], [0], [1], [0, 0, 1, 1], [], []>} : vector<48x28xbf16>, vector<28x256xbf16>, vector<48x256xf32> -> vector<48x256xf32>
    %40 = arith.addf %36, %39 : vector<48x256xf32>
    %c4_35 = arith.constant 4 : index
    %c0_36 = arith.constant 0 : index
    %c0_37 = arith.constant 0 : index
    %41 = vector.load %arg2[%c4_35, %c0_36, %c0_37] : memref<5x28x256xbf16, #tpu.memory_space<vmem>>, vector<1x28x256xbf16>
    %42 = vector.shape_cast %41 : vector<1x28x256xbf16> to vector<28x256xbf16>
    %cst_38 = arith.constant dense<0.000000e+00> : vector<48x256xf32>
    %43 = tpu.matmul %16, %42, %cst_38 {dimension_numbers = #tpu.dot_dimension_numbers<[1], [0], [0], [1], [0, 0, 1, 1], [], []>} : vector<48x28xbf16>, vector<28x256xbf16>, vector<48x256xf32> -> vector<48x256xf32>
    %44 = arith.addf %40, %43 : vector<48x256xf32>
    %45 = vector.extract_strided_slice %44 {offsets = [0, 0], sizes = [48, 128], strides = [1, 1]} : vector<48x256xf32> to vector<48x128xf32>
    %46 = vector.extract_strided_slice %44 {offsets = [0, 128], sizes = [48, 128], strides = [1, 1]} : vector<48x256xf32> to vector<48x128xf32>
    %47 = arith.maximumf %45, %46 : vector<48x128xf32>
    %c0_39 = arith.constant 0 : index
    %c0_40 = arith.constant 0 : index
    %c0_41 = arith.constant 0 : index
    %48 = vector.load %arg2[%c0_39, %c0_40, %c0_41] : memref<5x28x256xbf16, #tpu.memory_space<vmem>>, vector<1x28x256xbf16>
    %49 = vector.shape_cast %48 : vector<1x28x256xbf16> to vector<28x256xbf16>
    %cst_42 = arith.constant dense<0.000000e+00> : vector<48x256xf32>
    %50 = tpu.matmul %7, %49, %cst_42 {dimension_numbers = #tpu.dot_dimension_numbers<[1], [0], [0], [1], [0, 0, 1, 1], [], []>} : vector<48x28xbf16>, vector<28x256xbf16>, vector<48x256xf32> -> vector<48x256xf32>
    %c1_43 = arith.constant 1 : index
    %c0_44 = arith.constant 0 : index
    %c0_45 = arith.constant 0 : index
    %51 = vector.load %arg2[%c1_43, %c0_44, %c0_45] : memref<5x28x256xbf16, #tpu.memory_space<vmem>>, vector<1x28x256xbf16>
    %52 = vector.shape_cast %51 : vector<1x28x256xbf16> to vector<28x256xbf16>
    %cst_46 = arith.constant dense<0.000000e+00> : vector<48x256xf32>
    %53 = tpu.matmul %10, %52, %cst_46 {dimension_numbers = #tpu.dot_dimension_numbers<[1], [0], [0], [1], [0, 0, 1, 1], [], []>} : vector<48x28xbf16>, vector<28x256xbf16>, vector<48x256xf32> -> vector<48x256xf32>
    %54 = arith.addf %50, %53 : vector<48x256xf32>
    %c2_47 = arith.constant 2 : index
    %c0_48 = arith.constant 0 : index
    %c0_49 = arith.constant 0 : index
    %55 = vector.load %arg2[%c2_47, %c0_48, %c0_49] : memref<5x28x256xbf16, #tpu.memory_space<vmem>>, vector<1x28x256xbf16>
    %56 = vector.shape_cast %55 : vector<1x28x256xbf16> to vector<28x256xbf16>
    %cst_50 = arith.constant dense<0.000000e+00> : vector<48x256xf32>
    %57 = tpu.matmul %13, %56, %cst_50 {dimension_numbers = #tpu.dot_dimension_numbers<[1], [0], [0], [1], [0, 0, 1, 1], [], []>} : vector<48x28xbf16>, vector<28x256xbf16>, vector<48x256xf32> -> vector<48x256xf32>
    %58 = arith.addf %54, %57 : vector<48x256xf32>
    %c3_51 = arith.constant 3 : index
    %c0_52 = arith.constant 0 : index
    %c0_53 = arith.constant 0 : index
    %59 = vector.load %arg2[%c3_51, %c0_52, %c0_53] : memref<5x28x256xbf16, #tpu.memory_space<vmem>>, vector<1x28x256xbf16>
    %60 = vector.shape_cast %59 : vector<1x28x256xbf16> to vector<28x256xbf16>
    %cst_54 = arith.constant dense<0.000000e+00> : vector<48x256xf32>
    %61 = tpu.matmul %16, %60, %cst_54 {dimension_numbers = #tpu.dot_dimension_numbers<[1], [0], [0], [1], [0, 0, 1, 1], [], []>} : vector<48x28xbf16>, vector<28x256xbf16>, vector<48x256xf32> -> vector<48x256xf32>
    %62 = arith.addf %58, %61 : vector<48x256xf32>
    %c4_55 = arith.constant 4 : index
    %c0_56 = arith.constant 0 : index
    %c0_57 = arith.constant 0 : index
    %63 = vector.load %arg2[%c4_55, %c0_56, %c0_57] : memref<5x28x256xbf16, #tpu.memory_space<vmem>>, vector<1x28x256xbf16>
    %64 = vector.shape_cast %63 : vector<1x28x256xbf16> to vector<28x256xbf16>
    %cst_58 = arith.constant dense<0.000000e+00> : vector<48x256xf32>
    %65 = tpu.matmul %19, %64, %cst_58 {dimension_numbers = #tpu.dot_dimension_numbers<[1], [0], [0], [1], [0, 0, 1, 1], [], []>} : vector<48x28xbf16>, vector<28x256xbf16>, vector<48x256xf32> -> vector<48x256xf32>
    %66 = arith.addf %62, %65 : vector<48x256xf32>
    %67 = vector.extract_strided_slice %66 {offsets = [0, 0], sizes = [48, 128], strides = [1, 1]} : vector<48x256xf32> to vector<48x128xf32>
    %68 = vector.extract_strided_slice %66 {offsets = [0, 128], sizes = [48, 128], strides = [1, 1]} : vector<48x256xf32> to vector<48x128xf32>
    %69 = arith.maximumf %67, %68 : vector<48x128xf32>
    %70 = arith.maximumf %47, %69 : vector<48x128xf32>
    %71 = vector.broadcast %0 : vector<1x128xf32> to vector<48x128xf32>
    %72 = arith.addf %70, %71 : vector<48x128xf32>
    %cst_59 = arith.constant 0.000000e+00 : f32
    %73 = vector.broadcast %cst_59 : f32 to vector<48x128xf32>
    %74 = arith.maximumf %72, %73 : vector<48x128xf32>
    %c0_60 = arith.constant 0 : index
    %c0_61 = arith.constant 0 : index
    %75 = vector.load %arg11[%c0_60, %c0_61] : memref<48x128xf32, #tpu.memory_space<vmem>>, vector<48x128xf32>
    tpu.vector_store %arg11[%c0_60, %c0_61], %74 {strides = array<i32>} : memref<48x128xf32, #tpu.memory_space<vmem>>, vector<48x128xf32>,
    %c0_62 = arith.constant 0 : index
    %c0_63 = arith.constant 0 : index
    %c0_64 = arith.constant 0 : index
    %76 = vector.load %arg2[%c0_62, %c0_63, %c0_64] : memref<5x28x256xbf16, #tpu.memory_space<vmem>>, vector<1x28x256xbf16>
    %77 = vector.shape_cast %76 : vector<1x28x256xbf16> to vector<28x256xbf16>
    %cst_65 = arith.constant dense<0.000000e+00> : vector<48x256xf32>
    %78 = tpu.matmul %10, %77, %cst_65 {dimension_numbers = #tpu.dot_dimension_numbers<[1], [0], [0], [1], [0, 0, 1, 1], [], []>} : vector<48x28xbf16>, vector<28x256xbf16>, vector<48x256xf32> -> vector<48x256xf32>
    %c1_66 = arith.constant 1 : index
    %c0_67 = arith.constant 0 : index
    %c0_68 = arith.constant 0 : index
    %79 = vector.load %arg2[%c1_66, %c0_67, %c0_68] : memref<5x28x256xbf16, #tpu.memory_space<vmem>>, vector<1x28x256xbf16>
    %80 = vector.shape_cast %79 : vector<1x28x256xbf16> to vector<28x256xbf16>
    %cst_69 = arith.constant dense<0.000000e+00> : vector<48x256xf32>
    %81 = tpu.matmul %13, %80, %cst_69 {dimension_numbers = #tpu.dot_dimension_numbers<[1], [0], [0], [1], [0, 0, 1, 1], [], []>} : vector<48x28xbf16>, vector<28x256xbf16>, vector<48x256xf32> -> vector<48x256xf32>
    %82 = arith.addf %78, %81 : vector<48x256xf32>
    %c2_70 = arith.constant 2 : index
    %c0_71 = arith.constant 0 : index
    %c0_72 = arith.constant 0 : index
    %83 = vector.load %arg2[%c2_70, %c0_71, %c0_72] : memref<5x28x256xbf16, #tpu.memory_space<vmem>>, vector<1x28x256xbf16>
    %84 = vector.shape_cast %83 : vector<1x28x256xbf16> to vector<28x256xbf16>
    %cst_73 = arith.constant dense<0.000000e+00> : vector<48x256xf32>
    %85 = tpu.matmul %16, %84, %cst_73 {dimension_numbers = #tpu.dot_dimension_numbers<[1], [0], [0], [1], [0, 0, 1, 1], [], []>} : vector<48x28xbf16>, vector<28x256xbf16>, vector<48x256xf32> -> vector<48x256xf32>
    %86 = arith.addf %82, %85 : vector<48x256xf32>
    %c3_74 = arith.constant 3 : index
    %c0_75 = arith.constant 0 : index
    %c0_76 = arith.constant 0 : index
    %87 = vector.load %arg2[%c3_74, %c0_75, %c0_76] : memref<5x28x256xbf16, #tpu.memory_space<vmem>>, vector<1x28x256xbf16>
    %88 = vector.shape_cast %87 : vector<1x28x256xbf16> to vector<28x256xbf16>
    %cst_77 = arith.constant dense<0.000000e+00> : vector<48x256xf32>
    %89 = tpu.matmul %19, %88, %cst_77 {dimension_numbers = #tpu.dot_dimension_numbers<[1], [0], [0], [1], [0, 0, 1, 1], [], []>} : vector<48x28xbf16>, vector<28x256xbf16>, vector<48x256xf32> -> vector<48x256xf32>
    %90 = arith.addf %86, %89 : vector<48x256xf32>
    %c4_78 = arith.constant 4 : index
    %c0_79 = arith.constant 0 : index
    %c0_80 = arith.constant 0 : index
    %91 = vector.load %arg2[%c4_78, %c0_79, %c0_80] : memref<5x28x256xbf16, #tpu.memory_space<vmem>>, vector<1x28x256xbf16>
    %92 = vector.shape_cast %91 : vector<1x28x256xbf16> to vector<28x256xbf16>
    %cst_81 = arith.constant dense<0.000000e+00> : vector<48x256xf32>
    %93 = tpu.matmul %22, %92, %cst_81 {dimension_numbers = #tpu.dot_dimension_numbers<[1], [0], [0], [1], [0, 0, 1, 1], [], []>} : vector<48x28xbf16>, vector<28x256xbf16>, vector<48x256xf32> -> vector<48x256xf32>
    %94 = arith.addf %90, %93 : vector<48x256xf32>
    %95 = vector.extract_strided_slice %94 {offsets = [0, 0], sizes = [48, 128], strides = [1, 1]} : vector<48x256xf32> to vector<48x128xf32>
    %96 = vector.extract_strided_slice %94 {offsets = [0, 128], sizes = [48, 128], strides = [1, 1]} : vector<48x256xf32> to vector<48x128xf32>
    %97 = arith.maximumf %95, %96 : vector<48x128xf32>
    %c0_82 = arith.constant 0 : index
    %c0_83 = arith.constant 0 : index
    %c0_84 = arith.constant 0 : index
    %98 = vector.load %arg2[%c0_82, %c0_83, %c0_84] : memref<5x28x256xbf16, #tpu.memory_space<vmem>>, vector<1x28x256xbf16>
    %99 = vector.shape_cast %98 : vector<1x28x256xbf16> to vector<28x256xbf16>
    %cst_85 = arith.constant dense<0.000000e+00> : vector<48x256xf32>
    %100 = tpu.matmul %13, %99, %cst_85 {dimension_numbers = #tpu.dot_dimension_numbers<[1], [0], [0], [1], [0, 0, 1, 1], [], []>} : vector<48x28xbf16>, vector<28x256xbf16>, vector<48x256xf32> -> vector<48x256xf32>
    %c1_86 = arith.constant 1 : index
    %c0_87 = arith.constant 0 : index
    %c0_88 = arith.constant 0 : index
    %101 = vector.load %arg2[%c1_86, %c0_87, %c0_88] : memref<5x28x256xbf16, #tpu.memory_space<vmem>>, vector<1x28x256xbf16>
    %102 = vector.shape_cast %101 : vector<1x28x256xbf16> to vector<28x256xbf16>
    %cst_89 = arith.constant dense<0.000000e+00> : vector<48x256xf32>
    %103 = tpu.matmul %16, %102, %cst_89 {dimension_numbers = #tpu.dot_dimension_numbers<[1], [0], [0], [1], [0, 0, 1, 1], [], []>} : vector<48x28xbf16>, vector<28x256xbf16>, vector<48x256xf32> -> vector<48x256xf32>
    %104 = arith.addf %100, %103 : vector<48x256xf32>
    %c2_90 = arith.constant 2 : index
    %c0_91 = arith.constant 0 : index
    %c0_92 = arith.constant 0 : index
    %105 = vector.load %arg2[%c2_90, %c0_91, %c0_92] : memref<5x28x256xbf16, #tpu.memory_space<vmem>>, vector<1x28x256xbf16>
    %106 = vector.shape_cast %105 : vector<1x28x256xbf16> to vector<28x256xbf16>
    %cst_93 = arith.constant dense<0.000000e+00> : vector<48x256xf32>
    %107 = tpu.matmul %19, %106, %cst_93 {dimension_numbers = #tpu.dot_dimension_numbers<[1], [0], [0], [1], [0, 0, 1, 1], [], []>} : vector<48x28xbf16>, vector<28x256xbf16>, vector<48x256xf32> -> vector<48x256xf32>
    %108 = arith.addf %104, %107 : vector<48x256xf32>
    %c3_94 = arith.constant 3 : index
    %c0_95 = arith.constant 0 : index
    %c0_96 = arith.constant 0 : index
    %109 = vector.load %arg2[%c3_94, %c0_95, %c0_96] : memref<5x28x256xbf16, #tpu.memory_space<vmem>>, vector<1x28x256xbf16>
    %110 = vector.shape_cast %109 : vector<1x28x256xbf16> to vector<28x256xbf16>
    %cst_97 = arith.constant dense<0.000000e+00> : vector<48x256xf32>
    %111 = tpu.matmul %22, %110, %cst_97 {dimension_numbers = #tpu.dot_dimension_numbers<[1], [0], [0], [1], [0, 0, 1, 1], [], []>} : vector<48x28xbf16>, vector<28x256xbf16>, vector<48x256xf32> -> vector<48x256xf32>
    %112 = arith.addf %108, %111 : vector<48x256xf32>
    %c4_98 = arith.constant 4 : index
    %c0_99 = arith.constant 0 : index
    %c0_100 = arith.constant 0 : index
    %113 = vector.load %arg2[%c4_98, %c0_99, %c0_100] : memref<5x28x256xbf16, #tpu.memory_space<vmem>>, vector<1x28x256xbf16>
    %114 = vector.shape_cast %113 : vector<1x28x256xbf16> to vector<28x256xbf16>
    %cst_101 = arith.constant dense<0.000000e+00> : vector<48x256xf32>
    %115 = tpu.matmul %25, %114, %cst_101 {dimension_numbers = #tpu.dot_dimension_numbers<[1], [0], [0], [1], [0, 0, 1, 1], [], []>} : vector<48x28xbf16>, vector<28x256xbf16>, vector<48x256xf32> -> vector<48x256xf32>
    %116 = arith.addf %112, %115 : vector<48x256xf32>
    %117 = vector.extract_strided_slice %116 {offsets = [0, 0], sizes = [48, 128], strides = [1, 1]} : vector<48x256xf32> to vector<48x128xf32>
    %118 = vector.extract_strided_slice %116 {offsets = [0, 128], sizes = [48, 128], strides = [1, 1]} : vector<48x256xf32> to vector<48x128xf32>
    %119 = arith.maximumf %117, %118 : vector<48x128xf32>
    %120 = arith.maximumf %97, %119 : vector<48x128xf32>
    %121 = vector.broadcast %0 : vector<1x128xf32> to vector<48x128xf32>
    %122 = arith.addf %120, %121 : vector<48x128xf32>
    %cst_102 = arith.constant 0.000000e+00 : f32
    %123 = vector.broadcast %cst_102 : f32 to vector<48x128xf32>
    %124 = arith.maximumf %122, %123 : vector<48x128xf32>
    %c0_103 = arith.constant 0 : index
    %c0_104 = arith.constant 0 : index
    %125 = vector.load %arg12[%c0_103, %c0_104] : memref<48x128xf32, #tpu.memory_space<vmem>>, vector<48x128xf32>
    tpu.vector_store %arg12[%c0_103, %c0_104], %124 {strides = array<i32>} : memref<48x128xf32, #tpu.memory_space<vmem>>, vector<48x128xf32>,
    %c0_105 = arith.constant 0 : index
    %c0_106 = arith.constant 0 : index
    %126 = vector.load %arg11[%c0_105, %c0_106] : memref<48x128xf32, #tpu.memory_space<vmem>>, vector<48x128xf32>
    %c0_107 = arith.constant 0 : index
    %c0_108 = arith.constant 0 : index
    %127 = vector.load %arg12[%c0_107, %c0_108] : memref<48x128xf32, #tpu.memory_space<vmem>>, vector<48x128xf32>
    %128 = vector.extract_strided_slice %126 {offsets = [0, 0], sizes = [32, 128], strides = [1, 1]} : vector<48x128xf32> to vector<32x128xf32>
    %129 = arith.truncf %128 : vector<32x128xf32> to vector<32x128xbf16>
    %130 = vector.extract_strided_slice %127 {offsets = [0, 0], sizes = [32, 128], strides = [1, 1]} : vector<48x128xf32> to vector<32x128xf32>
    %131 = arith.truncf %130 : vector<32x128xf32> to vector<32x128xbf16>
    %132 = vector.extract_strided_slice %126 {offsets = [8, 0], sizes = [32, 128], strides = [1, 1]} : vector<48x128xf32> to vector<32x128xf32>
    %133 = arith.truncf %132 : vector<32x128xf32> to vector<32x128xbf16>
    %134 = vector.extract_strided_slice %127 {offsets = [8, 0], sizes = [32, 128], strides = [1, 1]} : vector<48x128xf32> to vector<32x128xf32>
    %135 = arith.truncf %134 : vector<32x128xf32> to vector<32x128xbf16>
    %136 = vector.extract_strided_slice %126 {offsets = [16, 0], sizes = [32, 128], strides = [1, 1]} : vector<48x128xf32> to vector<32x128xf32>
    %137 = arith.truncf %136 : vector<32x128xf32> to vector<32x128xbf16>
    %138 = vector.extract_strided_slice %127 {offsets = [16, 0], sizes = [32, 128], strides = [1, 1]} : vector<48x128xf32> to vector<32x128xf32>
    %139 = arith.truncf %138 : vector<32x128xf32> to vector<32x128xbf16>
    %c0_109 = arith.constant 0 : index
    %c0_110 = arith.constant 0 : index
    %c0_111 = arith.constant 0 : index
    %140 = vector.load %arg4[%c0_109, %c0_110, %c0_111] : memref<5x128x256xbf16, #tpu.memory_space<vmem>>, vector<1x128x256xbf16>
    %141 = vector.shape_cast %140 : vector<1x128x256xbf16> to vector<128x256xbf16>
    %cst_112 = arith.constant dense<0.000000e+00> : vector<32x256xf32>
    %142 = tpu.matmul %129, %141, %cst_112 {dimension_numbers = #tpu.dot_dimension_numbers<[1], [0], [0], [1], [0, 0, 1, 1], [], []>} : vector<32x128xbf16>, vector<128x256xbf16>, vector<32x256xf32> -> vector<32x256xf32>
    %c1_113 = arith.constant 1 : index
    %c0_114 = arith.constant 0 : index
    %c0_115 = arith.constant 0 : index
    %143 = vector.load %arg4[%c1_113, %c0_114, %c0_115] : memref<5x128x256xbf16, #tpu.memory_space<vmem>>, vector<1x128x256xbf16>
    %144 = vector.shape_cast %143 : vector<1x128x256xbf16> to vector<128x256xbf16>
    %cst_116 = arith.constant dense<0.000000e+00> : vector<32x256xf32>
    %145 = tpu.matmul %131, %144, %cst_116 {dimension_numbers = #tpu.dot_dimension_numbers<[1], [0], [0], [1], [0, 0, 1, 1], [], []>} : vector<32x128xbf16>, vector<128x256xbf16>, vector<32x256xf32> -> vector<32x256xf32>
    %146 = arith.addf %142, %145 : vector<32x256xf32>
    %c2_117 = arith.constant 2 : index
    %c0_118 = arith.constant 0 : index
    %c0_119 = arith.constant 0 : index
    %147 = vector.load %arg4[%c2_117, %c0_118, %c0_119] : memref<5x128x256xbf16, #tpu.memory_space<vmem>>, vector<1x128x256xbf16>
    %148 = vector.shape_cast %147 : vector<1x128x256xbf16> to vector<128x256xbf16>
    %cst_120 = arith.constant dense<0.000000e+00> : vector<32x256xf32>
    %149 = tpu.matmul %133, %148, %cst_120 {dimension_numbers = #tpu.dot_dimension_numbers<[1], [0], [0], [1], [0, 0, 1, 1], [], []>} : vector<32x128xbf16>, vector<128x256xbf16>, vector<32x256xf32> -> vector<32x256xf32>
    %150 = arith.addf %146, %149 : vector<32x256xf32>
    %c3_121 = arith.constant 3 : index
    %c0_122 = arith.constant 0 : index
    %c0_123 = arith.constant 0 : index
    %151 = vector.load %arg4[%c3_121, %c0_122, %c0_123] : memref<5x128x256xbf16, #tpu.memory_space<vmem>>, vector<1x128x256xbf16>
    %152 = vector.shape_cast %151 : vector<1x128x256xbf16> to vector<128x256xbf16>
    %cst_124 = arith.constant dense<0.000000e+00> : vector<32x256xf32>
    %153 = tpu.matmul %135, %152, %cst_124 {dimension_numbers = #tpu.dot_dimension_numbers<[1], [0], [0], [1], [0, 0, 1, 1], [], []>} : vector<32x128xbf16>, vector<128x256xbf16>, vector<32x256xf32> -> vector<32x256xf32>
    %154 = arith.addf %150, %153 : vector<32x256xf32>
    %c4_125 = arith.constant 4 : index
    %c0_126 = arith.constant 0 : index
    %c0_127 = arith.constant 0 : index
    %155 = vector.load %arg4[%c4_125, %c0_126, %c0_127] : memref<5x128x256xbf16, #tpu.memory_space<vmem>>, vector<1x128x256xbf16>
    %156 = vector.shape_cast %155 : vector<1x128x256xbf16> to vector<128x256xbf16>
    %cst_128 = arith.constant dense<0.000000e+00> : vector<32x256xf32>
    %157 = tpu.matmul %137, %156, %cst_128 {dimension_numbers = #tpu.dot_dimension_numbers<[1], [0], [0], [1], [0, 0, 1, 1], [], []>} : vector<32x128xbf16>, vector<128x256xbf16>, vector<32x256xf32> -> vector<32x256xf32>
    %158 = arith.addf %154, %157 : vector<32x256xf32>
    %159 = vector.extract_strided_slice %158 {offsets = [0, 0], sizes = [32, 128], strides = [1, 1]} : vector<32x256xf32> to vector<32x128xf32>
    %160 = vector.extract_strided_slice %158 {offsets = [0, 128], sizes = [32, 128], strides = [1, 1]} : vector<32x256xf32> to vector<32x128xf32>
    %161 = arith.maximumf %159, %160 : vector<32x128xf32>
    %c0_129 = arith.constant 0 : index
    %c0_130 = arith.constant 0 : index
    %c0_131 = arith.constant 0 : index
    %162 = vector.load %arg4[%c0_129, %c0_130, %c0_131] : memref<5x128x256xbf16, #tpu.memory_space<vmem>>, vector<1x128x256xbf16>
    %163 = vector.shape_cast %162 : vector<1x128x256xbf16> to vector<128x256xbf16>
    %cst_132 = arith.constant dense<0.000000e+00> : vector<32x256xf32>
    %164 = tpu.matmul %131, %163, %cst_132 {dimension_numbers = #tpu.dot_dimension_numbers<[1], [0], [0], [1], [0, 0, 1, 1], [], []>} : vector<32x128xbf16>, vector<128x256xbf16>, vector<32x256xf32> -> vector<32x256xf32>
    %c1_133 = arith.constant 1 : index
    %c0_134 = arith.constant 0 : index
    %c0_135 = arith.constant 0 : index
    %165 = vector.load %arg4[%c1_133, %c0_134, %c0_135] : memref<5x128x256xbf16, #tpu.memory_space<vmem>>, vector<1x128x256xbf16>
    %166 = vector.shape_cast %165 : vector<1x128x256xbf16> to vector<128x256xbf16>
    %cst_136 = arith.constant dense<0.000000e+00> : vector<32x256xf32>
    %167 = tpu.matmul %133, %166, %cst_136 {dimension_numbers = #tpu.dot_dimension_numbers<[1], [0], [0], [1], [0, 0, 1, 1], [], []>} : vector<32x128xbf16>, vector<128x256xbf16>, vector<32x256xf32> -> vector<32x256xf32>
    %168 = arith.addf %164, %167 : vector<32x256xf32>
    %c2_137 = arith.constant 2 : index
    %c0_138 = arith.constant 0 : index
    %c0_139 = arith.constant 0 : index
    %169 = vector.load %arg4[%c2_137, %c0_138, %c0_139] : memref<5x128x256xbf16, #tpu.memory_space<vmem>>, vector<1x128x256xbf16>
    %170 = vector.shape_cast %169 : vector<1x128x256xbf16> to vector<128x256xbf16>
    %cst_140 = arith.constant dense<0.000000e+00> : vector<32x256xf32>
    %171 = tpu.matmul %135, %170, %cst_140 {dimension_numbers = #tpu.dot_dimension_numbers<[1], [0], [0], [1], [0, 0, 1, 1], [], []>} : vector<32x128xbf16>, vector<128x256xbf16>, vector<32x256xf32> -> vector<32x256xf32>
    %172 = arith.addf %168, %171 : vector<32x256xf32>
    %c3_141 = arith.constant 3 : index
    %c0_142 = arith.constant 0 : index
    %c0_143 = arith.constant 0 : index
    %173 = vector.load %arg4[%c3_141, %c0_142, %c0_143] : memref<5x128x256xbf16, #tpu.memory_space<vmem>>, vector<1x128x256xbf16>
    %174 = vector.shape_cast %173 : vector<1x128x256xbf16> to vector<128x256xbf16>
    %cst_144 = arith.constant dense<0.000000e+00> : vector<32x256xf32>
    %175 = tpu.matmul %137, %174, %cst_144 {dimension_numbers = #tpu.dot_dimension_numbers<[1], [0], [0], [1], [0, 0, 1, 1], [], []>} : vector<32x128xbf16>, vector<128x256xbf16>, vector<32x256xf32> -> vector<32x256xf32>
    %176 = arith.addf %172, %175 : vector<32x256xf32>
    %c4_145 = arith.constant 4 : index
    %c0_146 = arith.constant 0 : index
    %c0_147 = arith.constant 0 : index
    %177 = vector.load %arg4[%c4_145, %c0_146, %c0_147] : memref<5x128x256xbf16, #tpu.memory_space<vmem>>, vector<1x128x256xbf16>
    %178 = vector.shape_cast %177 : vector<1x128x256xbf16> to vector<128x256xbf16>
    %cst_148 = arith.constant dense<0.000000e+00> : vector<32x256xf32>
    %179 = tpu.matmul %139, %178, %cst_148 {dimension_numbers = #tpu.dot_dimension_numbers<[1], [0], [0], [1], [0, 0, 1, 1], [], []>} : vector<32x128xbf16>, vector<128x256xbf16>, vector<32x256xf32> -> vector<32x256xf32>
    %180 = arith.addf %176, %179 : vector<32x256xf32>
    %181 = vector.extract_strided_slice %180 {offsets = [0, 0], sizes = [32, 128], strides = [1, 1]} : vector<32x256xf32> to vector<32x128xf32>
    %182 = vector.extract_strided_slice %180 {offsets = [0, 128], sizes = [32, 128], strides = [1, 1]} : vector<32x256xf32> to vector<32x128xf32>
    %183 = arith.maximumf %181, %182 : vector<32x128xf32>
    %184 = arith.maximumf %161, %183 : vector<32x128xf32>
    %185 = vector.broadcast %1 : vector<1x128xf32> to vector<32x128xf32>
    %186 = arith.addf %184, %185 : vector<32x128xf32>
    %cst_149 = arith.constant 0.000000e+00 : f32
    %187 = vector.broadcast %cst_149 : f32 to vector<32x128xf32>
    %188 = arith.maximumf %186, %187 : vector<32x128xf32>
    %189 = vector.extract_strided_slice %188 {offsets = [0, 0], sizes = [8, 128], strides = [1, 1]} : vector<32x128xf32> to vector<8x128xf32>
    %190 = arith.truncf %189 : vector<8x128xf32> to vector<8x128xbf16>
    %c0_150 = arith.constant 0 : index
    %c0_151 = arith.constant 0 : index
    %c0_152 = arith.constant 0 : index
    %191 = vector.load %arg6[%c0_150, %c0_151, %c0_152] : memref<4x128x64xbf16, #tpu.memory_space<vmem>>, vector<1x128x64xbf16>
    %192 = vector.shape_cast %191 : vector<1x128x64xbf16> to vector<128x64xbf16>
    %cst_153 = arith.constant dense<0.000000e+00> : vector<8x64xf32>
    %193 = tpu.matmul %190, %192, %cst_153 {dimension_numbers = #tpu.dot_dimension_numbers<[1], [0], [0], [1], [0, 0, 1, 1], [], []>} : vector<8x128xbf16>, vector<128x64xbf16>, vector<8x64xf32> -> vector<8x64xf32>
    %194 = vector.extract_strided_slice %188 {offsets = [8, 0], sizes = [8, 128], strides = [1, 1]} : vector<32x128xf32> to vector<8x128xf32>
    %195 = arith.truncf %194 : vector<8x128xf32> to vector<8x128xbf16>
    %c1_154 = arith.constant 1 : index
    %c0_155 = arith.constant 0 : index
    %c0_156 = arith.constant 0 : index
    %196 = vector.load %arg6[%c1_154, %c0_155, %c0_156] : memref<4x128x64xbf16, #tpu.memory_space<vmem>>, vector<1x128x64xbf16>
    %197 = vector.shape_cast %196 : vector<1x128x64xbf16> to vector<128x64xbf16>
    %cst_157 = arith.constant dense<0.000000e+00> : vector<8x64xf32>
    %198 = tpu.matmul %195, %197, %cst_157 {dimension_numbers = #tpu.dot_dimension_numbers<[1], [0], [0], [1], [0, 0, 1, 1], [], []>} : vector<8x128xbf16>, vector<128x64xbf16>, vector<8x64xf32> -> vector<8x64xf32>
    %199 = arith.addf %193, %198 : vector<8x64xf32>
    %200 = vector.extract_strided_slice %188 {offsets = [16, 0], sizes = [8, 128], strides = [1, 1]} : vector<32x128xf32> to vector<8x128xf32>
    %201 = arith.truncf %200 : vector<8x128xf32> to vector<8x128xbf16>
    %c2_158 = arith.constant 2 : index
    %c0_159 = arith.constant 0 : index
    %c0_160 = arith.constant 0 : index
    %202 = vector.load %arg6[%c2_158, %c0_159, %c0_160] : memref<4x128x64xbf16, #tpu.memory_space<vmem>>, vector<1x128x64xbf16>
    %203 = vector.shape_cast %202 : vector<1x128x64xbf16> to vector<128x64xbf16>
    %cst_161 = arith.constant dense<0.000000e+00> : vector<8x64xf32>
    %204 = tpu.matmul %201, %203, %cst_161 {dimension_numbers = #tpu.dot_dimension_numbers<[1], [0], [0], [1], [0, 0, 1, 1], [], []>} : vector<8x128xbf16>, vector<128x64xbf16>, vector<8x64xf32> -> vector<8x64xf32>
    %205 = arith.addf %199, %204 : vector<8x64xf32>
    %206 = vector.extract_strided_slice %188 {offsets = [24, 0], sizes = [8, 128], strides = [1, 1]} : vector<32x128xf32> to vector<8x128xf32>
    %207 = arith.truncf %206 : vector<8x128xf32> to vector<8x128xbf16>
    %c3_162 = arith.constant 3 : index
    %c0_163 = arith.constant 0 : index
    %c0_164 = arith.constant 0 : index
    %208 = vector.load %arg6[%c3_162, %c0_163, %c0_164] : memref<4x128x64xbf16, #tpu.memory_space<vmem>>, vector<1x128x64xbf16>
    %209 = vector.shape_cast %208 : vector<1x128x64xbf16> to vector<128x64xbf16>
    %cst_165 = arith.constant dense<0.000000e+00> : vector<8x64xf32>
    %210 = tpu.matmul %207, %209, %cst_165 {dimension_numbers = #tpu.dot_dimension_numbers<[1], [0], [0], [1], [0, 0, 1, 1], [], []>} : vector<8x128xbf16>, vector<128x64xbf16>, vector<8x64xf32> -> vector<8x64xf32>
    %211 = arith.addf %205, %210 : vector<8x64xf32>
    %c0_166 = arith.constant 0 : index
    %c0_167 = arith.constant 0 : index
    %212 = vector.load %arg7[%c0_166, %c0_167] : memref<1x64xf32, #tpu.memory_space<vmem>>, vector<1x64xf32>
    %213 = vector.broadcast %212 : vector<1x64xf32> to vector<8x64xf32>
    %214 = arith.addf %211, %213 : vector<8x64xf32>
    %cst_168 = arith.constant 0.000000e+00 : f32
    %215 = vector.broadcast %cst_168 : f32 to vector<8x64xf32>
    %216 = arith.maximumf %214, %215 : vector<8x64xf32>
    %217 = arith.truncf %216 : vector<8x64xf32> to vector<8x64xbf16>
    %c0_169 = arith.constant 0 : index
    %c0_170 = arith.constant 0 : index
    %218 = vector.load %arg8[%c0_169, %c0_170] : memref<64x128xbf16, #tpu.memory_space<vmem>>, vector<64x128xbf16>
    %cst_171 = arith.constant dense<0.000000e+00> : vector<8x128xf32>
    %219 = tpu.matmul %217, %218, %cst_171 {dimension_numbers = #tpu.dot_dimension_numbers<[1], [0], [0], [1], [0, 0, 1, 1], [], []>} : vector<8x64xbf16>, vector<64x128xbf16>, vector<8x128xf32> -> vector<8x128xf32>
    %c0_172 = arith.constant 0 : index
    %c0_173 = arith.constant 0 : index
    %220 = vector.load %arg9[%c0_172, %c0_173] : memref<1x128xf32, #tpu.memory_space<vmem>>, vector<1x128xf32>
    %221 = vector.broadcast %220 : vector<1x128xf32> to vector<8x128xf32>
    %222 = arith.addf %219, %221 : vector<8x128xf32>
    %223 = tpu.iota {dimensions = array<i32: 1>} : vector<8x128xi32>
    %c10_i32 = arith.constant 10 : i32
    %224 = vector.broadcast %c10_i32 : i32 to vector<8x128xi32>
    %225 = arith.cmpi slt, %223, %224 : vector<8x128xi32>
    %cst_174 = arith.constant -1.000000e+30 : f32
    %226 = vector.broadcast %cst_174 : f32 to vector<8x128xf32>
    %227 = arith.select %225, %222, %226 : vector<8x128xi1>, vector<8x128xf32>
    %cst_175 = arith.constant dense<0xFF800000> : vector<8xf32>
    %228 = vector.multi_reduction <maximumf>, %227, %cst_175 [1] : vector<8x128xf32> to vector<8xf32>
    %229 = vector.shape_cast %228 : vector<8xf32> to vector<8x1xf32>
    %230 = vector.broadcast %229 : vector<8x1xf32> to vector<8x128xf32>
    %231 = arith.subf %222, %230 : vector<8x128xf32>
    %232 = math.exp %231 : vector<8x128xf32>
    %cst_176 = arith.constant 0.000000e+00 : f32
    %233 = vector.broadcast %cst_176 : f32 to vector<8x128xf32>
    %234 = arith.select %225, %232, %233 : vector<8x128xi1>, vector<8x128xf32>
    %cst_177 = arith.constant dense<0.000000e+00> : vector<8xf32>
    %235 = vector.multi_reduction <add>, %234, %cst_177 [1] : vector<8x128xf32> to vector<8xf32>
    %236 = vector.shape_cast %235 : vector<8xf32> to vector<8x1xf32>
    %237 = math.log %236 : vector<8x1xf32>
    %238 = arith.addf %229, %237 : vector<8x1xf32>
    %239 = vector.broadcast %238 : vector<8x1xf32> to vector<8x128xf32>
    %240 = arith.subf %222, %239 : vector<8x128xf32>
    %c0_178 = arith.constant 0 : index
    %c0_179 = arith.constant 0 : index
    %241 = vector.load %arg10[%c0_178, %c0_179] : memref<8x128xf32, #tpu.memory_space<vmem>>, vector<8x128xf32>
    tpu.vector_store %arg10[%c0_178, %c0_179], %240 {strides = array<i32>} : memref<8x128xf32, #tpu.memory_space<vmem>>, vector<8x128xf32>,
    return
  }
  func.func @transform_0(%arg0: i32) -> (i32, i32, i32) {
    %c0_i32 = arith.constant 0 : i32
    %c0_i32_0 = arith.constant 0 : i32
    %c0_i32_1 = arith.constant 0 : i32
    return %c0_i32, %arg0, %c0_i32_0 : i32, i32, i32
  }
  func.func @transform_1(%arg0: i32) -> (i32, i32, i32) {
    %c0_i32 = arith.constant 0 : i32
    %c0_i32_0 = arith.constant 0 : i32
    %c0_i32_1 = arith.constant 0 : i32
    %c0_i32_2 = arith.constant 0 : i32
    return %c0_i32, %c0_i32_0, %c0_i32_1 : i32, i32, i32
  }
  func.func @transform_2(%arg0: i32) -> (i32, i32) {
    %c0_i32 = arith.constant 0 : i32
    %c0_i32_0 = arith.constant 0 : i32
    %c0_i32_1 = arith.constant 0 : i32
    return %c0_i32, %c0_i32_0 : i32, i32
  }
  func.func @transform_3(%arg0: i32) -> (i32, i32, i32) {
    %c0_i32 = arith.constant 0 : i32
    %c0_i32_0 = arith.constant 0 : i32
    %c0_i32_1 = arith.constant 0 : i32
    %c0_i32_2 = arith.constant 0 : i32
    return %c0_i32, %c0_i32_0, %c0_i32_1 : i32, i32, i32
  }
  func.func @transform_4(%arg0: i32) -> (i32, i32) {
    %c0_i32 = arith.constant 0 : i32
    %c0_i32_0 = arith.constant 0 : i32
    %c0_i32_1 = arith.constant 0 : i32
    return %c0_i32, %c0_i32_0 : i32, i32
  }
  func.func @transform_5(%arg0: i32) -> (i32, i32, i32) {
    %c0_i32 = arith.constant 0 : i32
    %c0_i32_0 = arith.constant 0 : i32
    %c0_i32_1 = arith.constant 0 : i32
    %c0_i32_2 = arith.constant 0 : i32
    return %c0_i32, %c0_i32_0, %c0_i32_1 : i32, i32, i32
  }
  func.func @transform_6(%arg0: i32) -> (i32, i32) {
    %c0_i32 = arith.constant 0 : i32
    %c0_i32_0 = arith.constant 0 : i32
    %c0_i32_1 = arith.constant 0 : i32
    return %c0_i32, %c0_i32_0 : i32, i32
  }
  func.func @transform_7(%arg0: i32) -> (i32, i32) {
    %c0_i32 = arith.constant 0 : i32
    %c0_i32_0 = arith.constant 0 : i32
    %c0_i32_1 = arith.constant 0 : i32
    return %c0_i32, %c0_i32_0 : i32, i32
  }
  func.func @transform_8(%arg0: i32) -> (i32, i32) {
    %c0_i32 = arith.constant 0 : i32
    %c0_i32_0 = arith.constant 0 : i32
    %c0_i32_1 = arith.constant 0 : i32
    return %c0_i32, %c0_i32_0 : i32, i32
  }
  func.func @transform_9(%arg0: i32) -> (i32, i32) {
    %c0_i32 = arith.constant 0 : i32
    %c0_i32_0 = arith.constant 0 : i32
    return %arg0, %c0_i32 : i32, i32
  }
}

</mosaic_0001>

<bundles_post_ra>
// kernel: net_forward.1
= control target key start
LH: loop header
LB: loop body
LE: loop exit
PB: predicated region body
PF: predicated region fallthrough
CT: control target
= control target key end

     0   :  { %vm151_vm0 = vcmask 1045504   ;;  %v6269_v2 = vmov 0   ;;  %vm141_vm1 = vcmask 228352   ;;  %vm4384_vm2 = vmmov 0   ;;  %s6259_s1 = inlined_call_operand.vmem [shape: bf16[5,28,256], index: 1, kind: input, shape index: {}]   ;;  %s6260_s0 = inlined_call_operand.vmem [shape: f32[8,48,28], index: 0, kind: input, shape index: {}]   ;;  %s6261_s3 = inlined_call_operand.vmem [shape: bf16[5,128,256], index: 3, kind: input, shape index: {}]   ;;  %s6262_s2 = inlined_call_operand.vmem [shape: f32[1,128], index: 2, kind: input, shape index: {}]   ;;  %s6263_s5 = inlined_call_operand.vmem [shape: bf16[4,128,64], index: 5, kind: input, shape index: {}]   ;;  %s6264_s4 = inlined_call_operand.vmem [shape: f32[1,128], index: 4, kind: input, shape index: {}]   ;;  %s6265_s7 = inlined_call_operand.vmem [shape: bf16[64,128], index: 7, kind: input, shape index: {}]   ;;  %s6266_s6 = inlined_call_operand.vmem [shape: f32[1,64], index: 6, kind: input, shape index: {}]   ;;  %s6267_s8 = inlined_call_operand.vmem [shape: f32[1,128], index: 8, kind: input, shape index: {}]   ;;  %s6268_s9 = inlined_call_operand.vmem [shape: f32[8,128], index: 9, kind: output, shape index: {}]  }
   0x1   :  { %v4438_v0 = vld [vmem:[%s6259_s1 + $0x30] sm:$0xff]  ;;  %v3648_v1 = vld [vmem:[%s6259_s1 + $0x38] sm:$0x33]  ;;  %190 = vmatprep.mubr.bf16.mxu0 %v6269_v2  ;;  %210 = vmatprep.mubr.bf16.mxu1 %v6269_v2  ;;  %v4452_v5 = vld [vmem:[%s6259_s1 + $0x24] ss:$8 sps:$4 sm:$0xff]   ;;  %vm3538_vm3 = vcmask 523264  }
   0x2   :  { %v4446_v3 = vcombine.high %v4438_v0, %v3648_v1  ;;  %v3651_v4 = vcombine.low %v4438_v0, %v3648_v1  ;;  %v4457_v6 = vld [vmem:[%s6259_s1 + $0x20] ss:$8 sps:$4 sm:$0xff]   ;;  %v3603_v7 = vld [vmem:[%s6260_s0 + $0x30] sm:$0xff]  ;;  %v3604_v8 = vld [vmem:[%s6260_s0 + $0x38] sm:$0xff] }
   0x3   :  { %v3607_v10 = vld [vmem:[%s6260_s0 + $0x50] sm:$0xff]  ;;  %v117_v12 = vld [vmem:[%s6259_s1 + $0x18] sm:$0x33]  ;;  %v4499_v17 = vpack.c.bf16 %v3604_v8, %v3603_v7  ;;  %v4520_v23 = vld [vmem:[%s6259_s1 + $0x4] ss:$8 sps:$4 sm:$0xff]  }
   0x4   :  { %3653 = vmatprep.subr.msk.bf16.mxu0 %vm151_vm0, %v4446_v3  ;;  %4163 = vmatprep.subr.msk.bf16.mxu1 %vm151_vm0, %v4446_v3  ;;  %v4470_v9 = vsel %vm151_vm0, %v3651_v4, 0  ;;  %v4478_v11 = vld [vmem:[%s6259_s1 + $0x10] sm:$0xff]  ;;  %v3608_v13 = vld [vmem:[%s6260_s0 + $0x58] sm:$0xff]  ;;  %v4525_v24 = vld [vmem:[%s6259_s1] ss:$8 sps:$4 sm:$0xff]  }
   0x5   :  { %171 = vmatpush1.bf16.msra.mxu0 %v4470_v9  ;;  %4165 = vmatpush1.bf16.msra.mxu1 %v4470_v9  ;;  %v4491_v14 = vcombine.high %v4478_v11, %v117_v12  ;;  %v3659_v15 = vcombine.low %v4478_v11, %v117_v12  ;;  %v4497_v16 = vld [vmem:[%s6259_s1 + $0x50] sm:$0xff]  ;;  %v4501_v18 = vpack.c.bf16 %v3608_v13, %v3607_v10  ;;  %v3668_v19 = vld [vmem:[%s6259_s1 + $0x58] sm:$0x33]  ;;  %v3605_v27 = vld [vmem:[%s6260_s0 + $0x40] sm:$0xff] }
   0x6   :  { %172 = vmatprep.subr.bf16.mxu0 %v4452_v5  ;;  %4164 = vmatprep.subr.bf16.mxu1 %v4452_v5  ;;  %v4509_v20 = vcombine.high %v4497_v16, %v3668_v19  ;;  %v3671_v21 = vcombine.low %v4497_v16, %v3668_v19  ;;  %v4532_v25 = vld [vmem:[%s6259_s1 + $0x70] sm:$0xff]  ;;  %v3680_v26 = vld [vmem:[%s6259_s1 + $0x78] sm:$0x33]  ;;  %v4550_v29 = vld [vmem:[%s6259_s1 + $0x44] ss:$8 sps:$4 sm:$0xff]  }
   0x7   :  { %v4515_v22 = vsel %vm151_vm0, %v3659_v15, 0  ;;  %v3606_v30 = vld [vmem:[%s6260_s0 + $0x48] sm:$0xff]  ;;  %v35_v31 = vld [vmem:[%s6260_s0] sm:$0xff]  ;;  %v4566_v33 = vcombine.high %v4532_v25, %v3680_v26  ;;  %v3683_v34 = vcombine.low %v4532_v25, %v3680_v26  ;;  %v4578_v36 = vld [vmem:[%s6259_s1 + $0x90] sm:$0xff] }
   0x8   :  { %v4545_v28 = vsel %vm151_vm0, %v3671_v21, 0  ;;  %v36_v32 = vld [vmem:[%s6260_s0 + $0x8] sm:$0xff]  ;;  %v4580_v37 = vpack.c.bf16 %v3606_v30, %v3605_v27  ;;  %v3692_v39 = vld [vmem:[%s6259_s1 + $0x98] sm:$0x33]  ;;  %v37_v43 = vld [vmem:[%s6260_s0 + $0x10] sm:$0xff] }
   0x9   :  { %173 = vmatpush1.bf16.msra.mxu0 %v4457_v6  ;;  %4166 = vmatpush1.bf16.msra.mxu1 %v4457_v6  ;;  %v4573_v35 = vld [vmem:[%s6259_s1 + $0x40] ss:$8 sps:$4 sm:$0xff]   ;;  %v41_v38 = vpack.c.bf16 %v36_v32, %v35_v31  ;;  %v4590_v40 = vsel %vm151_vm0, %v3683_v34, 0  ;;  %v4595_v41 = vld [vmem:[%s6259_s1 + $0x64] ss:$8 sps:$4 sm:$0xff]   ;;  %v4599_v42 = vcombine.high %v4578_v36, %v3692_v39  ;;  %v38_v44 = vld [vmem:[%s6260_s0 + $0x18] sm:$0xff]  ;;  %v3695_v52 = vcombine.low %v4578_v36, %v3692_v39 }
   0xa   :  { %3661 = vmatprep.subr.msk.bf16.mxu1 %vm151_vm0, %v4491_v14  ;;  %3673 = vmatprep.subr.msk.bf16.mxu0 %vm151_vm0, %v4509_v20  ;;  %v3609_v45 = vld [vmem:[%s6260_s0 + $0x60] sm:$0xff]  ;;  %v3610_v46 = vld [vmem:[%s6260_s0 + $0x68] sm:$0xff]  ;;  %v4626_v48 = vld [vmem:[%s6259_s1 + $0x38] sm:$0x33]  ;;  %v42_v56 = vpack.c.bf16 %v38_v44, %v37_v43 }
   0xb   :  { %v4621_v47 = vld [vmem:[%s6259_s1 + $0x60] ss:$8 sps:$4 sm:$0xff]   ;;  %v4632_v49 = vcombine.high %v4438_v0, %v4626_v48  ;;  %v3728_v50 = vcombine.low %v4438_v0, %v4626_v48  ;;  %v4639_v51 = vld [vmem:[%s6259_s1 + $0x18] sm:$0x33]  ;;  %v4655_v57 = vpack.c.bf16 %v3610_v46, %v3609_v45  ;;  %v4678_v63 = vsel %vm151_vm0, %v3695_v52, 0  ;;  %v3611_v8 = vld [vmem:[%s6260_s0 + $0x70] sm:$0xff] }
   0xc   :  { %3654 = vmatmul.mubr.msk.bf16.vlgmr.msra.gmra.mxu0 %vm141_vm1, %v4499_v17  ;;  %3656 = vmatmul.mubr.msk.bf16.vlgmr.msra.gmra.mxu1 %vm141_vm1, %v4501_v18  ;;  %v4646_v53 = vcombine.high %v4478_v11, %v4639_v51  ;;  %v3736_v54 = vcombine.low %v4478_v11, %v4639_v51  ;;  %v4653_v55 = vld [vmem:[%s6259_s1 + $0x58] sm:$0x33]  ;;  %v4683_v1 = vld [vmem:[%s6259_s1 + $0x84] ss:$8 sps:$4 sm:$0xff]   ;;  %v4717_v15 = vld [vmem:[%s6259_s1 + $0x80] ss:$8 sps:$4 sm:$0xff]  }
   0xd   :  { %267 = vmatpush1.bf16.msra.mxu1 %v4515_v22  ;;  %200 = vmatprep.mubr.bf16.mxu0 %v6269_v2  ;;  %v4659_v58 = vcombine.high %v4497_v16, %v4653_v55  ;;  %v3748_v59 = vcombine.low %v4497_v16, %v4653_v55  ;;  %v4666_v60 = vld [vmem:[%s6259_s1 + $0x78] sm:$0x33]  ;;  %v39_v4 = vld [vmem:[%s6260_s0 + $0x20] sm:$0xff]  ;;  %v40_v7 = vld [vmem:[%s6260_s0 + $0x28] sm:$0xff] }
   0xe   :  { %268 = vmatprep.subr.bf16.mxu1 %v4520_v23  ;;  %286 = vmatprep.mubr.bf16.mxu1 %v6269_v2  ;;  %v4671_v61 = vcombine.high %v4532_v25, %v4666_v60  ;;  %v3760_v62 = vcombine.low %v4532_v25, %v4666_v60  ;;  %v3612_v10 = vld [vmem:[%s6260_s0 + $0x78] sm:$0xff]  ;;  %v43_v19 = vpack.c.bf16 %v40_v7, %v39_v4  ;;  %v3613_v26 = vld [vmem:[%s6260_s0 + $0x80] sm:$0xff]  ;;  %v3614_v27 = vld [vmem:[%s6260_s0 + $0x88] sm:$0xff] }
   0xf   :  { %368 = vmatpush1.bf16.msra.mxu0 %v4545_v28  ;;  %v4720_v21 = vpack.c.bf16 %v3612_v10, %v3611_v8  ;;  %v3616_v30 = vld [vmem:[%s6260_s0 + $0x98] sm:$0xff]  ;;  %v4742_v31 = vpack.c.bf16 %v3614_v27, %v3613_v26  ;;  %v3617_v34 = vld [vmem:[%s6260_s0 + $0xa0] sm:$0xff]  ;;  %v3622_v43 = vld [vmem:[%s6260_s0 + $0xc8] sm:$0xff] }
  0x10   :  { %369 = vmatprep.subr.bf16.mxu0 %v4550_v29  ;;  %v3621_v39 = vld [vmem:[%s6260_s0 + $0xc0] sm:$0xff]  ;;  %v3619_v45 = vld [vmem:[%s6260_s0 + $0xb0] sm:$0xff]  ;;  %v3620_v46 = vld [vmem:[%s6260_s0 + $0xb8] sm:$0xff]  ;;  %v4944_v51 = vsel %vm151_vm0, %v3760_v62, 0 }
  0x11   :  { %269 = vmatpush1.bf16.msra.mxu1 %v4525_v24  ;;  %v3624_v52 = vld [vmem:[%s6260_s0 + $0xd8] sm:$0xff]  ;;  %v3626_v7 = vld [vmem:[%s6260_s0 + $0xe8] sm:$0xff]  ;;  %v3627_v0 = vld [vmem:[%s6260_s0 + $0xf0] sm:$0xff] }
  0x12   :  { %3685 = vmatprep.subr.msk.bf16.mxu1 %vm151_vm0, %v4566_v33  ;;  %v3630_v11 = vld [vmem:[%s6260_s0 + $0x108] sm:$0xff]  ;;  %v3631_v48 = vld [vmem:[%s6260_s0 + $0x110] sm:$0xff]  ;;  %v3632_v16 = vld [vmem:[%s6260_s0 + $0x118] sm:$0xff] }
  0x13   :  { %370 = vmatpush1.bf16.msra.mxu0 %v4573_v35  ;;  %v3637_v55 = vld [vmem:[%s6260_s0 + $0x140] sm:$0xff] }
  0x14   :  { %3655 = vmatmul.mubr.msk.bf16.gmra.mxu0 %vm141_vm1, %v4580_v37  ;;  %3662 = vmatmul.mubr.msk.bf16.vlgmr.msra.gmra.mxu1 %vm141_vm1, %v41_v38  ;;  %v3618_v38 = vld [vmem:[%s6260_s0 + $0xa8] sm:$0xff] }
  0x15   :  { %481 = vmatpush1.bf16.msra.mxu1 %v4590_v40  ;;  %296 = vmatprep.mubr.bf16.mxu1 %v6269_v2  ;;  %v4766_v44 = vpack.c.bf16 %v3618_v38, %v3617_v34 }
  0x16   :  { %387 = vmatprep.mubr.bf16.mxu0 %v6269_v2  ;;  %482 = vmatprep.subr.bf16.mxu1 %v4595_v41 }
  0x17   :  { %3697 = vmatprep.subr.msk.bf16.mxu0 %vm151_vm0, %v4599_v42 }
  0x19   :  { %483 = vmatpush1.bf16.msra.mxu1 %v4621_v47 }
  0x1a   :  { %3701 = vmatprep.subr.msk.bf16.mxu1 %vm151_vm0, %v4446_v3  ;;  %v4694_v3 = vld [vmem:[%s6259_s1 + $0x98] sm:$0x33] }
  0x1b   :  { %v4709_v12 = vcombine.high %v4578_v36, %v4694_v3  ;;  %v3772_v13 = vcombine.low %v4578_v36, %v4694_v3  ;;  %v3633_v36 = vld [vmem:[%s6260_s0 + $0x120] sm:$0xff] }
  0x1c   :  { %3663 = vmatmul.mubr.msk.bf16.gmra.mxu1 %vm141_vm1, %v42_v56  ;;  %3674 = vmatmul.mubr.msk.bf16.vlgmr.msra.gmra.mxu0 %vm141_vm1, %v4655_v57  ;;  %v4793_v56 = vpack.c.bf16 %v3620_v46, %v3619_v45 }
  0x1d   :  { %306 = vmatprep.mubr.bf16.mxu1 %v6269_v2  ;;  %397 = vmatprep.mubr.bf16.mxu0 %v6269_v2  ;;  %v4961_v25 = vsel %vm151_vm0, %v3772_v13, 0 }
  0x1e   :  { %594 = vmatpush1.bf16.msra.mxu0 %v4678_v63 }
  0x1f   :  { %595 = vmatprep.subr.bf16.mxu0 %v4683_v1 }
  0x22   :  { %596 = vmatpush1.bf16.msra.mxu0 %v4717_v15 }
  0x23   :  { %3705 = vmatprep.subr.msk.bf16.mxu0 %vm151_vm0, %v4491_v14  ;;  %v3615_v14 = vld [vmem:[%s6260_s0 + $0x90] sm:$0xff] }
  0x24   :  { %3664 = vmatmul.mubr.msk.bf16.gmra.mxu1 %vm141_vm1, %v43_v19  ;;  %3675 = vmatmul.mubr.msk.bf16.gmra.mxu0 %vm141_vm1, %v4720_v21  ;;  %v4744_v32 = vpack.c.bf16 %v3616_v30, %v3615_v14 }
  0x25   :  { %407 = vmatprep.mubr.bf16.mxu0 %v6269_v2  ;;  %500 = vmatprep.mubr.bf16.mxu1 %v6269_v2 }
  0x2c   :  { %3676 = vmatmul.mubr.msk.bf16.gmra.mxu0 %vm141_vm1, %v4742_v31  ;;  %3686 = vmatmul.mubr.msk.bf16.vlgmr.msra.gmra.mxu1 %vm141_vm1, %v4744_v32 }
  0x2d   :  { %675 = vmatpush1.bf16.msra.mxu1 %v4470_v9  ;;  %510 = vmatprep.mubr.bf16.mxu1 %v6269_v2  ;;  %v4768_v9 = vpack.c.bf16 %v3622_v43, %v3621_v39 }
  0x2e   :  { %613 = vmatprep.mubr.bf16.mxu0 %v6269_v2  ;;  %676 = vmatprep.subr.bf16.mxu1 %v4452_v5 }
  0x31   :  { %677 = vmatpush1.bf16.msra.mxu1 %v4457_v6 }
  0x32   :  { %3709 = vmatprep.subr.msk.bf16.mxu1 %vm151_vm0, %v4509_v20  ;;  %v3623_v20 = vld [vmem:[%s6260_s0 + $0xd0] sm:$0xff] }
  0x33   :  { %v4795_v4 = vpack.c.bf16 %v3624_v52, %v3623_v20 }
  0x34   :  { %3687 = vmatmul.mubr.msk.bf16.gmra.mxu1 %vm141_vm1, %v4766_v44  ;;  %3698 = vmatmul.mubr.msk.bf16.vlgmr.msra.gmra.mxu0 %vm141_vm1, %v4768_v9 }
  0x35   :  { %520 = vmatprep.mubr.bf16.mxu1 %v6269_v2  ;;  %623 = vmatprep.mubr.bf16.mxu0 %v6269_v2 }
  0x36   :  { %738 = vmatpush1.bf16.msra.mxu0 %v4515_v22  ;;  %v3625_v22 = vld [vmem:[%s6260_s0 + $0xe0] sm:$0xff] }
  0x37   :  { %739 = vmatprep.subr.bf16.mxu0 %v4520_v23  ;;  %v4812_v8 = vpack.c.bf16 %v3626_v7, %v3625_v22 }
  0x3a   :  { %740 = vmatpush1.bf16.msra.mxu0 %v4525_v24 }
  0x3b   :  { %3713 = vmatprep.subr.msk.bf16.mxu0 %vm151_vm0, %v4566_v33  ;;  %v4888_v33 = vsel %vm151_vm0, %v3736_v54, 0  ;;  %v3635_v54 = vld [vmem:[%s6260_s0 + $0x130] sm:$0xff] }
  0x3c   :  { %3688 = vmatmul.mubr.msk.bf16.gmra.mxu1 %vm141_vm1, %v4793_v56  ;;  %3699 = vmatmul.mubr.msk.bf16.gmra.mxu0 %vm141_vm1, %v4795_v4 }
  0x3d   :  { %633 = vmatprep.mubr.bf16.mxu0 %v6269_v2  ;;  %694 = vmatprep.mubr.bf16.mxu1 %v6269_v2 }
  0x44   :  { %3700 = vmatmul.mubr.msk.bf16.gmra.mxu0 %vm141_vm1, %v4812_v8  ;;  %3702 = vmatmul.mubr.msk.bf16.vlgmr.msra.gmra.mxu1 %vm141_vm1, %v4655_v57 }
  0x45   :  { %801 = vmatpush1.bf16.msra.mxu1 %v4545_v28  ;;  %704 = vmatprep.mubr.bf16.mxu1 %v6269_v2 }
  0x46   :  { %757 = vmatprep.mubr.bf16.mxu0 %v6269_v2  ;;  %802 = vmatprep.subr.bf16.mxu1 %v4550_v29 }
  0x49   :  { %803 = vmatpush1.bf16.msra.mxu1 %v4573_v35 }
  0x4a   :  { %3717 = vmatprep.subr.msk.bf16.mxu1 %vm151_vm0, %v4599_v42  ;;  %v4913_v42 = vsel %vm151_vm0, %v3748_v59, 0 }
  0x4c   :  { %3703 = vmatmul.mubr.msk.bf16.gmra.mxu1 %vm141_vm1, %v4720_v21  ;;  %3706 = vmatmul.mubr.msk.bf16.vlgmr.msra.gmra.mxu0 %vm141_vm1, %v4499_v17  ;;  %v4857_v17 = vsel %vm151_vm0, %v3728_v50, 0  ;;  %v4929_v50 = vpack.c.bf16 %v3632_v16, %v3631_v48  ;;  %v4205_v16 = vld [vmem:[%s6261_s3 + $0x70] ss:$8 sps:$4 sm:$0xff]  }
  0x4d   :  { %714 = vmatprep.mubr.bf16.mxu1 %v6269_v2  ;;  %767 = vmatprep.mubr.bf16.mxu0 %v6269_v2 }
  0x4e   :  { %876 = vmatpush1.bf16.msra.mxu0 %v4590_v40 }
  0x4f   :  { %877 = vmatprep.subr.bf16.mxu0 %v4595_v41 }
  0x52   :  { %878 = vmatpush1.bf16.msra.mxu0 %v4621_v47 }
  0x53   :  { %3730 = vmatprep.subr.msk.bf16.mxu0 %vm151_vm0, %v4632_v49 }
  0x54   :  { %3704 = vmatmul.mubr.msk.bf16.gmra.mxu1 %vm141_vm1, %v4742_v31  ;;  %3707 = vmatmul.mubr.msk.bf16.gmra.mxu0 %vm141_vm1, %v4580_v37  ;;  %v3629_v37 = vld [vmem:[%s6260_s0 + $0x100] sm:$0xff] }
  0x55   :  { %777 = vmatprep.mubr.bf16.mxu0 %v6269_v2  ;;  %820 = vmatprep.mubr.bf16.mxu1 %v6269_v2  ;;  %v4904_v40 = vpack.c.bf16 %v3630_v11, %v3629_v37 }
  0x5c   :  { %3708 = vmatmul.mubr.msk.bf16.gmra.mxu0 %vm141_vm1, %v4501_v18  ;;  %3710 = vmatmul.mubr.msk.bf16.vlgmr.msra.gmra.mxu1 %vm141_vm1, %v4744_v32  ;;  %v3628_v18 = vld [vmem:[%s6260_s0 + $0xf8] sm:$0xff] }
  0x5d   :  { %960 = vmatpush1.bf16.msra.mxu1 %v4678_v63  ;;  %830 = vmatprep.mubr.bf16.mxu1 %v6269_v2  ;;  %v4882_v28 = vpack.c.bf16 %v3628_v18, %v3627_v0 }
  0x5e   :  { %895 = vmatprep.mubr.bf16.mxu0 %v6269_v2  ;;  %961 = vmatprep.subr.bf16.mxu1 %v4683_v1 }
  0x61   :  { %962 = vmatpush1.bf16.msra.mxu1 %v4717_v15 }
  0x62   :  { %3738 = vmatprep.subr.msk.bf16.mxu1 %vm151_vm0, %v4646_v53 }
  0x64   :  { %3711 = vmatmul.mubr.msk.bf16.gmra.mxu1 %vm141_vm1, %v4766_v44  ;;  %3714 = vmatmul.mubr.msk.bf16.vlgmr.msra.gmra.mxu0 %vm141_vm1, %v4768_v9 }
  0x65   :  { %840 = vmatprep.mubr.bf16.mxu1 %v6269_v2  ;;  %905 = vmatprep.mubr.bf16.mxu0 %v6269_v2 }
  0x66   :  { %1103 = vmatpush1.bf16.msra.mxu0 %v4857_v17 }
  0x67   :  { %1104 = vmatprep.subr.bf16.mxu0 %v4452_v5 }
  0x6a   :  { %1105 = vmatpush1.bf16.msra.mxu0 %v4457_v6 }
  0x6b   :  { %3750 = vmatprep.subr.msk.bf16.mxu0 %vm151_vm0, %v4659_v58 }
  0x6c   :  { %3712 = vmatmul.mubr.msk.bf16.gmra.mxu1 %vm141_vm1, %v4793_v56  ;;  %3715 = vmatmul.mubr.msk.bf16.gmra.mxu0 %vm141_vm1, %v4795_v4 }
  0x6d   :  { %915 = vmatprep.mubr.bf16.mxu0 %v6269_v2  ;;  %979 = vmatprep.mubr.bf16.mxu1 %v6269_v2 }
  0x74   :  { %3716 = vmatmul.mubr.msk.bf16.gmra.mxu0 %vm141_vm1, %v4812_v8  ;;  %3718 = vmatmul.mubr.msk.bf16.vlgmr.msra.gmra.mxu1 %vm141_vm1, %v4882_v28 }
  0x75   :  { %1190 = vmatpush1.bf16.msra.mxu1 %v4888_v33  ;;  %989 = vmatprep.mubr.bf16.mxu1 %v6269_v2 }
  0x76   :  { %1122 = vmatprep.mubr.bf16.mxu0 %v6269_v2  ;;  %1191 = vmatprep.subr.bf16.mxu1 %v4520_v23 }
  0x79   :  { %1192 = vmatpush1.bf16.msra.mxu1 %v4525_v24 }
  0x7a   :  { %3762 = vmatprep.subr.msk.bf16.mxu1 %vm151_vm0, %v4671_v61 }
  0x7c   :  { %3719 = vmatmul.mubr.msk.bf16.gmra.mxu1 %vm141_vm1, %v4904_v40  ;;  %3731 = vmatmul.mubr.msk.bf16.vlgmr.msra.gmra.mxu0 %vm141_vm1, %v4744_v32 }
  0x7d   :  { %999 = vmatprep.mubr.bf16.mxu1 %v6269_v2  ;;  %1132 = vmatprep.mubr.bf16.mxu0 %v6269_v2 }
  0x7e   :  { %1281 = vmatpush1.bf16.msra.mxu0 %v4913_v42 }
  0x7f   :  { %1282 = vmatprep.subr.bf16.mxu0 %v4550_v29 }
  0x82   :  { %1283 = vmatpush1.bf16.msra.mxu0 %v4573_v35 }
  0x83   :  { %3774 = vmatprep.subr.msk.bf16.mxu0 %vm151_vm0, %v4709_v12 }
  0x84   :  { %3720 = vmatmul.mubr.msk.bf16.gmra.mxu1 %vm141_vm1, %v4929_v50  ;;  %3732 = vmatmul.mubr.msk.bf16.gmra.mxu0 %vm141_vm1, %v4766_v44 }
  0x85   :  { %1142 = vmatprep.mubr.bf16.mxu0 %v6269_v2  ;;  %1209 = vmatprep.mubr.bf16.mxu1 %v6269_v2 }
  0x8c   :  { %3733 = vmatmul.mubr.msk.bf16.gmra.mxu0 %vm141_vm1, %v4793_v56  ;;  %3739 = vmatmul.mubr.msk.bf16.vlgmr.msra.gmra.mxu1 %vm141_vm1, %v4655_v57 }
  0x8d   :  { %1384 = vmatpush1.bf16.msra.mxu1 %v4944_v51  ;;  %1219 = vmatprep.mubr.bf16.mxu1 %v6269_v2 }
  0x8e   :  { %1300 = vmatprep.mubr.bf16.mxu0 %v6269_v2  ;;  %1385 = vmatprep.subr.bf16.mxu1 %v4595_v41 }
  0x91   :  { %1386 = vmatpush1.bf16.msra.mxu1 %v4621_v47 }
  0x92   :  { %3778 = vmatprep.subr.msk.bf16.mxu1 %vm151_vm0, %v4632_v49  ;;  %v3634_v49 = vld [vmem:[%s6260_s0 + $0x128] sm:$0xff] }
  0x94   :  { %3740 = vmatmul.mubr.msk.bf16.gmra.mxu1 %vm141_vm1, %v4720_v21  ;;  %3751 = vmatmul.mubr.msk.bf16.vlgmr.msra.gmra.mxu0 %vm141_vm1, %v4768_v9 }
  0x95   :  { %1229 = vmatprep.mubr.bf16.mxu1 %v6269_v2  ;;  %1310 = vmatprep.mubr.bf16.mxu0 %v6269_v2 }
  0x96   :  { %1496 = vmatpush1.bf16.msra.mxu0 %v4961_v25 }
  0x97   :  { %1497 = vmatprep.subr.bf16.mxu0 %v4683_v1 }
  0x9a   :  { %1498 = vmatpush1.bf16.msra.mxu0 %v4717_v15 }
  0x9b   :  { %3782 = vmatprep.subr.msk.bf16.mxu0 %vm151_vm0, %v4646_v53  ;;  %v4994_v53 = vpack.c.bf16 %v3634_v49, %v3633_v36 }
  0x9c   :  { %3741 = vmatmul.mubr.msk.bf16.gmra.mxu1 %vm141_vm1, %v4742_v31  ;;  %3752 = vmatmul.mubr.msk.bf16.gmra.mxu0 %vm141_vm1, %v4795_v4 }
  0x9d   :  { %1320 = vmatprep.mubr.bf16.mxu0 %v6269_v2  ;;  %1403 = vmatprep.mubr.bf16.mxu1 %v6269_v2 }
  0xa4   :  { %3753 = vmatmul.mubr.msk.bf16.gmra.mxu0 %vm141_vm1, %v4812_v8  ;;  %3763 = vmatmul.mubr.msk.bf16.vlgmr.msra.gmra.mxu1 %vm141_vm1, %v4882_v28 }
  0xa5   :  { %1577 = vmatpush1.bf16.msra.mxu1 %v4857_v17  ;;  %1413 = vmatprep.mubr.bf16.mxu1 %v6269_v2  ;;  %v3640_v17 = vld [vmem:[%s6260_s0 + $0x158] sm:$0xff] }
  0xa6   :  { %1515 = vmatprep.mubr.bf16.mxu0 %v6269_v2  ;;  %1578 = vmatprep.subr.bf16.mxu1 %v4452_v5  ;;  %v3636_v5 = vld [vmem:[%s6260_s0 + $0x138] sm:$0xff] }
  0xa9   :  { %1579 = vmatpush1.bf16.msra.mxu1 %v4457_v6  ;;  %v5013_v6 = vpack.c.bf16 %v3636_v5, %v3635_v54  ;;  %v3641_v5 = vld [vmem:[%s6260_s0 + $0x160] sm:$0xff] }
  0xaa   :  { %3786 = vmatprep.subr.msk.bf16.mxu1 %vm151_vm0, %v4659_v58 }
  0xac   :  { %3764 = vmatmul.mubr.msk.bf16.gmra.mxu1 %vm141_vm1, %v4904_v40  ;;  %3775 = vmatmul.mubr.msk.bf16.vlgmr.msra.gmra.mxu0 %vm141_vm1, %v4994_v53 }
  0xad   :  { %1423 = vmatprep.mubr.bf16.mxu1 %v6269_v2  ;;  %1525 = vmatprep.mubr.bf16.mxu0 %v6269_v2 }
  0xae   :  { %1640 = vmatpush1.bf16.msra.mxu0 %v4888_v33 }
  0xaf   :  { %1641 = vmatprep.subr.bf16.mxu0 %v4520_v23  ;;  %v3638_v23 = vld [vmem:[%s6260_s0 + $0x148] sm:$0xff] }
  0xb2   :  { %1642 = vmatpush1.bf16.msra.mxu0 %v4525_v24  ;;  %v5030_v24 = vpack.c.bf16 %v3638_v23, %v3637_v55  ;;  %v4208_v55 = vld [vmem:[%s6261_s3 + $0x60] ss:$8 sps:$4 sm:$0xff]  }
  0xb3   :  { %3790 = vmatprep.subr.msk.bf16.mxu0 %vm151_vm0, %v4671_v61 }
  0xb4   :  { %3765 = vmatmul.mubr.msk.bf16.gmra.mxu1 %vm141_vm1, %v4929_v50  ;;  %3776 = vmatmul.mubr.msk.bf16.gmra.mxu0 %vm141_vm1, %v5013_v6 }
  0xb5   :  { %1535 = vmatprep.mubr.bf16.mxu0 %v6269_v2  ;;  %1596 = vmatprep.mubr.bf16.mxu1 %v6269_v2 }
  0xbc   :  { %3777 = vmatmul.mubr.msk.bf16.gmra.mxu0 %vm141_vm1, %v5030_v24  ;;  %3779 = vmatmul.mubr.msk.bf16.vlgmr.msra.gmra.mxu1 %vm141_vm1, %v4768_v9 }
  0xbd   :  { %1703 = vmatpush1.bf16.msra.mxu1 %v4913_v42  ;;  %1606 = vmatprep.mubr.bf16.mxu1 %v6269_v2 }
  0xbe   :  { %1659 = vmatprep.mubr.bf16.mxu0 %v6269_v2  ;;  %1704 = vmatprep.subr.bf16.mxu1 %v4550_v29 }
  0xc1   :  { %1705 = vmatpush1.bf16.msra.mxu1 %v4573_v35 }
  0xc2   :  { %3794 = vmatprep.subr.msk.bf16.mxu1 %vm151_vm0, %v4709_v12  ;;  %v4207_v12 = vld [vmem:[%s6261_s3 + $0x74] ss:$8 sps:$4 sm:$0xff]  }
  0xc4   :  { %3780 = vmatmul.mubr.msk.bf16.gmra.mxu1 %vm141_vm1, %v4795_v4  ;;  %3783 = vmatmul.mubr.msk.bf16.vlgmr.msra.gmra.mxu0 %vm141_vm1, %v4744_v32 }
  0xc5   :  { %1616 = vmatprep.mubr.bf16.mxu1 %v6269_v2  ;;  %1669 = vmatprep.mubr.bf16.mxu0 %v6269_v2 }
  0xc6   :  { %1778 = vmatpush1.bf16.msra.mxu0 %v4944_v51 }
  0xc7   :  { %1779 = vmatprep.subr.bf16.mxu0 %v4595_v41 }
  0xca   :  { %1780 = vmatpush1.bf16.msra.mxu0 %v4621_v47 }
  0xcc   :  { %v192_v29 = vpop.f32.mrf.mxu0  ;;  %v212_v35 = vpop.f32.mrf.mxu1  ;;  %3781 = vmatmul.mubr.msk.bf16.gmra.mxu1 %vm141_vm1, %v4812_v8  ;;  %3784 = vmatmul.mubr.msk.bf16.gmra.mxu0 %vm141_vm1, %v4766_v44  ;;  %v3639_v8 = vld [vmem:[%s6260_s0 + $0x150] sm:$0xff] }
  0xcd   :  { %1679 = vmatprep.mubr.bf16.mxu0 %v6269_v2  ;;  %1722 = vmatprep.mubr.bf16.mxu1 %v6269_v2 }
  0xce   :  { %v194_v57 = vpop.f32.mrf.mxu0  ;;  %v214_v58 = vpop.f32.mrf.mxu1 }
  0xd0   :  { %v196_v59 = vpop.f32.mrf.mxu0  ;;  %v216_v60 = vpop.f32.mrf.mxu1 }
  0xd2   :  { %v198_v61 = vpop.f32.mrf.mxu0  ;;  %v5058_v41 = vpop.f32.mrf.mxu1 }
  0xd4   :  { %v202_v47 = vpop.f32.mrf.mxu0  ;;  %v288_v62 = vpop.f32.mrf.mxu1  ;;  %3785 = vmatmul.mubr.msk.bf16.gmra.mxu0 %vm141_vm1, %v4793_v56  ;;  %3787 = vmatmul.mubr.msk.bf16.vlgmr.msra.gmra.mxu1 %vm141_vm1, %v4882_v28 }
  0xd5   :  { %v289_v63 = vadd.f32 %v288_v62, %v192_v29  ;;  %1862 = vmatpush1.bf16.msra.mxu1 %v4961_v25  ;;  %1732 = vmatprep.mubr.bf16.mxu1 %v6269_v2  ;;  %v4210_v25 = vld [vmem:[%s6261_s3 + $0x64] ss:$8 sps:$4 sm:$0xff]   ;;  %v4213_v29 = vld [vmem:[%s6261_s3 + $0x54] ss:$8 sps:$4 sm:$0xff]   ;;  %v4211_v62 = vld [vmem:[%s6261_s3 + $0x50] ss:$8 sps:$4 sm:$0xff]  }
  0xd6   :  { %v204_v3 = vpop.f32.mrf.mxu0  ;;  %v290_v10 = vpop.f32.mrf.mxu1  ;;  %1797 = vmatprep.mubr.bf16.mxu0 %v6269_v2  ;;  %1863 = vmatprep.subr.bf16.mxu1 %v4683_v1 }
  0xd7   :  { %v291_v13 = vadd.f32 %v290_v10, %v194_v57  ;;  %v4216_v10 = vld [vmem:[%s6261_s3 + $0x44] ss:$8 sps:$4 sm:$0xff]  }
  0xd8   :  { %v206_v19 = vpop.f32.mrf.mxu0  ;;  %v292_v21 = vpop.f32.mrf.mxu1 }
  0xd9   :  { %v293_v26 = vadd.f32 %v292_v21, %v196_v59  ;;  %1864 = vmatpush1.bf16.msra.mxu1 %v4717_v15  ;;  %v3643_v21 = vld [vmem:[%s6260_s0 + $0x170] sm:$0xff] }
  0xda   :  { %v5072_v27 = vpop.f32.mrf.mxu0  ;;  %v294_v14 = vpop.f32.mrf.mxu1  ;;  %2222 = vmatprep.subr.bf16.mxu1 %v4207_v12 }
  0xdb   :  { %v5074_v30 = vadd.f32 %v294_v14, %v198_v61  ;;  %v4214_v14 = vld [vmem:[%s6261_s3 + $0x40] ss:$8 sps:$4 sm:$0xff]  }
  0xdc   :  { %v298_v31 = vpop.f32.mrf.mxu1  ;;  %v389_v32 = vpop.f32.mrf.mxu0  ;;  %3788 = vmatmul.mubr.msk.bf16.gmra.mxu1 %vm141_vm1, %v4904_v40  ;;  %3791 = vmatmul.mubr.msk.bf16.vlgmr.msra.gmra.mxu0 %vm141_vm1, %v4994_v53  ;;  %v111_v40 = vpack.c.bf16 %v3640_v17, %v3639_v8 }
  0xdd   :  { %v299_v1 = vadd.f32 %v298_v31, %v202_v47  ;;  %v418_v34 = vadd.f32 %v389_v32, %v289_v63  ;;  %1742 = vmatprep.mubr.bf16.mxu1 %v6269_v2  ;;  %1807 = vmatprep.mubr.bf16.mxu0 %v6269_v2 }
  0xde   :  { %v300_v15 = vpop.f32.mrf.mxu1  ;;  %v391_v38 = vpop.f32.mrf.mxu0 }
  0xdf   :  { %v301_v39 = vadd.f32 %v300_v15, %v204_v3  ;;  %v419_v43 = vadd.f32 %v391_v38, %v291_v13 }
  0xe0   :  { %v302_v44 = vpop.f32.mrf.mxu1  ;;  %v393_v9 = vpop.f32.mrf.mxu0 }
  0xe1   :  { %v303_v45 = vadd.f32 %v302_v44, %v206_v19  ;;  %v420_v46 = vadd.f32 %v393_v9, %v293_v26  ;;  %v3644_v26 = vld [vmem:[%s6260_s0 + $0x178] sm:$0xff] }
  0xe2   :  { %v5082_v20 = vpop.f32.mrf.mxu1  ;;  %v5084_v52 = vpop.f32.mrf.mxu0  ;;  %v113_v9 = vpack.c.bf16 %v3644_v26, %v3643_v21 }
  0xe4   :  { %v308_v56 = vpop.f32.mrf.mxu1  ;;  %v399_v4 = vpop.f32.mrf.mxu0  ;;  %3789 = vmatmul.mubr.msk.bf16.gmra.mxu1 %vm141_vm1, %v4929_v50  ;;  %3792 = vmatmul.mubr.msk.bf16.gmra.mxu0 %vm141_vm1, %v5013_v6  ;;  %v3642_v6 = vld [vmem:[%s6260_s0 + $0x168] sm:$0xff] }
  0xe5   :  { %v309_v22 = vadd.f32 %v308_v56, %v212_v35  ;;  %v422_v7 = vadd.f32 %v399_v4, %v299_v1  ;;  %1817 = vmatprep.mubr.bf16.mxu0 %v6269_v2  ;;  %1881 = vmatprep.mubr.bf16.mxu1 %v6269_v2  ;;  %v4219_v1 = vld [vmem:[%s6261_s3 + $0x34] ss:$8 sps:$4 sm:$0xff]   ;;  %v4217_v4 = vld [vmem:[%s6261_s3 + $0x30] ss:$8 sps:$4 sm:$0xff]  }
  0xe6   :  { %v310_v0 = vpop.f32.mrf.mxu1  ;;  %v401_v18 = vpop.f32.mrf.mxu0 }
  0xe7   :  { %v311_v28 = vadd.f32 %v310_v0, %v214_v58  ;;  %v423_v33 = vadd.f32 %v401_v18, %v301_v39  ;;  %v305_v18 = vadd.f32 %v5082_v20, %v5072_v27 }
  0xe8   :  { %v312_v37 = vpop.f32.mrf.mxu1  ;;  %v403_v11 = vpop.f32.mrf.mxu0 }
  0xe9   :  { %v313_v42 = vadd.f32 %v312_v37, %v216_v60  ;;  %v424_v48 = vadd.f32 %v403_v11, %v303_v45  ;;  %v112_v60 = vpack.c.bf16 %v3642_v6, %v3641_v5  ;;  %v4220_v37 = vld [vmem:[%s6261_s3 + $0x20] ss:$8 sps:$4 sm:$0xff]   ;;  %v4223_v5 = vld [vmem:[%s6261_s3 + $0x10] ss:$8 sps:$4 sm:$0xff]  }
  0xea   :  { %v5101_v50 = vpop.f32.mrf.mxu1  ;;  %v5103_v51 = vpop.f32.mrf.mxu0 }
  0xeb   :  { %v425_v27 = vadd.f32 %v5103_v51, %v305_v18  ;;  %v4228_v51 = vld [vmem:[%s6261_s3 + $0x4] ss:$8 sps:$4 sm:$0xff]  }
  0xec   :  { %v409_v36 = vpop.f32.mrf.mxu0  ;;  %v502_v49 = vpop.f32.mrf.mxu1  ;;  %3793 = vmatmul.mubr.msk.bf16.gmra.mxu0 %vm141_vm1, %v5030_v24  ;;  %3795 = vmatmul.mubr.msk.bf16.vlgmr.msra.gmra.mxu1 %vm141_vm1, %v111_v40 }
  0xed   :  { %v426_v53 = vadd.f32 %v409_v36, %v309_v22  ;;  %v531_v54 = vadd.f32 %v502_v49, %v418_v34  ;;  %1891 = vmatprep.mubr.bf16.mxu1 %v6269_v2  ;;  %2223 = vmatpush1.bf16.msra.mxu1 %v4205_v16  ;;  %v421_v34 = vadd.f32 %v5084_v52, %v5074_v30  ;;  %v4222_v52 = vld [vmem:[%s6261_s3 + $0x24] ss:$8 sps:$4 sm:$0xff]  }
  0xee   :  { %v411_v23 = vpop.f32.mrf.mxu0  ;;  %v504_v24 = vpop.f32.mrf.mxu1  ;;  %2224 = vmatprep.subr.bf16.mxu1 %v4210_v25  ;;  %2121 = vmatprep.mubr.bf16.mxu0 %v6269_v2 }
  0xef   :  { %v427_v35 = vadd.f32 %v411_v23, %v311_v28  ;;  %v532_v57 = vadd.f32 %v504_v24, %v419_v43 }
  0xf0   :  { %v413_v58 = vpop.f32.mrf.mxu0  ;;  %v506_v59 = vpop.f32.mrf.mxu1 }
  0xf1   :  { %v428_v61 = vadd.f32 %v413_v58, %v313_v42  ;;  %v533_v47 = vadd.f32 %v506_v59, %v420_v46  ;;  %2225 = vmatpush1.bf16.msra.mxu1 %v4208_v55  ;;  %v4225_v42 = vld [vmem:[%s6261_s3 + $0x14] ss:$8 sps:$4 sm:$0xff]   ;;  %v5328_v46 = vld [vmem:[%s6261_s3 + $0xa4] ss:$8 sps:$4 sm:$0xff]  }
  0xf2   :  { %v5128_v63 = vpop.f32.mrf.mxu0  ;;  %v508_v3 = vpop.f32.mrf.mxu1  ;;  %2226 = vmatprep.subr.bf16.mxu1 %v4213_v29  ;;  %6323 = vst [vmem:[#allocation13_spill] sm:$0xff] %v5328_v46 }
  0xf3   :  { %v534_v45 = vadd.f32 %v508_v3, %v421_v34 }
  0xf4   :  { %v512_v12 = vpop.f32.mrf.mxu1  ;;  %v615_v13 = vpop.f32.mrf.mxu0  ;;  %3796 = vmatmul.mubr.msk.bf16.gmra.mxu1 %vm141_vm1, %v112_v60  ;;  %v4226_v60 = vld [vmem:[%s6261_s3] ss:$8 sps:$4 sm:$0xff]  }
  0xf5   :  { %v535_v19 = vadd.f32 %v512_v12, %v422_v7  ;;  %1901 = vmatprep.mubr.bf16.mxu1 %v6269_v2  ;;  %2227 = vmatpush1.bf16.msra.mxu1 %v4211_v62  ;;  %v5149_v15 = vadd.f32 %v615_v13, %v531_v54 }
  0xf6   :  { %v514_v31 = vpop.f32.mrf.mxu1  ;;  %v617_v32 = vpop.f32.mrf.mxu0  ;;  %2228 = vmatprep.subr.bf16.mxu1 %v4216_v10 }
  0xf7   :  { %v536_v38 = vadd.f32 %v514_v31, %v423_v33  ;;  %v5151_v39 = vadd.f32 %v617_v32, %v532_v57  ;;  %v315_v57 = vadd.f32 %v5101_v50, %v5058_v41  ;;  %v5319_v31 = vld [vmem:[%s6261_s3 + $0xb0] ss:$8 sps:$4 sm:$0xff]  }
  0xf8   :  { %v516_v43 = vpop.f32.mrf.mxu1  ;;  %v619_v44 = vpop.f32.mrf.mxu0  ;;  %6322 = vst [vmem:[#allocation12_spill] sm:$0xff] %v5319_v31 }
  0xf9   :  { %v537_v56 = vadd.f32 %v516_v43, %v424_v48  ;;  %2229 = vmatpush1.bf16.msra.mxu1 %v4214_v14  ;;  %v5161_v7 = vadd.f32 %v619_v44, %v533_v47  ;;  %v429_v62 = vadd.f32 %v5128_v63, %v315_v57  ;;  %v5282_v57 = vld [vmem:[%s6261_s3 + $0xd4] ss:$8 sps:$4 sm:$0xff]  }
  0xfa   :  { %v518_v22 = vpop.f32.mrf.mxu1  ;;  %v621_v30 = vpop.f32.mrf.mxu0  ;;  %2230 = vmatprep.subr.bf16.mxu1 %v4219_v1  ;;  %6317 = vst [vmem:[#allocation7_spill] sm:$0xff] %v5282_v57 }
  0xfb   :  { %v5163_v8 = vadd.f32 %v621_v30, %v534_v45  ;;  %v538_v49 = vadd.f32 %v518_v22, %v425_v27 }
  0xfc   :  { %v522_v17 = vpop.f32.mrf.mxu1  ;;  %v625_v0 = vpop.f32.mrf.mxu0  ;;  %3797 = vmatmul.mubr.msk.bf16.gmra.mxu1 %vm141_vm1, %v113_v9 }
  0xfd   :  { %v539_v33 = vadd.f32 %v522_v17, %v426_v53  ;;  %2231 = vmatpush1.bf16.msra.mxu1 %v4217_v4  ;;  %2254 = vmatprep.mubr.bf16.mxu1 %v6269_v2  ;;  %v5178_v20 = vadd.f32 %v625_v0, %v535_v19 }
  0xfe   :  { %v524_v11 = vpop.f32.mrf.mxu1  ;;  %v627_v40 = vpop.f32.mrf.mxu0  ;;  %2232 = vmatprep.subr.bf16.mxu1 %v4222_v52 }
  0xff   :  { %v540_v48 = vadd.f32 %v524_v11, %v427_v35  ;;  %v5180_v16 = vadd.f32 %v627_v40, %v536_v38  ;;  %v5256_v11 = vld [vmem:[%s6261_s3 + $0xf0] ss:$8 sps:$4 sm:$0xff]  }
 0x100   :  { %v526_v25 = vpop.f32.mrf.mxu1  ;;  %v629_v36 = vpop.f32.mrf.mxu0  ;;  %6314 = vst [vmem:[#allocation4_spill] sm:$0xff] %v5256_v11 }
 0x101   :  { %v541_v54 = vadd.f32 %v526_v25, %v428_v61  ;;  %2233 = vmatpush1.bf16.msra.mxu1 %v4220_v37  ;;  %v5190_v23 = vadd.f32 %v629_v36, %v537_v56  ;;  %v5263_v36 = vld [vmem:[%s6261_s3 + $0xe4] ss:$8 sps:$4 sm:$0xff]  }
 0x102   :  { %v528_v6 = vpop.f32.mrf.mxu1  ;;  %v631_v55 = vpop.f32.mrf.mxu0  ;;  %2234 = vmatprep.subr.bf16.mxu1 %v4225_v42  ;;  %6315 = vst [vmem:[#allocation5_spill] sm:$0xff] %v5263_v36 }
 0x103   :  { %v5192_v24 = vadd.f32 %v631_v55, %v538_v49  ;;  %v542_v50 = vadd.f32 %v528_v6, %v429_v62  ;;  %v4237_v49 = vld [vmem:[%s6261_s3 + $0x1f4] ss:$8 sps:$4 sm:$0xff]  }
 0x104   :  { %v635_v29 = vpop.f32.mrf.mxu0  ;;  %v5194_v35 = vpop.f32.mrf.mxu1 }
 0x105   :  { %v5200_v59 = vadd.f32 %v635_v29, %v539_v33  ;;  %2235 = vmatpush1.bf16.msra.mxu1 %v4223_v5  ;;  %v5251_v33 = vld [vmem:[%s6261_s3 + $0xf4] ss:$8 sps:$4 sm:$0xff]   ;;  %v5271_v5 = vld [vmem:[%s6261_s3 + $0xe0] ss:$8 sps:$4 sm:$0xff]  }
 0x106   :  { %v637_v61 = vpop.f32.mrf.mxu0  ;;  %v5205_v47 = vpop.f32.mrf.mxu1  ;;  %2236 = vmatprep.subr.bf16.mxu1 %v4228_v51  ;;  %2089 = vmatprep.subr.bf16.mxu0 %v5251_v33  ;;  %6316 = vst [vmem:[#allocation6_spill] sm:$0xff] %v5271_v5 }
 0x107   :  { %v5208_v3 = vadd.f32 %v637_v61, %v540_v48  ;;  %2090 = vmatpush1.bf16.msra.mxu0 %v5256_v11 }
 0x108   :  { %v639_v10 = vpop.f32.mrf.mxu0  ;;  %v5210_v41 = vpop.f32.mrf.mxu1  ;;  %2091 = vmatprep.subr.bf16.mxu0 %v5263_v36 }
 0x109   :  { %v5214_v13 = vadd.f32 %v639_v10, %v541_v54  ;;  %2237 = vmatpush1.bf16.msra.mxu1 %v4226_v60  ;;  %v5287_v60 = vld [vmem:[%s6261_s3 + $0xd0] ss:$8 sps:$4 sm:$0xff]  }
 0x10a   :  { %v641_v19 = vpop.f32.mrf.mxu0  ;;  %v5216_v21 = vpop.f32.mrf.mxu1  ;;  %2530 = vmatprep.subr.bf16.mxu1 %v4237_v49  ;;  %6318 = vst [vmem:[#allocation8_spill] sm:$0xff] %v5287_v60 }
 0x10b   :  { %v5218_v26 = vadd.f32 %v641_v19, %v542_v50  ;;  %2092 = vmatpush1.bf16.msra.mxu0 %v5271_v5  ;;  %v5298_v19 = vld [vmem:[%s6261_s3 + $0xc4] ss:$8 sps:$4 sm:$0xff]  }
 0x10c   :  { %v5220_v14 = vpop.f32.mrf.mxu1  ;;  %v5222_v63 = vpop.f32.mrf.mxu0  ;;  %2093 = vmatprep.subr.bf16.mxu0 %v5282_v57  ;;  %6319 = vst [vmem:[#allocation9_spill] sm:$0xff] %v5298_v19 }
 0x10e   :  { %v5226_v32 = vpop.f32.mrf.mxu1  ;;  %v5228_v1 = vpop.f32.mrf.mxu0 }
 0x10f   :  { %2094 = vmatpush1.bf16.msra.mxu0 %v5287_v60 }
 0x110   :  { %v5230_v34 = vpop.f32.mrf.mxu1  ;;  %v5232_v38 = vpop.f32.mrf.mxu0  ;;  %2095 = vmatprep.subr.bf16.mxu0 %v5298_v19 }
 0x112   :  { %v5234_v43 = vpop.f32.mrf.mxu1  ;;  %v5236_v44 = vpop.f32.mrf.mxu0 }
 0x114   :  { %v716_v9 = vpop.f32.mrf.mxu1  ;;  %v5238_v45 = vpop.f32.mrf.mxu0 }
 0x116   :  { %v718_v56 = vpop.f32.mrf.mxu1  ;;  %v5240_v4 = vpop.f32.mrf.mxu0 }
 0x118   :  { %v720_v22 = vpop.f32.mrf.mxu1  ;;  %v5242_v30 = vpop.f32.mrf.mxu0 }
 0x11a   :  { %v5244_v52 = vpop.f32.mrf.mxu1  ;;  %v5246_v17 = vpop.f32.mrf.mxu0 }
 0x11c   :  { %v779_v0 = vpop.f32.mrf.mxu0  ;;  %v822_v18 = vpop.f32.mrf.mxu1 }
 0x11d   :  { %v780_v37 = vadd.f32 %v779_v0, %v716_v9  ;;  %v5303_v9 = vld [vmem:[%s6261_s3 + $0xc0] ss:$8 sps:$4 sm:$0xff]  }
 0x11e   :  { %v781_v40 = vpop.f32.mrf.mxu0  ;;  %v824_v42 = vpop.f32.mrf.mxu1  ;;  %6320 = vst [vmem:[#allocation10_spill] sm:$0xff] %v5303_v9  ;;  %2096 = vmatpush1.bf16.msra.mxu0 %v5303_v9 }
 0x11f   :  { %v782_v27 = vadd.f32 %v781_v40, %v718_v56 }
 0x120   :  { %v783_v48 = vpop.f32.mrf.mxu0  ;;  %v826_v25 = vpop.f32.mrf.mxu1 }
 0x121   :  { %v784_v54 = vadd.f32 %v783_v48, %v720_v22  ;;  %v5314_v48 = vld [vmem:[%s6261_s3 + $0xb4] ss:$8 sps:$4 sm:$0xff]  }
 0x122   :  { %v5273_v6 = vpop.f32.mrf.mxu0  ;;  %v828_v55 = vpop.f32.mrf.mxu1  ;;  %6321 = vst [vmem:[#allocation11_spill] sm:$0xff] %v5314_v48  ;;  %2097 = vmatprep.subr.bf16.mxu0 %v5314_v48 }
 0x123   :  { %2098 = vmatpush1.bf16.msra.mxu0 %v5319_v31 }
 0x124   :  { %v5277_v51 = vpop.f32.mrf.mxu1  ;;  %v897_v29 = vpop.f32.mrf.mxu0  ;;  %2099 = vmatprep.subr.bf16.mxu0 %v5328_v46 }
 0x126   :  { %v5289_v61 = vpop.f32.mrf.mxu1  ;;  %v899_v62 = vpop.f32.mrf.mxu0 }
 0x128   :  { %v5293_v10 = vpop.f32.mrf.mxu1  ;;  %v901_v50 = vpop.f32.mrf.mxu0 }
 0x12a   :  { %v5305_v56 = vpop.f32.mrf.mxu1  ;;  %v903_v22 = vpop.f32.mrf.mxu0 }
 0x12c   :  { %v842_v0 = vpop.f32.mrf.mxu1  ;;  %v5309_v40 = vpop.f32.mrf.mxu0 }
 0x12d   :  { %v859_v49 = vadd.f32 %v842_v0, %v780_v37  ;;  %v760_v37 = vadd.f32 %v5222_v63, %v5194_v35  ;;  %v762_v0 = vadd.f32 %v5228_v1, %v5205_v47  ;;  %v764_v35 = vadd.f32 %v5232_v38, %v5210_v41  ;;  %v5350_v63 = vld [vmem:[%s6261_s3 + $0x94] ss:$8 sps:$4 sm:$0xff]  }
 0x12e   :  { %v844_v12 = vpop.f32.mrf.mxu1  ;;  %v909_v2 = vpop.f32.mrf.mxu0  ;;  %6325 = vst [vmem:[#allocation15_spill] sm:$0xff] %v5350_v63  ;;  %v766_v1 = vadd.f32 %v5236_v44, %v5216_v21  ;;  %v770_v21 = vadd.f32 %v5238_v45, %v5220_v14  ;;  %v772_v44 = vadd.f32 %v5240_v4, %v5226_v32 }
 0x12f   :  { %v860_v58 = vadd.f32 %v844_v12, %v782_v27  ;;  %v5337_v12 = vld [vmem:[%s6261_s3 + $0xa0] ss:$8 sps:$4 sm:$0xff]   ;;  %v851_v48 = vadd.f32 %v822_v18, %v760_v37  ;;  %v852_v19 = vadd.f32 %v824_v42, %v762_v0  ;;  %v5359_v18 = vld [vmem:[%s6261_s3 + $0x90] ss:$8 sps:$4 sm:$0xff]   ;;  %v853_v41 = vadd.f32 %v826_v25, %v764_v35  ;;  %v5372_v25 = vld [vmem:[%s6261_s3 + $0x84] ss:$8 sps:$4 sm:$0xff]  }
 0x130   :  { %v846_v53 = vpop.f32.mrf.mxu1  ;;  %v5323_v28 = vpop.f32.mrf.mxu0  ;;  %6324 = vst [vmem:[#allocation14_spill] sm:$0xff] %v5337_v12  ;;  %2100 = vmatpush1.bf16.msra.mxu0 %v5337_v12  ;;  %6326 = vst [vmem:[#allocation16_spill] sm:$0xff] %v5359_v18  ;;  %v854_v37 = vadd.f32 %v828_v55, %v766_v1  ;;  %v855_v14 = vadd.f32 %v5277_v51, %v770_v21  ;;  %v856_v4 = vadd.f32 %v5289_v61, %v772_v44  ;;  %v5400_v61 = vld [vmem:[%s6261_s3 + $0x174] ss:$8 sps:$4 sm:$0xff]  }
 0x131   :  { %v861_v9 = vadd.f32 %v846_v53, %v784_v54  ;;  %v926_v54 = vadd.f32 %v897_v29, %v851_v48  ;;  %v927_v60 = vadd.f32 %v899_v62, %v852_v19  ;;  %2101 = vmatprep.subr.bf16.mxu0 %v5350_v63  ;;  %6327 = vst [vmem:[#allocation17_spill] sm:$0xff] %v5372_v25  ;;  %6330 = vst [vmem:[#allocation19_spill] sm:$0xff] %v5400_v61 }
 0x132   :  { %v5339_v27 = vpop.f32.mrf.mxu1  ;;  %v5341_v31 = vpop.f32.mrf.mxu0  ;;  %v928_v55 = vadd.f32 %v901_v50, %v853_v41  ;;  %v929_v19 = vadd.f32 %v903_v22, %v854_v37  ;;  %v5387_v50 = vld [vmem:[%s6262_s2] ss:$0 sm:$0xff]  ;;  %v774_v51 = vadd.f32 %v5242_v30, %v5230_v34 }
 0x134   :  { %v917_v47 = vpop.f32.mrf.mxu0  ;;  %v981_v53 = vpop.f32.mrf.mxu1  ;;  %2102 = vmatpush1.bf16.msra.mxu0 %v5359_v18 }
 0x135   :  { %v5354_v46 = vadd.f32 %v917_v47, %v859_v49  ;;  %v1010_v0 = vadd.f32 %v981_v53, %v926_v54  ;;  %2103 = vmatprep.subr.bf16.mxu0 %v5372_v25  ;;  %v776_v53 = vadd.f32 %v5246_v17, %v5234_v43  ;;  %v857_v54 = vadd.f32 %v5293_v10, %v774_v51 }
 0x136   :  { %v919_v38 = vpop.f32.mrf.mxu0  ;;  %v983_v42 = vpop.f32.mrf.mxu1  ;;  %v6335_v51 = vmax.f32 %v5190_v23, %v5192_v24 }
 0x137   :  { %v5362_v12 = vadd.f32 %v919_v38, %v860_v58  ;;  %v1011_v57 = vadd.f32 %v983_v42, %v927_v60  ;;  %v5379_v60 = vld [vmem:[%s6261_s3 + $0x80] ss:$8 sps:$4 sm:$0xff]   ;;  %v858_v38 = vadd.f32 %v5305_v56, %v776_v53  ;;  %v6331_v42 = vmax.f32 %v5161_v7, %v5163_v8 }
 0x138   :  { %v921_v29 = vpop.f32.mrf.mxu0  ;;  %v985_v62 = vpop.f32.mrf.mxu1  ;;  %6328 = vst [vmem:[#allocation18_spill] sm:$0xff] %v5379_v60  ;;  %2104 = vmatpush1.bf16.msra.mxu0 %v5379_v60  ;;  %v932_v10 = vadd.f32 %v5323_v28, %v857_v54  ;;  %v6332_v7 = vmax.f32 %v5178_v20, %v5180_v16  ;;  %v5438_v16 = vld [vmem:[%s6261_s3 + $0x1e4] ss:$8 sps:$4 sm:$0xff]  }
 0x139   :  { %v1022_v58 = vmax.f32 %v1010_v0, %v1011_v57  ;;  %v5374_v48 = vadd.f32 %v921_v29, %v861_v9  ;;  %v6329_v57 = vmax.f32 %v5149_v15, %v5151_v39  ;;  %v1012_v22 = vadd.f32 %v985_v62, %v928_v55  ;;  %2372 = vmatprep.subr.bf16.mxu0 %v5400_v61 }
 0x13a   :  { %v923_v32 = vpop.f32.mrf.mxu0  ;;  %v987_v45 = vpop.f32.mrf.mxu1  ;;  %v930_v15 = vadd.f32 %v5309_v40, %v855_v14  ;;  %v931_v39 = vadd.f32 %v909_v2, %v856_v4  ;;  %v933_v0 = vadd.f32 %v5341_v31, %v858_v38  ;;  %v786_v14 = vadd.f32 %v5273_v6, %v5244_v52  ;;  %v5431_v31 = vld [vmem:[%s6261_s3 + $0x1f0] ss:$8 sps:$4 sm:$0xff]   ;;  %6334 = vst [vmem:[#allocation21_spill] sm:$0xff] %v5438_v16 }
 0x13b   :  { %v1028_v9 = vmax.f32 %v6329_v57, %v1022_v58  ;;  %v1013_v49 = vadd.f32 %v987_v45, %v929_v19  ;;  %6333 = vst [vmem:[#allocation20_spill] sm:$0xff] %v5431_v31 }
 0x13c   :  { %v991_v35 = vpop.f32.mrf.mxu1  ;;  %v5395_v47 = vpop.f32.mrf.mxu0  ;;  %v862_v52 = vadd.f32 %v5339_v27, %v786_v14  ;;  %v5452_v27 = vld [vmem:[%s6261_s3 + $0x1e0] ss:$8 sps:$4 sm:$0xff]  }
 0x13d   :  { %v1023_v1 = vmax.f32 %v1012_v22, %v1013_v49  ;;  %v1040_v41 = vadd.f32 %v5387_v50, %v1028_v9  ;;  %v1014_v43 = vadd.f32 %v991_v35, %v930_v15  ;;  %6337 = vst [vmem:[#allocation22_spill] sm:$0xff] %v5452_v27 }
 0x13e   :  { %v993_v34 = vpop.f32.mrf.mxu1  ;;  %v5407_v30 = vpop.f32.mrf.mxu0  ;;  %v937_v15 = vadd.f32 %v923_v32, %v862_v52  ;;  %v5462_v32 = vld [vmem:[%s6261_s3 + $0x1d4] ss:$8 sps:$4 sm:$0xff]  }
 0x13f   :  { %v1029_v37 = vmax.f32 %v6331_v42, %v1023_v1  ;;  %v1015_v17 = vadd.f32 %v993_v34, %v931_v39  ;;  %v1046_v29 = vmax.f32 %v1040_v41, 0.0  ;;  %v6336_v1 = vmov 0   ;;  %6339 = vst [vmem:[#allocation24_spill] sm:$0xff] %v5462_v32 }
 0x140   :  { %v995_v40 = vpop.f32.mrf.mxu1  ;;  %v5414_v2 = vpop.f32.mrf.mxu0  ;;  %v6340_v42 = vmax.f32 %v5200_v59, %v5208_v3  ;;  %v5481_v59 = vld [vmem:[%s6261_s3 + $0x1c4] ss:$8 sps:$4 sm:$0xff]  }
 0x141   :  { %v1041_v21 = vadd.f32 %v5387_v50, %v1029_v37  ;;  %v1024_v44 = vmax.f32 %v1014_v43, %v1015_v17  ;;  %v1016_v19 = vadd.f32 %v995_v40, %v932_v10  ;;  %6343 = vst [vmem:[#allocation27_spill] sm:$0xff] %v5481_v59 }
 0x142   :  { %v997_v62 = vpop.f32.mrf.mxu1  ;;  %v5419_v55 = vpop.f32.mrf.mxu0 }
 0x143   :  { %v1047_v56 = vmax.f32 %v1041_v21, 0.0  ;;  %v1030_v8 = vmax.f32 %v6332_v7, %v1024_v44  ;;  %v1017_v58 = vadd.f32 %v997_v62, %v933_v0 }
 0x144   :  { %v1001_v28 = vpop.f32.mrf.mxu1  ;;  %v5426_v45 = vpop.f32.mrf.mxu0 }
 0x145   :  { %v1966_v4 = vpack.c.bf16 %v1047_v56, %v1046_v29  ;;  %v1042_v57 = vadd.f32 %v5387_v50, %v1030_v8  ;;  %v1025_v9 = vmax.f32 %v1016_v19, %v1017_v58  ;;  %v1018_v20 = vadd.f32 %v1001_v28, %v5354_v46  ;;  %v5492_v58 = vld [vmem:[%s6261_s3 + $0x1c0] ss:$8 sps:$4 sm:$0xff]  }
 0x146   :  { %v1003_v6 = vpop.f32.mrf.mxu1  ;;  %v5441_v22 = vpop.f32.mrf.mxu0  ;;  %6345 = vst [vmem:[#allocation28_spill] sm:$0xff] %v5492_v58 }
 0x147   :  { %v1048_v49 = vmax.f32 %v1042_v57, 0.0  ;;  %v1031_v35 = vmax.f32 %v6335_v51, %v1025_v9  ;;  %v1019_v53 = vadd.f32 %v1003_v6, %v5362_v12  ;;  %2255 = vmatmul.mubr.bf16.vlgmr.msra.gmra.mxu1 %v1966_v4  ;;  %v5517_v51 = vld [vmem:[%s6261_s3 + $0x1a4] ss:$8 sps:$4 sm:$0xff]  }
 0x148   :  { %v1005_v46 = vpop.f32.mrf.mxu1  ;;  %v1138_v39 = vpop.f32.mrf.mxu0  ;;  %2264 = vmatprep.mubr.bf16.mxu1 %v6336_v1  ;;  %2531 = vmatpush1.bf16.msra.mxu1 %v5431_v31  ;;  %6349 = vst [vmem:[#allocation32_spill] sm:$0xff] %v5517_v51 }
 0x149   :  { %v5454_v54 = vpack.c.bf16 %v1048_v49, %v1047_v56  ;;  %v1043_v23 = vadd.f32 %v5387_v50, %v1031_v35  ;;  %v1026_v24 = vmax.f32 %v1018_v20, %v1019_v53  ;;  %v1020_v12 = vadd.f32 %v1005_v46, %v5374_v48  ;;  %2532 = vmatprep.subr.bf16.mxu1 %v5438_v16  ;;  %v5471_v48 = vld [vmem:[%s6261_s3 + $0x1d0] ss:$8 sps:$4 sm:$0xff]  }
 0x14a   :  { %v1007_v41 = vpop.f32.mrf.mxu1  ;;  %v1140_v34 = vpop.f32.mrf.mxu0  ;;  %6341 = vst [vmem:[#allocation25_spill] sm:$0xff] %v5471_v48  ;;  %v6344_v56 = vmax.f32 %v5214_v13, %v5218_v26  ;;  %v5501_v26 = vld [vmem:[%s6261_s3 + $0x1b4] ss:$8 sps:$4 sm:$0xff]  }
 0x14b   :  { %6338 = vst [vmem:[#allocation23_spill] sm:$0xff] %v5454_v54  ;;  %v1049_v38 = vmax.f32 %v1043_v23, 0.0  ;;  %v1032_v37 = vmax.f32 %v6340_v42, %v1026_v24  ;;  %v1021_v43 = vadd.f32 %v1007_v41, %v937_v15  ;;  %6346 = vst [vmem:[#allocation29_spill] sm:$0xff] %v5501_v26 }
 0x14c   :  { %v1144_v17 = vpop.f32.mrf.mxu0  ;;  %v1211_v40 = vpop.f32.mrf.mxu1  ;;  %2533 = vmatpush1.bf16.msra.mxu1 %v5452_v27 }
 0x14d   :  { %v1044_v10 = vadd.f32 %v5387_v50, %v1032_v37  ;;  %v1027_v0 = vmax.f32 %v1020_v12, %v1021_v43  ;;  %v1212_v21 = vadd.f32 %v1211_v40, %v5395_v47  ;;  %v5475_v44 = vpack.c.bf16 %v1049_v38, %v1048_v49  ;;  %2534 = vmatprep.subr.bf16.mxu1 %v5462_v32 }
 0x14e   :  { %v1146_v3 = vpop.f32.mrf.mxu0  ;;  %v1213_v29 = vpop.f32.mrf.mxu1 }
 0x14f   :  { %6342 = vst [vmem:[#allocation26_spill] sm:$0xff] %v5475_v44  ;;  %v1050_v62 = vmax.f32 %v1044_v10, 0.0  ;;  %v1033_v7 = vmax.f32 %v6344_v56, %v1027_v0  ;;  %v1214_v8 = vadd.f32 %v1213_v29, %v5407_v30  ;;  %2265 = vmatmul.mubr.bf16.gmra.mxu1 %v5475_v44  ;;  %v5544_v29 = vld [vmem:[%s6261_s3 + $0x184] ss:$8 sps:$4 sm:$0xff]  }
 0x150   :  { %v1148_v47 = vpop.f32.mrf.mxu0  ;;  %v1215_v19 = vpop.f32.mrf.mxu1  ;;  %2535 = vmatpush1.bf16.msra.mxu1 %v5471_v48  ;;  %2562 = vmatprep.mubr.bf16.mxu1 %v6336_v1  ;;  %6354 = vst [vmem:[#allocation37_spill] sm:$0xff] %v5544_v29 }
 0x151   :  { %v1045_v14 = vadd.f32 %v5387_v50, %v1033_v7  ;;  %v1216_v13 = vadd.f32 %v1215_v19, %v5414_v2  ;;  %2536 = vmatprep.subr.bf16.mxu1 %v5481_v59  ;;  %v5503_v30 = vpack.c.bf16 %v1050_v62, %v1049_v38  ;;  %v5510_v2 = vld [vmem:[%s6261_s3 + $0x1b0] ss:$8 sps:$4 sm:$0xff]   ;;  %v5532_v38 = vld [vmem:[%s6261_s3 + $0x194] ss:$8 sps:$4 sm:$0xff]  }
 0x152   :  { %v1150_v28 = vpop.f32.mrf.mxu0  ;;  %v1217_v4 = vpop.f32.mrf.mxu1  ;;  %6348 = vst [vmem:[#allocation31_spill] sm:$0xff] %v5510_v2  ;;  %6352 = vst [vmem:[#allocation35_spill] sm:$0xff] %v5532_v38 }
 0x153   :  { %6347 = vst [vmem:[#allocation30_spill] sm:$0xff] %v5503_v30  ;;  %v1051_v57 = vmax.f32 %v1045_v14, 0.0  ;;  %v1218_v9 = vadd.f32 %v1217_v4, %v5419_v55 }
 0x154   :  { %v1221_v20 = vpop.f32.mrf.mxu1  ;;  %v1302_v52 = vpop.f32.mrf.mxu0  ;;  %2537 = vmatpush1.bf16.msra.mxu1 %v5492_v58 }
 0x155   :  { %v1222_v6 = vadd.f32 %v1221_v20, %v5426_v45  ;;  %v1331_v49 = vadd.f32 %v1302_v52, %v1212_v21  ;;  %2538 = vmatprep.subr.bf16.mxu1 %v5501_v26  ;;  %v5519_v55 = vpack.c.bf16 %v1051_v57, %v1050_v62  ;;  %v5526_v45 = vld [vmem:[%s6261_s3 + $0x1a0] ss:$8 sps:$4 sm:$0xff]  }
 0x156   :  { %v1223_v35 = vpop.f32.mrf.mxu1  ;;  %v1304_v53 = vpop.f32.mrf.mxu0  ;;  %6351 = vst [vmem:[#allocation34_spill] sm:$0xff] %v5526_v45 }
 0x157   :  { %6350 = vst [vmem:[#allocation33_spill] sm:$0xff] %v5519_v55  ;;  %v1224_v15 = vadd.f32 %v1223_v35, %v5441_v22  ;;  %v1332_v46 = vadd.f32 %v1304_v53, %v1214_v8 }
 0x158   :  { %v1225_v23 = vpop.f32.mrf.mxu1  ;;  %v1306_v24 = vpop.f32.mrf.mxu0  ;;  %2539 = vmatpush1.bf16.msra.mxu1 %v5510_v2 }
 0x159   :  { %v1226_v12 = vadd.f32 %v1225_v23, %v1138_v39  ;;  %v1333_v41 = vadd.f32 %v1306_v24, %v1216_v13  ;;  %2540 = vmatprep.subr.bf16.mxu1 %v5517_v51  ;;  %v5538_v39 = vld [vmem:[%s6261_s3 + $0x190] ss:$8 sps:$4 sm:$0xff]  }
 0x15a   :  { %v1227_v22 = vpop.f32.mrf.mxu1  ;;  %v1308_v42 = vpop.f32.mrf.mxu0  ;;  %6353 = vst [vmem:[#allocation36_spill] sm:$0xff] %v5538_v39 }
 0x15b   :  { %v1228_v37 = vadd.f32 %v1227_v22, %v1140_v34  ;;  %v1334_v43 = vadd.f32 %v1308_v42, %v1218_v9 }
 0x15c   :  { %v1231_v40 = vpop.f32.mrf.mxu1  ;;  %v1312_v10 = vpop.f32.mrf.mxu0  ;;  %2541 = vmatpush1.bf16.msra.mxu1 %v5526_v45 }
 0x15d   :  { %v1232_v0 = vadd.f32 %v1231_v40, %v1144_v17  ;;  %v1335_v21 = vadd.f32 %v1312_v10, %v1222_v6  ;;  %2542 = vmatprep.subr.bf16.mxu1 %v5532_v38  ;;  %v5550_v17 = vld [vmem:[%s6261_s3 + $0x180] ss:$8 sps:$4 sm:$0xff]  }
 0x15e   :  { %v1233_v34 = vpop.f32.mrf.mxu1  ;;  %v1314_v62 = vpop.f32.mrf.mxu0  ;;  %6355 = vst [vmem:[#allocation38_spill] sm:$0xff] %v5550_v17 }
 0x15f   :  { %v1234_v56 = vadd.f32 %v1233_v34, %v1146_v3  ;;  %v1336_v7 = vadd.f32 %v1314_v62, %v1224_v15 }
 0x160   :  { %v1235_v8 = vpop.f32.mrf.mxu1  ;;  %v1316_v19 = vpop.f32.mrf.mxu0  ;;  %2543 = vmatpush1.bf16.msra.mxu1 %v5538_v39 }
 0x161   :  { %v1236_v14 = vadd.f32 %v1235_v8, %v1148_v47  ;;  %v1337_v13 = vadd.f32 %v1316_v19, %v1226_v12  ;;  %2544 = vmatprep.subr.bf16.mxu1 %v5544_v29 }
 0x162   :  { %v1237_v4 = vpop.f32.mrf.mxu1  ;;  %v1318_v57 = vpop.f32.mrf.mxu0 }
 0x163   :  { %v1238_v9 = vadd.f32 %v1237_v4, %v1150_v28  ;;  %v1338_v20 = vadd.f32 %v1318_v57, %v1228_v37 }
 0x164   :  { %v1322_v52 = vpop.f32.mrf.mxu0  ;;  %v1405_v3 = vpop.f32.mrf.mxu1  ;;  %2545 = vmatpush1.bf16.msra.mxu1 %v5550_v17 }
 0x165   :  { %v1339_v6 = vadd.f32 %v1322_v52, %v1232_v0  ;;  %v1434_v35 = vadd.f32 %v1405_v3, %v1331_v49  ;;  %2753 = vmatprep.subr.bf16.mxu1 %v5251_v33 }
 0x166   :  { %v1324_v53 = vpop.f32.mrf.mxu0  ;;  %v1407_v15 = vpop.f32.mrf.mxu1 }
 0x167   :  { %v1340_v23 = vadd.f32 %v1324_v53, %v1234_v56  ;;  %v1435_v24 = vadd.f32 %v1407_v15, %v1332_v46 }
 0x168   :  { %v1326_v47 = vpop.f32.mrf.mxu0  ;;  %v1409_v12 = vpop.f32.mrf.mxu1 }
 0x169   :  { %v1341_v22 = vadd.f32 %v1326_v47, %v1236_v14  ;;  %v1436_v42 = vadd.f32 %v1409_v12, %v1333_v41 }
 0x16a   :  { %v1328_v40 = vpop.f32.mrf.mxu0  ;;  %v1411_v10 = vpop.f32.mrf.mxu1 }
 0x16b   :  { %v1342_v28 = vadd.f32 %v1328_v40, %v1238_v9  ;;  %v1437_v37 = vadd.f32 %v1411_v10, %v1334_v43 }
 0x16c   :  { %v1415_v34 = vpop.f32.mrf.mxu1  ;;  %v1517_v62 = vpop.f32.mrf.mxu0 }
 0x16d   :  { %v1438_v8 = vadd.f32 %v1415_v34, %v1335_v21  ;;  %v5555_v49 = vadd.f32 %v1517_v62, %v1434_v35 }
 0x16e   :  { %v1417_v19 = vpop.f32.mrf.mxu1  ;;  %v1519_v0 = vpop.f32.mrf.mxu0 }
 0x16f   :  { %v1439_v33 = vadd.f32 %v1417_v19, %v1336_v7  ;;  %v5557_v4 = vadd.f32 %v1519_v0, %v1435_v24 }
 0x170   :  { %v1419_v56 = vpop.f32.mrf.mxu1  ;;  %v1521_v46 = vpop.f32.mrf.mxu0 }
 0x171   :  { %v1440_v41 = vadd.f32 %v1419_v56, %v1337_v13  ;;  %v5561_v9 = vadd.f32 %v1521_v46, %v1436_v42 }
 0x172   :  { %v1421_v57 = vpop.f32.mrf.mxu1  ;;  %v1523_v52 = vpop.f32.mrf.mxu0 }
 0x173   :  { %v1441_v43 = vadd.f32 %v1421_v57, %v1338_v20  ;;  %v5563_v3 = vadd.f32 %v1523_v52, %v1437_v37 }
 0x174   :  { %v1425_v21 = vpop.f32.mrf.mxu1  ;;  %v1527_v53 = vpop.f32.mrf.mxu0 }
 0x175   :  { %v1442_v35 = vadd.f32 %v1425_v21, %v1339_v6  ;;  %v5567_v47 = vadd.f32 %v1527_v53, %v1438_v8 }
 0x176   :  { %v1427_v15 = vpop.f32.mrf.mxu1  ;;  %v1529_v24 = vpop.f32.mrf.mxu0 }
 0x177   :  { %v1443_v12 = vadd.f32 %v1427_v15, %v1340_v23  ;;  %v5569_v40 = vadd.f32 %v1529_v24, %v1439_v33 }
 0x178   :  { %v1429_v13 = vpop.f32.mrf.mxu1  ;;  %v1531_v10 = vpop.f32.mrf.mxu0 }
 0x179   :  { %v1444_v42 = vadd.f32 %v1429_v13, %v1341_v22  ;;  %v5573_v62 = vadd.f32 %v1531_v10, %v1440_v41 }
 0x17a   :  { %v1431_v37 = vpop.f32.mrf.mxu1  ;;  %v1533_v34 = vpop.f32.mrf.mxu0 }
 0x17b   :  { %6356 = vst [vmem:[#allocation39_spill] sm:$0xff] %v5573_v62  ;;  %v1445_v19 = vadd.f32 %v1431_v37, %v1342_v28  ;;  %v5575_v0 = vadd.f32 %v1533_v34, %v1441_v43 }
 0x17c   :  { %v1537_v6 = vpop.f32.mrf.mxu0  ;;  %v1598_v56 = vpop.f32.mrf.mxu1 }
 0x17d   :  { %6357 = vst [vmem:[#allocation40_spill] sm:$0xff] %v5575_v0  ;;  %v5579_v46 = vadd.f32 %v1537_v6, %v1442_v35 }
 0x17e   :  { %v1539_v8 = vpop.f32.mrf.mxu0  ;;  %v1600_v33 = vpop.f32.mrf.mxu1 }
 0x17f   :  { %6358 = vst [vmem:[#allocation41_spill] sm:$0xff] %v5579_v46  ;;  %v5581_v57 = vadd.f32 %v1539_v8, %v1443_v12 }
 0x180   :  { %v1541_v52 = vpop.f32.mrf.mxu0  ;;  %v1602_v22 = vpop.f32.mrf.mxu1 }
 0x181   :  { %6359 = vst [vmem:[#allocation42_spill] sm:$0xff] %v5581_v57  ;;  %v5585_v21 = vadd.f32 %v1541_v52, %v1444_v42 }
 0x182   :  { %v1543_v28 = vpop.f32.mrf.mxu0  ;;  %v1604_v43 = vpop.f32.mrf.mxu1 }
 0x183   :  { %6360 = vst [vmem:[#allocation43_spill] sm:$0xff] %v5585_v21  ;;  %v5587_v53 = vadd.f32 %v1543_v28, %v1445_v19 }
 0x184   :  { %v1608_v15 = vpop.f32.mrf.mxu1  ;;  %v1661_v24 = vpop.f32.mrf.mxu0 }
 0x185   :  { %6361 = vst [vmem:[#allocation44_spill] sm:$0xff] %v5587_v53  ;;  %v1662_v54 = vadd.f32 %v1661_v24, %v1598_v56 }
 0x186   :  { %v1610_v35 = vpop.f32.mrf.mxu1  ;;  %v1663_v10 = vpop.f32.mrf.mxu0 }
 0x187   :  { %v1664_v25 = vadd.f32 %v1663_v10, %v1600_v33 }
 0x188   :  { %v5591_v12 = vpop.f32.mrf.mxu1  ;;  %v1665_v37 = vpop.f32.mrf.mxu0 }
 0x189   :  { %v1666_v53 = vadd.f32 %v1665_v37, %v1602_v22  ;;  %v6364_v37 = vmax.f32 %v5567_v47, %v5569_v40  ;;  %v5635_v47 = vld [vmem:[%s6261_s3 + $0x164] ss:$8 sps:$4 sm:$0xff]  }
 0x18a   :  { %v5593_v34 = vpop.f32.mrf.mxu1  ;;  %v1667_v6 = vpop.f32.mrf.mxu0 }
 0x18b   :  { %v1668_v21 = vadd.f32 %v1667_v6, %v1604_v43 }
 0x18c   :  { %v5595_v8 = vpop.f32.mrf.mxu1  ;;  %v1671_v42 = vpop.f32.mrf.mxu0 }
 0x18d   :  { %v1672_v33 = vadd.f32 %v1671_v42, %v1608_v15 }
 0x18e   :  { %v5597_v52 = vpop.f32.mrf.mxu1  ;;  %v1673_v19 = vpop.f32.mrf.mxu0 }
 0x190   :  { %v1622_v28 = vpop.f32.mrf.mxu1  ;;  %v1675_v41 = vpop.f32.mrf.mxu0 }
 0x192   :  { %v1624_v23 = vpop.f32.mrf.mxu1  ;;  %v1677_v20 = vpop.f32.mrf.mxu0 }
 0x194   :  { %v5599_v7 = vpop.f32.mrf.mxu0  ;;  %v1724_v13 = vpop.f32.mrf.mxu1 }
 0x196   :  { %v5601_v14 = vpop.f32.mrf.mxu0  ;;  %v1726_v17 = vpop.f32.mrf.mxu1 }
 0x198   :  { %v1685_v29 = vpop.f32.mrf.mxu0  ;;  %v1728_v39 = vpop.f32.mrf.mxu1 }
 0x199   :  { %v1686_v38 = vadd.f32 %v1685_v29, %v1622_v28  ;;  %v1755_v1 = vadd.f32 %v1728_v39, %v1666_v53 }
 0x19a   :  { %v1687_v45 = vpop.f32.mrf.mxu0  ;;  %v1730_v51 = vpop.f32.mrf.mxu1 }
 0x19b   :  { %v1688_v2 = vadd.f32 %v1687_v45, %v1624_v23  ;;  %v1753_v45 = vadd.f32 %v1724_v13, %v1662_v54  ;;  %v1754_v23 = vadd.f32 %v1726_v17, %v1664_v25  ;;  %v1756_v0 = vadd.f32 %v1730_v51, %v1668_v21 }
 0x19c   :  { %v1734_v26 = vpop.f32.mrf.mxu1  ;;  %v1799_v58 = vpop.f32.mrf.mxu0  ;;  %v1676_v51 = vadd.f32 %v1675_v41, %v5591_v12  ;;  %v1682_v41 = vadd.f32 %v5599_v7, %v5595_v8 }
 0x19d   :  { %v1828_v36 = vadd.f32 %v1799_v58, %v1753_v45  ;;  %v1757_v25 = vadd.f32 %v1734_v26, %v1672_v33  ;;  %v6362_v58 = vmax.f32 %v5555_v49, %v5557_v4  ;;  %v6363_v49 = vmax.f32 %v5561_v9, %v5563_v3  ;;  %v6366_v45 = vld [vmem:[#allocation40_spill] sm:$0xff] }
 0x19e   :  { %v1736_v59 = vpop.f32.mrf.mxu1  ;;  %v1801_v48 = vpop.f32.mrf.mxu0 }
 0x19f   :  { %v1829_v11 = vadd.f32 %v1801_v48, %v1754_v23 }
 0x1a0   :  { %v1738_v32 = vpop.f32.mrf.mxu1  ;;  %v1803_v27 = vpop.f32.mrf.mxu0 }
 0x1a1   :  { %v1830_v24 = vadd.f32 %v1803_v27, %v1755_v1 }
 0x1a2   :  { %v1740_v16 = vpop.f32.mrf.mxu1  ;;  %v1805_v31 = vpop.f32.mrf.mxu0 }
 0x1a3   :  { %v1831_v10 = vadd.f32 %v1805_v31, %v1756_v0  ;;  %v1759_v31 = vadd.f32 %v1738_v32, %v1676_v51 }
 0x1a4   :  { %v1744_v55 = vpop.f32.mrf.mxu1  ;;  %v1809_v44 = vpop.f32.mrf.mxu0 }
 0x1a5   :  { %v1761_v15 = vadd.f32 %v1744_v55, %v1682_v41  ;;  %v6377_v41 = vld [vmem:[#allocation6_spill] sm:$0xff] }
 0x1a6   :  { %v1746_v30 = vpop.f32.mrf.mxu1  ;;  %v1811_v61 = vpop.f32.mrf.mxu0 }
 0x1a8   :  { %v1748_v60 = vpop.f32.mrf.mxu1  ;;  %v1813_v29 = vpop.f32.mrf.mxu0 }
 0x1a9   :  { %v5603_v18 = vadd.f32 %v1748_v60, %v1686_v38  ;;  %v1674_v38 = vadd.f32 %v1673_v19, %v1610_v35 }
 0x1aa   :  { %v1750_v28 = vpop.f32.mrf.mxu1  ;;  %v1815_v57 = vpop.f32.mrf.mxu0 }
 0x1ab   :  { %v5605_v63 = vadd.f32 %v1750_v28, %v1688_v2  ;;  %v1758_v13 = vadd.f32 %v1736_v59, %v1674_v38  ;;  %v6365_v28 = vld [vmem:[#allocation39_spill] sm:$0xff] }
 0x1ac   :  { %v1883_v5 = vpop.f32.mrf.mxu1  ;;  %v1819_v2 = vpop.f32.mrf.mxu0  ;;  %v6367_v23 = vmax.f32 %v6365_v28, %v6366_v45  ;;  %v6388_v28 = vld [vmem:[#allocation17_spill] sm:$0xff] }
 0x1ad   :  { %v1912_v62 = vadd.f32 %v1883_v5, %v1828_v36  ;;  %v1832_v5 = vadd.f32 %v1809_v44, %v1757_v25  ;;  %v1833_v39 = vadd.f32 %v1811_v61, %v1758_v13  ;;  %v1684_v44 = vadd.f32 %v5601_v14, %v5597_v52  ;;  %v5775_v45 = vld [vmem:[%s6261_s3 + $0x264] ss:$8 sps:$4 sm:$0xff]  }
 0x1ae   :  { %v1885_v46 = vpop.f32.mrf.mxu1  ;;  %v1821_v27 = vpop.f32.mrf.mxu0  ;;  %v1836_v8 = vadd.f32 %v1819_v2, %v1761_v15  ;;  %v6379_v15 = vld [vmem:[#allocation8_spill] sm:$0xff] }
 0x1af   :  { %v1913_v56 = vadd.f32 %v1885_v46, %v1829_v11  ;;  %v1678_v11 = vadd.f32 %v1677_v20, %v5593_v34  ;;  %v1834_v20 = vadd.f32 %v1813_v29, %v1759_v31 }
 0x1b0   :  { %v1887_v60 = vpop.f32.mrf.mxu1  ;;  %v1823_v12 = vpop.f32.mrf.mxu0 }
 0x1b1   :  { %v1924_v54 = vmax.f32 %v1912_v62, %v1913_v56  ;;  %v1914_v22 = vadd.f32 %v1887_v60, %v1830_v24  ;;  %v1760_v59 = vadd.f32 %v1740_v16, %v1678_v11  ;;  %v1762_v16 = vadd.f32 %v1746_v30, %v1684_v44  ;;  %v5690_v44 = vld [vmem:[%s6261_s3 + $0x140] ss:$8 sps:$4 sm:$0xff]  }
 0x1b2   :  { %v1889_v17 = vpop.f32.mrf.mxu1  ;;  %v1825_v40 = vpop.f32.mrf.mxu0  ;;  %v1838_v38 = vadd.f32 %v1823_v12, %v5603_v18  ;;  %v5657_v18 = vld [vmem:[%s6261_s3 + $0x154] ss:$8 sps:$4 sm:$0xff]  }
 0x1b3   :  { %v1930_v48 = vmax.f32 %v6362_v58, %v1924_v54  ;;  %v1915_v43 = vadd.f32 %v1889_v17, %v1831_v10  ;;  %v1835_v32 = vadd.f32 %v1815_v57, %v1760_v59  ;;  %v5627_v57 = vld [vmem:[%s6261_s3 + $0x170] ss:$8 sps:$4 sm:$0xff]   ;;  %v1837_v42 = vadd.f32 %v1821_v27, %v1762_v16  ;;  %v5646_v10 = vld [vmem:[%s6261_s3 + $0x160] ss:$8 sps:$4 sm:$0xff]  }
 0x1b4   :  { %v1893_v36 = vpop.f32.mrf.mxu1  ;;  %v6368_v54 = vmov 0   ;;  %v1839_v25 = vadd.f32 %v1825_v40, %v5605_v63  ;;  %v6373_v27 = vld [vmem:[#allocation5_spill] sm:$0xff]  ;;  %v5761_v40 = vld [vmem:[%s6261_s3 + $0x274] ss:$8 sps:$4 sm:$0xff]  }
 0x1b5   :  { %v1925_v1 = vmax.f32 %v1914_v22, %v1915_v43  ;;  %v1936_v26 = vadd.f32 %v5387_v50, %v1930_v48  ;;  %v1916_v0 = vadd.f32 %v1893_v36, %v1832_v5  ;;  %v6369_v22 = vld [vmem:[#allocation41_spill] sm:$0xff]  ;;  %v6370_v43 = vld [vmem:[#allocation42_spill] sm:$0xff]  ;;  %v6372_v5 = vld [vmem:[#allocation4_spill] sm:$0xff] }
 0x1b6   :  { %v1895_v62 = vpop.f32.mrf.mxu1  ;;  %v6371_v51 = vmax.f32 %v6369_v22, %v6370_v43  ;;  %v6380_v16 = vld [vmem:[#allocation9_spill] sm:$0xff] }
 0x1b7   :  { %v1931_v4 = vmax.f32 %v6363_v49, %v1925_v1  ;;  %v1917_v46 = vadd.f32 %v1895_v62, %v1833_v39  ;;  %v1942_v35 = vmax.f32 %v1936_v26, 0.0  ;;  %v5668_v39 = vld [vmem:[%s6261_s3 + $0x150] ss:$8 sps:$4 sm:$0xff]   ;;  %v5678_v62 = vld [vmem:[%s6261_s3 + $0x144] ss:$8 sps:$4 sm:$0xff]  }
 0x1b8   :  { %v1897_v61 = vpop.f32.mrf.mxu1  ;;  %v6374_v49 = vld [vmem:[#allocation43_spill] sm:$0xff]  ;;  %v5867_v22 = vld [vmem:[%s6261_s3 + $0x204] ss:$8 sps:$4 sm:$0xff]   ;;  %v5874_v43 = vld [vmem:[%s6261_s3 + $0x200] ss:$8 sps:$4 sm:$0xff]  }
 0x1b9   :  { %v1937_v21 = vadd.f32 %v5387_v50, %v1931_v4  ;;  %v1926_v53 = vmax.f32 %v1916_v0, %v1917_v46  ;;  %v1918_v7 = vadd.f32 %v1897_v61, %v1834_v20  ;;  %v6375_v4 = vld [vmem:[#allocation44_spill] sm:$0xff]  ;;  %v6378_v20 = vld [vmem:[#allocation7_spill] sm:$0xff] }
 0x1ba   :  { %v1899_v9 = vpop.f32.mrf.mxu1  ;;  %v6376_v0 = vmax.f32 %v6374_v49, %v6375_v4  ;;  %v4375_v49 = vld [vmem:[%s6261_s3 + $0x24] ss:$8 sps:$4 sm:$0xff]   ;;  %v4376_v4 = vld [vmem:[%s6261_s3 + $0x20] ss:$8 sps:$4 sm:$0xff]  }
 0x1bb   :  { %v1943_v3 = vmax.f32 %v1937_v21, 0.0  ;;  %v1932_v34 = vmax.f32 %v6364_v37, %v1926_v53  ;;  %v1919_v6 = vadd.f32 %v1899_v9, %v1835_v32  ;;  %v5700_v21 = vld [vmem:[%s6261_s3 + $0x134] ss:$8 sps:$4 sm:$0xff]  }
 0x1bc   :  { %v1903_v14 = vpop.f32.mrf.mxu1  ;;  %v6381_v9 = vld [vmem:[#allocation10_spill] sm:$0xff]  ;;  %v6382_v37 = vld [vmem:[#allocation11_spill] sm:$0xff] }
 0x1bd   :  { %v5629_v55 = vpack.c.bf16 %v1943_v3, %v1942_v35  ;;  %v1938_v30 = vadd.f32 %v5387_v50, %v1932_v34  ;;  %v1927_v52 = vmax.f32 %v1918_v7, %v1919_v6  ;;  %v1920_v33 = vadd.f32 %v1903_v14, %v1836_v8  ;;  %v5716_v35 = vld [vmem:[%s6261_s3 + $0x124] ss:$8 sps:$4 sm:$0xff]   ;;  %v5733_v34 = vld [vmem:[%s6261_s3 + $0x114] ss:$8 sps:$4 sm:$0xff]   ;;  %v5740_v6 = vld [vmem:[%s6261_s3 + $0x110] ss:$8 sps:$4 sm:$0xff]  }
 0x1be   :  { %v1905_v19 = vpop.f32.mrf.mxu1  ;;  %v6383_v7 = vld [vmem:[#allocation12_spill] sm:$0xff]  ;;  %v6384_v8 = vld [vmem:[#allocation13_spill] sm:$0xff] }
 0x1bf   :  { %v1944_v29 = vmax.f32 %v1938_v30, 0.0  ;;  %v1933_v56 = vmax.f32 %v6367_v23, %v1927_v52  ;;  %v1921_v60 = vadd.f32 %v1905_v19, %v1837_v42  ;;  %2122 = vmatmul.mubr.bf16.vlgmr.msra.gmra.mxu0 %v5629_v55  ;;  %v5747_v14 = vld [vmem:[%s6261_s3 + $0x104] ss:$8 sps:$4 sm:$0xff]   ;;  %v6385_v42 = vld [vmem:[#allocation14_spill] sm:$0xff]  ;;  %v5754_v30 = vld [vmem:[%s6261_s3 + $0x100] ss:$8 sps:$4 sm:$0xff]  }
 0x1c0   :  { %2373 = vmatpush1.bf16.msra.mxu0 %v5627_v57  ;;  %v1907_v24 = vpop.f32.mrf.mxu1  ;;  %2131 = vmatprep.mubr.bf16.mxu0 %v6368_v54  ;;  %v6386_v52 = vld [vmem:[#allocation15_spill] sm:$0xff]  ;;  %v6387_v19 = vld [vmem:[#allocation16_spill] sm:$0xff] }
 0x1c1   :  { %v5650_v2 = vpack.c.bf16 %v1944_v29, %v1943_v3  ;;  %v1939_v17 = vadd.f32 %v5387_v50, %v1933_v56  ;;  %v1928_v13 = vmax.f32 %v1920_v33, %v1921_v60  ;;  %2374 = vmatprep.subr.bf16.mxu0 %v5635_v47  ;;  %v1922_v11 = vadd.f32 %v1907_v24, %v1838_v38  ;;  %v5726_v3 = vld [vmem:[%s6261_s3 + $0x120] ss:$8 sps:$4 sm:$0xff]   ;;  %v6389_v23 = vld [vmem:[#allocation23_spill] sm:$0xff]  ;;  %v6390_v56 = vld [vmem:[#allocation18_spill] sm:$0xff] }
 0x1c2   :  { %v1909_v58 = vpop.f32.mrf.mxu1  ;;  %v5783_v33 = vld [vmem:[%s6261_s3 + $0x260] ss:$8 sps:$4 sm:$0xff]   ;;  %v6391_v60 = vld [vmem:[#allocation19_spill] sm:$0xff] }
 0x1c3   :  { %v1945_v48 = vmax.f32 %v1939_v17, 0.0  ;;  %v1934_v36 = vmax.f32 %v6371_v51, %v1928_v13  ;;  %v1923_v63 = vadd.f32 %v1909_v58, %v1839_v25  ;;  %2563 = vmatmul.mubr.bf16.vlgmr.msra.gmra.mxu1 %v5650_v2  ;;  %v5790_v38 = vld [vmem:[%s6261_s3 + $0x254] ss:$8 sps:$4 sm:$0xff]   ;;  %v5799_v24 = vld [vmem:[%s6261_s3 + $0x250] ss:$8 sps:$4 sm:$0xff]  }
 0x1c4   :  { %2375 = vmatpush1.bf16.msra.mxu0 %v5646_v10  ;;  %2754 = vmatpush1.bf16.msra.mxu1 %v6372_v5  ;;  %v5806_v25 = vld [vmem:[%s6261_s3 + $0x244] ss:$8 sps:$4 sm:$0xff]   ;;  %v6392_v17 = vld [vmem:[#allocation30_spill] sm:$0xff]  ;;  %v4368_v5 = vld [vmem:[%s6261_s3 + $0x60] ss:$8 sps:$4 sm:$0xff]  }
 0x1c5   :  { %v1940_v1 = vadd.f32 %v5387_v50, %v1934_v36  ;;  %v1929_v31 = vmax.f32 %v1922_v11, %v1923_v63  ;;  %2376 = vmatprep.subr.bf16.mxu0 %v5657_v18  ;;  %2755 = vmatprep.subr.bf16.mxu1 %v6373_v27  ;;  %v5673_v26 = vpack.c.bf16 %v1945_v48, %v1944_v29  ;;  %v5768_v29 = vld [vmem:[%s6261_s3 + $0x270] ss:$8 sps:$4 sm:$0xff]   ;;  %v5838_v13 = vld [vmem:[%s6261_s3 + $0x224] ss:$8 sps:$4 sm:$0xff]   ;;  %v5853_v58 = vld [vmem:[%s6261_s3 + $0x214] ss:$8 sps:$4 sm:$0xff]  }
 0x1c6   :  { %2572 = vmatprep.mubr.bf16.mxu1 %v6368_v54  ;;  %v4365_v51 = vld [vmem:[%s6261_s3 + $0x74] ss:$8 sps:$4 sm:$0xff]   ;;  %v4366_v11 = vld [vmem:[%s6261_s3 + $0x70] ss:$8 sps:$4 sm:$0xff]   ;;  %v4367_v63 = vld [vmem:[%s6261_s3 + $0x64] ss:$8 sps:$4 sm:$0xff]  }
 0x1c7   :  { %v1946_v59 = vmax.f32 %v1940_v1, 0.0  ;;  %v1935_v46 = vmax.f32 %v6376_v0, %v1929_v31  ;;  %2132 = vmatmul.mubr.bf16.gmra.mxu0 %v5673_v26  ;;  %v6393_v36 = vld [vmem:[#allocation26_spill] sm:$0xff]  ;;  %v6394_v1 = vld [vmem:[#allocation33_spill] sm:$0xff] }
 0x1c8   :  { %2377 = vmatpush1.bf16.msra.mxu0 %v5668_v39  ;;  %2756 = vmatpush1.bf16.msra.mxu1 %v6377_v41  ;;  %v4371_v31 = vld [vmem:[%s6261_s3 + $0x44] ss:$8 sps:$4 sm:$0xff]   ;;  %v4372_v27 = vld [vmem:[%s6261_s3 + $0x40] ss:$8 sps:$4 sm:$0xff]   ;;  %v4377_v0 = vld [vmem:[%s6261_s3 + $0x14] ss:$8 sps:$4 sm:$0xff]  }
 0x1c9   :  { %v1941_v61 = vadd.f32 %v5387_v50, %v1935_v46  ;;  %2378 = vmatprep.subr.bf16.mxu0 %v5678_v62  ;;  %2757 = vmatprep.subr.bf16.mxu1 %v6378_v20  ;;  %v5695_v32 = vpack.c.bf16 %v1946_v59, %v1945_v48  ;;  %v5709_v50 = vld [vmem:[%s6261_s3 + $0x130] ss:$8 sps:$4 sm:$0xff]   ;;  %v4379_v41 = vld [vmem:[%s6261_s3 + $0x4] ss:$8 sps:$4 sm:$0xff]  }
 0x1ca   :  { %2404 = vmatprep.mubr.bf16.mxu0 %v6368_v54  ;;  %v5860_v48 = vld [vmem:[%s6261_s3 + $0x210] ss:$8 sps:$4 sm:$0xff]   ;;  %v6395_v20 = vld [vmem:[#allocation20_spill] sm:$0xff] }
 0x1cb   :  { %v1947_v53 = vmax.f32 %v1941_v61, 0.0  ;;  %2573 = vmatmul.mubr.bf16.gmra.mxu1 %v5695_v32  ;;  %v4378_v46 = vld [vmem:[%s6261_s3 + $0x10] ss:$8 sps:$4 sm:$0xff]   ;;  %v4381_v61 = vld [vmem:[%s6261_s3 + $0x1f4] ss:$8 sps:$4 sm:$0xff]  }
 0x1cc   :  { %2379 = vmatpush1.bf16.msra.mxu0 %v5690_v44  ;;  %2758 = vmatpush1.bf16.msra.mxu1 %v6379_v15  ;;  %v6399_v15 = vld [vmem:[#allocation25_spill] sm:$0xff] }
 0x1cd   :  { %2380 = vmatprep.subr.bf16.mxu0 %v5700_v21  ;;  %2759 = vmatprep.subr.bf16.mxu1 %v6380_v16  ;;  %v5718_v12 = vpack.c.bf16 %v1947_v53, %v1946_v59  ;;  %v4374_v59 = vld [vmem:[%s6261_s3 + $0x30] ss:$8 sps:$4 sm:$0xff]   ;;  %v6398_v53 = vld [vmem:[#allocation24_spill] sm:$0xff]  ;;  %v6402_v16 = vld [vmem:[#allocation29_spill] sm:$0xff] }
 0x1ce   :  { %2785 = vmatprep.mubr.bf16.mxu1 %v6368_v54 }
 0x1d0   :  { %2381 = vmatpush1.bf16.msra.mxu0 %v5709_v50  ;;  %2760 = vmatpush1.bf16.msra.mxu1 %v6381_v9  ;;  %v6404_v9 = vld [vmem:[#allocation32_spill] sm:$0xff] }
 0x1d1   :  { %2382 = vmatprep.subr.bf16.mxu0 %v5716_v35  ;;  %2761 = vmatprep.subr.bf16.mxu1 %v6382_v37  ;;  %v6406_v37 = vld [vmem:[#allocation35_spill] sm:$0xff] }
 0x1d4   :  { %2383 = vmatpush1.bf16.msra.mxu0 %v5726_v3  ;;  %2762 = vmatpush1.bf16.msra.mxu1 %v6383_v7  ;;  %v6409_v7 = vld [vmem:[#allocation38_spill] sm:$0xff] }
 0x1d5   :  { %2384 = vmatprep.subr.bf16.mxu0 %v5733_v34  ;;  %2763 = vmatprep.subr.bf16.mxu1 %v6384_v8 }
 0x1d8   :  { %2385 = vmatpush1.bf16.msra.mxu0 %v5740_v6  ;;  %2764 = vmatpush1.bf16.msra.mxu1 %v6385_v42  ;;  %v4328_v42 = vld [vmem:[%s6263_s5 + $0x70] sm:$0xff]  }
 0x1d9   :  { %2386 = vmatprep.subr.bf16.mxu0 %v5747_v14  ;;  %2765 = vmatprep.subr.bf16.mxu1 %v6386_v52 }
 0x1dc   :  { %2387 = vmatpush1.bf16.msra.mxu0 %v5754_v30  ;;  %2766 = vmatpush1.bf16.msra.mxu1 %v6387_v19  ;;  %v4331_v19 = vld [vmem:[%s6263_s5 + $0x20] sm:$0xff]  }
 0x1dd   :  { %2688 = vmatprep.subr.bf16.mxu0 %v5761_v40  ;;  %2767 = vmatprep.subr.bf16.mxu1 %v6388_v28 }
 0x1df   :  { %2405 = vmatmul.mubr.bf16.vlgmr.msra.gmra.mxu0 %v6389_v23 }
 0x1e0   :  { %2689 = vmatpush1.bf16.msra.mxu0 %v5768_v29  ;;  %2768 = vmatpush1.bf16.msra.mxu1 %v6390_v56 }
 0x1e1   :  { %2690 = vmatprep.subr.bf16.mxu0 %v5775_v45  ;;  %2859 = vmatprep.subr.bf16.mxu1 %v6391_v60 }
 0x1e2   :  { %2414 = vmatprep.mubr.bf16.mxu0 %v6368_v54 }
 0x1e3   :  { %2786 = vmatmul.mubr.bf16.vlgmr.msra.gmra.mxu1 %v6389_v23  ;;  %v4333_v23 = vld [vmem:[%s6263_s5 + $0x18] sm:$0xff]  }
 0x1e4   :  { %2691 = vmatpush1.bf16.msra.mxu0 %v5783_v33  ;;  %2860 = vmatpush1.bf16.msra.mxu1 %v5627_v57  ;;  %v5815_v57 = vld [vmem:[%s6261_s3 + $0x240] ss:$8 sps:$4 sm:$0xff]  }
 0x1e5   :  { %2692 = vmatprep.subr.bf16.mxu0 %v5790_v38  ;;  %2861 = vmatprep.subr.bf16.mxu1 %v5635_v47  ;;  %v5822_v47 = vld [vmem:[%s6261_s3 + $0x234] ss:$8 sps:$4 sm:$0xff]  }
 0x1e6   :  { %2795 = vmatprep.mubr.bf16.mxu1 %v6368_v54 }
 0x1e7   :  { %2415 = vmatmul.mubr.bf16.gmra.mxu0 %v6392_v17 }
 0x1e8   :  { %2693 = vmatpush1.bf16.msra.mxu0 %v5799_v24  ;;  %2862 = vmatpush1.bf16.msra.mxu1 %v5646_v10  ;;  %v5831_v10 = vld [vmem:[%s6261_s3 + $0x230] ss:$8 sps:$4 sm:$0xff]  }
 0x1e9   :  { %2694 = vmatprep.subr.bf16.mxu0 %v5806_v25  ;;  %2863 = vmatprep.subr.bf16.mxu1 %v5657_v18  ;;  %v5846_v18 = vld [vmem:[%s6261_s3 + $0x220] ss:$8 sps:$4 sm:$0xff]  }
 0x1ea   :  { %2720 = vmatprep.mubr.bf16.mxu0 %v6368_v54 }
 0x1eb   :  { %2796 = vmatmul.mubr.bf16.gmra.mxu1 %v6392_v17 }
 0x1ec   :  { %2695 = vmatpush1.bf16.msra.mxu0 %v5815_v57  ;;  %2864 = vmatpush1.bf16.msra.mxu1 %v5668_v39  ;;  %v4369_v39 = vld [vmem:[%s6261_s3 + $0x54] ss:$8 sps:$4 sm:$0xff]  }
 0x1ed   :  { %2696 = vmatprep.subr.bf16.mxu0 %v5822_v47  ;;  %2865 = vmatprep.subr.bf16.mxu1 %v5678_v62  ;;  %v4373_v62 = vld [vmem:[%s6261_s3 + $0x34] ss:$8 sps:$4 sm:$0xff]  }
 0x1ee   :  { %2891 = vmatprep.mubr.bf16.mxu1 %v6368_v54 }
 0x1f0   :  { %2697 = vmatpush1.bf16.msra.mxu0 %v5831_v10  ;;  %2866 = vmatpush1.bf16.msra.mxu1 %v5690_v44  ;;  %v4380_v44 = vld [vmem:[%s6261_s3] ss:$8 sps:$4 sm:$0xff]  }
 0x1f1   :  { %2698 = vmatprep.subr.bf16.mxu0 %v5838_v13  ;;  %2867 = vmatprep.subr.bf16.mxu1 %v5700_v21  ;;  %v6397_v21 = vld [vmem:[#allocation22_spill] sm:$0xff] }
 0x1f4   :  { %2699 = vmatpush1.bf16.msra.mxu0 %v5846_v18  ;;  %2868 = vmatpush1.bf16.msra.mxu1 %v5709_v50  ;;  %v6401_v50 = vld [vmem:[#allocation28_spill] sm:$0xff] }
 0x1f5   :  { %2700 = vmatprep.subr.bf16.mxu0 %v5853_v58  ;;  %2869 = vmatprep.subr.bf16.mxu1 %v5716_v35  ;;  %v6403_v35 = vld [vmem:[#allocation31_spill] sm:$0xff] }
 0x1f8   :  { %2701 = vmatpush1.bf16.msra.mxu0 %v5860_v48  ;;  %2870 = vmatpush1.bf16.msra.mxu1 %v5726_v3  ;;  %v6405_v3 = vld [vmem:[#allocation34_spill] sm:$0xff] }
 0x1f9   :  { %2702 = vmatprep.subr.bf16.mxu0 %v5867_v22  ;;  %2871 = vmatprep.subr.bf16.mxu1 %v5733_v34  ;;  %v6408_v34 = vld [vmem:[#allocation37_spill] sm:$0xff] }
 0x1fc   :  { %2703 = vmatpush1.bf16.msra.mxu0 %v5874_v43  ;;  %2872 = vmatpush1.bf16.msra.mxu1 %v5740_v6  ;;  %v4383_v6 = vmov 0.0  }
 0x1fd   :  { %2806 = vmatprep.subr.bf16.mxu0 %v4365_v51  ;;  %2873 = vmatprep.subr.bf16.mxu1 %v5747_v14  ;;  %v4327_v14 = vld [vmem:[%s6263_s5 + $0x30] sm:$0xff]  }
 0x1ff   :  { %2721 = vmatmul.mubr.bf16.vlgmr.msra.gmra.mxu0 %v6393_v36 }
 0x200   :  { %2807 = vmatpush1.bf16.msra.mxu0 %v4366_v11  ;;  %2874 = vmatpush1.bf16.msra.mxu1 %v5754_v30  ;;  %v4329_v30 = vld [vmem:[%s6263_s5 + $0x28] sm:$0xff]  }
 0x201   :  { %2808 = vmatprep.subr.bf16.mxu0 %v4367_v63  ;;  %2981 = vmatprep.subr.bf16.mxu1 %v5761_v40  ;;  %v4330_v40 = vld [vmem:[%s6263_s5 + $0x68] sm:$0xff]   ;;  %v4340_v63 = vld [vmem:[%s6263_s5 + $0x40] sm:$0xff]  }
 0x202   :  { %2730 = vmatprep.mubr.bf16.mxu0 %v6368_v54 }
 0x203   :  { %2892 = vmatmul.mubr.bf16.vlgmr.msra.gmra.mxu1 %v5650_v2  ;;  %v4370_v2 = vld [vmem:[%s6261_s3 + $0x50] ss:$8 sps:$4 sm:$0xff]  }
 0x204   :  { %2809 = vmatpush1.bf16.msra.mxu0 %v4368_v5  ;;  %2982 = vmatpush1.bf16.msra.mxu1 %v5768_v29 }
 0x205   :  { %2810 = vmatprep.subr.bf16.mxu0 %v4369_v39  ;;  %2983 = vmatprep.subr.bf16.mxu1 %v5775_v45  ;;  %v4332_v45 = vld [vmem:[%s6263_s5 + $0x60] sm:$0xff]  }
 0x206   :  { %2901 = vmatprep.mubr.bf16.mxu1 %v6368_v54 }
 0x207   :  { %2731 = vmatmul.mubr.bf16.gmra.mxu0 %v6394_v1  ;;  %v5987_v8 = vpop.f32.mrf.mxu1 }
 0x208   :  { %2811 = vmatpush1.bf16.msra.mxu0 %v4370_v2  ;;  %2984 = vmatpush1.bf16.msra.mxu1 %v5783_v33 }
 0x209   :  { %2812 = vmatprep.subr.bf16.mxu0 %v4371_v31  ;;  %2985 = vmatprep.subr.bf16.mxu1 %v5790_v38  ;;  %v6003_v52 = vpop.f32.mrf.mxu1  ;;  %v4334_v38 = vld [vmem:[%s6263_s5 + $0x58] sm:$0xff]  }
 0x20a   :  { %2838 = vmatprep.mubr.bf16.mxu0 %v6368_v54 }
 0x20b   :  { %2902 = vmatmul.mubr.bf16.gmra.mxu1 %v5695_v32  ;;  %v6396_v32 = vld [vmem:[#allocation21_spill] sm:$0xff]  ;;  %v6013_v29 = vpop.f32.mrf.mxu1 }
 0x20c   :  { %2813 = vmatpush1.bf16.msra.mxu0 %v4372_v27  ;;  %2986 = vmatpush1.bf16.msra.mxu1 %v5799_v24  ;;  %v4335_v24 = vld [vmem:[%s6263_s5 + $0x10] sm:$0xff]  }
 0x20d   :  { %2814 = vmatprep.subr.bf16.mxu0 %v4373_v62  ;;  %2987 = vmatprep.subr.bf16.mxu1 %v5806_v25  ;;  %v6017_v28 = vpop.f32.mrf.mxu1 }
 0x20e   :  { %3013 = vmatprep.mubr.bf16.mxu1 %v6368_v54 }
 0x20f   :  { %v2266_v33 = vpop.f32.mrf.mxu1 }
 0x210   :  { %2815 = vmatpush1.bf16.msra.mxu0 %v4374_v59  ;;  %2988 = vmatpush1.bf16.msra.mxu1 %v5815_v57 }
 0x211   :  { %2816 = vmatprep.subr.bf16.mxu0 %v4375_v49  ;;  %2989 = vmatprep.subr.bf16.mxu1 %v5822_v47  ;;  %v2268_v17 = vpop.f32.mrf.mxu1  ;;  %v4336_v47 = vld [vmem:[%s6263_s5 + $0x50] sm:$0xff]  }
 0x214   :  { %2817 = vmatpush1.bf16.msra.mxu0 %v4376_v4  ;;  %2990 = vmatpush1.bf16.msra.mxu1 %v5831_v10  ;;  %v4337_v10 = vld [vmem:[%s6263_s5 + $0x8] sm:$0xff]  }
 0x215   :  { %2818 = vmatprep.subr.bf16.mxu0 %v4377_v0  ;;  %2991 = vmatprep.subr.bf16.mxu1 %v5838_v13 }
 0x218   :  { %2819 = vmatpush1.bf16.msra.mxu0 %v4378_v46  ;;  %2992 = vmatpush1.bf16.msra.mxu1 %v5846_v18  ;;  %v2270_v18 = vpop.f32.mrf.mxu1 }
 0x219   :  { %2820 = vmatprep.subr.bf16.mxu0 %v4379_v41  ;;  %2993 = vmatprep.subr.bf16.mxu1 %v5853_v58 }
 0x21a   :  { %v2272_v51 = vpop.f32.mrf.mxu1 }
 0x21c   :  { %2821 = vmatpush1.bf16.msra.mxu0 %v4380_v44  ;;  %2994 = vmatpush1.bf16.msra.mxu1 %v5860_v48  ;;  %v4338_v48 = vld [vmem:[%s6263_s5 + $0x48] sm:$0xff]  }
 0x21d   :  { %2920 = vmatprep.subr.bf16.mxu0 %v4381_v61  ;;  %2995 = vmatprep.subr.bf16.mxu1 %v5867_v22  ;;  %v4339_v22 = vld [vmem:[%s6263_s5] sm:$0xff]  }
 0x21f   :  { %2839 = vmatmul.mubr.bf16.vlgmr.msra.gmra.mxu0 %v5629_v55  ;;  %v6400_v55 = vld [vmem:[#allocation27_spill] sm:$0xff] }
 0x220   :  { %2921 = vmatpush1.bf16.msra.mxu0 %v6395_v20  ;;  %2996 = vmatpush1.bf16.msra.mxu1 %v5874_v43 }
 0x221   :  { %2922 = vmatprep.subr.bf16.mxu0 %v6396_v32  ;;  %2848 = vmatprep.mubr.bf16.mxu0 %v6368_v54 }
 0x222   :  { %4091 = vmatprep.subr.bf16.mxu1 %v4383_v6 }
 0x223   :  { %3014 = vmatmul.mubr.bf16.vlgmr.msra.gmra.mxu1 %v5673_v26 }
 0x224   :  { %2923 = vmatpush1.bf16.msra.mxu0 %v6397_v21  ;;  %3023 = vmatprep.mubr.bf16.mxu1 %v6368_v54 }
 0x225   :  { %2924 = vmatprep.subr.bf16.mxu0 %v6398_v53 }
 0x227   :  { %2849 = vmatmul.mubr.bf16.gmra.mxu0 %v5673_v26  ;;  %v6407_v26 = vld [vmem:[#allocation36_spill] sm:$0xff] }
 0x228   :  { %2925 = vmatpush1.bf16.msra.mxu0 %v6399_v15  ;;  %2952 = vmatprep.mubr.bf16.mxu0 %v6368_v54 }
 0x229   :  { %2926 = vmatprep.subr.bf16.mxu0 %v6400_v55 }
 0x22b   :  { %3024 = vmatmul.mubr.bf16.gmra.mxu1 %v5718_v12  ;;  %v4325_v12 = vld [vmem:[%s6263_s5 + $0x38] sm:$0xff]  }
 0x22c   :  { %2927 = vmatpush1.bf16.msra.mxu0 %v6401_v50  ;;  %4092 = vmatpush3.bf16.msra.mxu1 %v4325_v12 }
 0x22d   :  { %2928 = vmatprep.subr.bf16.mxu0 %v6402_v16  ;;  %4093 = vmatprep.subr.bf16.mxu1 %v4383_v6 }
 0x22e   :  { %4107 = vmatprep.mubr.msk.bf16.mxu1 %vm4384_vm2, %v4383_v6 }
 0x230   :  { %2929 = vmatpush1.bf16.msra.mxu0 %v6403_v35  ;;  %4094 = vmatpush3.bf16.msra.mxu1 %v4327_v14 }
 0x231   :  { %2930 = vmatprep.subr.bf16.mxu0 %v6404_v9  ;;  %4095 = vmatprep.subr.bf16.mxu1 %v4383_v6 }
 0x234   :  { %2931 = vmatpush1.bf16.msra.mxu0 %v6405_v3  ;;  %4096 = vmatpush3.bf16.msra.mxu1 %v4329_v30 }
 0x235   :  { %2932 = vmatprep.subr.bf16.mxu0 %v6406_v37  ;;  %4097 = vmatprep.subr.bf16.mxu1 %v4383_v6 }
 0x238   :  { %2933 = vmatpush1.bf16.msra.mxu0 %v6407_v26  ;;  %4098 = vmatpush3.bf16.msra.mxu1 %v4331_v19 }
 0x239   :  { %2934 = vmatprep.subr.bf16.mxu0 %v6408_v34  ;;  %4099 = vmatprep.subr.bf16.mxu1 %v4383_v6 }
 0x23c   :  { %2935 = vmatpush1.bf16.msra.mxu0 %v6409_v7  ;;  %4100 = vmatpush3.bf16.msra.mxu1 %v4333_v23 }
 0x23d   :  { %4071 = vmatprep.subr.bf16.mxu0 %v4383_v6  ;;  %4101 = vmatprep.subr.bf16.mxu1 %v4383_v6 }
 0x23f   :  { %2953 = vmatmul.mubr.bf16.vlgmr.msra.gmra.mxu0 %v6393_v36 }
 0x240   :  { %2962 = vmatprep.mubr.bf16.mxu0 %v6368_v54  ;;  %v4326_v54 = vld [vmem:[%s6263_s5 + $0x78] sm:$0xff]   ;;  %4102 = vmatpush3.bf16.msra.mxu1 %v4335_v24 }
 0x241   :  { %4072 = vmatpush3.bf16.msra.mxu0 %v4326_v54  ;;  %4103 = vmatprep.subr.bf16.mxu1 %v4383_v6 }
 0x242   :  { %4073 = vmatprep.subr.bf16.mxu0 %v4383_v6 }
 0x244   :  { %4104 = vmatpush3.bf16.msra.mxu1 %v4337_v10 }
 0x245   :  { %4074 = vmatpush3.bf16.msra.mxu0 %v4328_v42  ;;  %4105 = vmatprep.subr.bf16.mxu1 %v4383_v6 }
 0x246   :  { %4075 = vmatprep.subr.bf16.mxu0 %v4383_v6 }
 0x247   :  { %2963 = vmatmul.mubr.bf16.gmra.mxu0 %v6394_v1 }
 0x248   :  { %4106 = vmatpush3.bf16.msra.mxu1 %v4339_v22  ;;  %4087 = vmatprep.mubr.msk.bf16.mxu0 %vm4384_vm2, %v4383_v6 }
 0x249   :  { %4076 = vmatpush3.bf16.msra.mxu0 %v4330_v40  ;;  %4131 = vmatprep.subr.bf16.mxu1 %v4383_v6 }
 0x24a   :  { %4077 = vmatprep.subr.bf16.mxu0 %v4383_v6 }
 0x24d   :  { %4078 = vmatpush3.bf16.msra.mxu0 %v4332_v45 }
 0x24e   :  { %4079 = vmatprep.subr.bf16.mxu0 %v4383_v6 }
 0x251   :  { %4080 = vmatpush3.bf16.msra.mxu0 %v4334_v38 }
 0x252   :  { %4081 = vmatprep.subr.bf16.mxu0 %v4383_v6 }
 0x255   :  { %4082 = vmatpush3.bf16.msra.mxu0 %v4336_v47 }
 0x256   :  { %4083 = vmatprep.subr.bf16.mxu0 %v4383_v6 }
 0x259   :  { %4084 = vmatpush3.bf16.msra.mxu0 %v4338_v48 }
 0x25a   :  { %4085 = vmatprep.subr.bf16.mxu0 %v4383_v6 }
 0x25d   :  { %4086 = vmatpush3.bf16.msra.mxu0 %v4340_v63 }
 0x25e   :  { %4111 = vmatprep.subr.bf16.mxu0 %v4383_v6 }
 0x27f   :  { %v6026_v56 = vpop.f32.mrf.mxu0 }
 0x281   :  { %v6028_v60 = vpop.f32.mrf.mxu0 }
 0x283   :  { %v6038_v25 = vpop.f32.mrf.mxu0  ;;  %v6068_v5 = vpop.f32.mrf.mxu1 }
 0x285   :  { %v6040_v57 = vpop.f32.mrf.mxu0  ;;  %v6070_v39 = vpop.f32.mrf.mxu1 }
 0x287   :  { %v2133_v13 = vpop.f32.mrf.mxu0  ;;  %v6072_v1 = vpop.f32.mrf.mxu1 }
 0x288   :  { %v2267_v4 = vadd.f32 %v2266_v33, %v2133_v13 }
 0x289   :  { %v2135_v58 = vpop.f32.mrf.mxu0  ;;  %v6074_v2 = vpop.f32.mrf.mxu1 }
 0x28a   :  { %v2269_v41 = vadd.f32 %v2268_v17, %v2135_v58 }
 0x28b   :  { %v2137_v43 = vpop.f32.mrf.mxu0  ;;  %v2574_v62 = vpop.f32.mrf.mxu1 }
 0x28c   :  { %v2271_v20 = vadd.f32 %v2270_v18, %v2137_v43 }
 0x28d   :  { %v2139_v36 = vpop.f32.mrf.mxu0  ;;  %v2576_v0 = vpop.f32.mrf.mxu1 }
 0x28e   :  { %v2273_v11 = vadd.f32 %v2272_v51, %v2139_v36 }
 0x28f   :  { %v2578_v53 = vpop.f32.mrf.mxu1 }
 0x291   :  { %v2580_v3 = vpop.f32.mrf.mxu1 }
 0x29f   :  { %v6076_v31 = vpop.f32.mrf.mxu0 }
 0x2a1   :  { %v6078_v27 = vpop.f32.mrf.mxu0 }
 0x2a3   :  { %v6080_v59 = vpop.f32.mrf.mxu0  ;;  %v2787_v26 = vpop.f32.mrf.mxu1 }
 0x2a5   :  { %v6082_v49 = vpop.f32.mrf.mxu0  ;;  %v2789_v12 = vpop.f32.mrf.mxu1 }
 0x2a7   :  { %v2416_v46 = vpop.f32.mrf.mxu0  ;;  %v2791_v42 = vpop.f32.mrf.mxu1 }
 0x2a8   :  { %v2429_v44 = vadd.f32 %v2416_v46, %v2267_v4 }
 0x2a9   :  { %v2418_v61 = vpop.f32.mrf.mxu0  ;;  %v2793_v23 = vpop.f32.mrf.mxu1 }
 0x2aa   :  { %v2430_v32 = vadd.f32 %v2418_v61, %v2269_v41  ;;  %v2587_v21 = vadd.f32 %v2574_v62, %v2429_v44 }
 0x2ab   :  { %v2420_v15 = vpop.f32.mrf.mxu0  ;;  %v6098_v10 = vpop.f32.mrf.mxu1 }
 0x2ac   :  { %v2431_v55 = vadd.f32 %v2420_v15, %v2271_v20  ;;  %v2588_v50 = vadd.f32 %v2576_v0, %v2430_v32  ;;  %v2257_v15 = vadd.f32 %v5987_v8, %v6026_v56 }
 0x2ad   :  { %v2422_v16 = vpop.f32.mrf.mxu0  ;;  %v6102_v18 = vpop.f32.mrf.mxu1 }
 0x2ae   :  { %v2432_v35 = vadd.f32 %v2422_v16, %v2273_v11  ;;  %v2589_v9 = vadd.f32 %v2578_v53, %v2431_v55 }
 0x2af   :  { %v6104_v58 = vpop.f32.mrf.mxu1 }
 0x2b0   :  { %v2590_v37 = vadd.f32 %v2580_v3, %v2432_v35  ;;  %v2263_v35 = vadd.f32 %v6017_v28, %v6040_v57 }
 0x2b1   :  { %v6106_v48 = vpop.f32.mrf.mxu1 }
 0x2bf   :  { %v2722_v34 = vpop.f32.mrf.mxu0 }
 0x2c1   :  { %v2724_v7 = vpop.f32.mrf.mxu0 }
 0x2c3   :  { %v6084_v54 = vpop.f32.mrf.mxu0  ;;  %v2893_v22 = vpop.f32.mrf.mxu1 }
 0x2c5   :  { %v6086_v14 = vpop.f32.mrf.mxu0  ;;  %v2895_v43 = vpop.f32.mrf.mxu1 }
 0x2c7   :  { %v2732_v30 = vpop.f32.mrf.mxu0  ;;  %v2897_v36 = vpop.f32.mrf.mxu1 }
 0x2c8   :  { %v6088_v40 = vadd.f32 %v2732_v30, %v2587_v21  ;;  %v2259_v21 = vadd.f32 %v6003_v52, %v6028_v60  ;;  %v2428_v52 = vadd.f32 %v6082_v49, %v2263_v35 }
 0x2c9   :  { %v2734_v19 = vpop.f32.mrf.mxu0  ;;  %v2899_v63 = vpop.f32.mrf.mxu1 }
 0x2ca   :  { %v6090_v45 = vadd.f32 %v2734_v19, %v2588_v50  ;;  %v2426_v50 = vadd.f32 %v6078_v27, %v2259_v21  ;;  %v2261_v19 = vadd.f32 %v6013_v29, %v6038_v25  ;;  %v2586_v29 = vadd.f32 %v6074_v2, %v2428_v52 }
 0x2cb   :  { %v2736_v33 = vpop.f32.mrf.mxu0  ;;  %v6108_v4 = vpop.f32.mrf.mxu1 }
 0x2cc   :  { %v2751_v38 = vmax.f32 %v6088_v40, %v6090_v45  ;;  %v6094_v17 = vadd.f32 %v2736_v33, %v2589_v9  ;;  %v2425_v9 = vadd.f32 %v6076_v31, %v2257_v15  ;;  %v2584_v8 = vadd.f32 %v6070_v39, %v2426_v50  ;;  %v4356_v45 = vld [vmem:[%s6263_s5 + $0x80] sm:$0xff]  }
 0x2cd   :  { %v2738_v24 = vpop.f32.mrf.mxu0  ;;  %v6110_v46 = vpop.f32.mrf.mxu1  ;;  %v2427_v33 = vadd.f32 %v6080_v59, %v2261_v19  ;;  %v2744_v59 = vadd.f32 %v6086_v14, %v2586_v29 }
 0x2ce   :  { %v6096_v47 = vadd.f32 %v2738_v24, %v2590_v37  ;;  %v2583_v28 = vadd.f32 %v6068_v5, %v2425_v9  ;;  %v2742_v31 = vadd.f32 %v2724_v7, %v2584_v8  ;;  %v4342_v8 = vld [vmem:[%s6263_s5 + $0xb8] sm:$0xff]  }
 0x2cf   :  { %v6114_v44 = vpop.f32.mrf.mxu1 }
 0x2d0   :  { %v2752_v13 = vmax.f32 %v6094_v17, %v6096_v47  ;;  %v4354_v47 = vld [vmem:[%s6263_s5 + $0x88] sm:$0xff]  }
 0x2d1   :  { %v6118_v20 = vpop.f32.mrf.mxu1 }
 0x2df   :  { %v2840_v51 = vpop.f32.mrf.mxu0 }
 0x2e0   :  { %v2841_v53 = vadd.f32 %v2840_v51, %v2787_v26 }
 0x2e1   :  { %v2842_v11 = vpop.f32.mrf.mxu0 }
 0x2e2   :  { %v2843_v16 = vadd.f32 %v2842_v11, %v2789_v12  ;;  %v2912_v30 = vadd.f32 %v2893_v22, %v2841_v53  ;;  %v2741_v22 = vadd.f32 %v2722_v34, %v2583_v28  ;;  %v6142_v34 = vld [vmem:[%s6264_s4] ss:$0 sm:$0xff] }
 0x2e3   :  { %v2844_v62 = vpop.f32.mrf.mxu0  ;;  %v3015_v55 = vpop.f32.mrf.mxu1 }
 0x2e4   :  { %v2845_v37 = vadd.f32 %v2844_v62, %v2791_v42  ;;  %v2913_v12 = vadd.f32 %v2895_v43, %v2843_v16 }
 0x2e5   :  { %v2846_v0 = vpop.f32.mrf.mxu0  ;;  %v3017_v60 = vpop.f32.mrf.mxu1 }
 0x2e6   :  { %v2847_v56 = vadd.f32 %v2846_v0, %v2793_v23  ;;  %v2914_v24 = vadd.f32 %v2897_v36, %v2845_v37  ;;  %v2585_v23 = vadd.f32 %v6072_v1, %v2427_v33  ;;  %v2749_v0 = vmax.f32 %v2741_v22, %v2742_v31  ;;  %v4341_v37 = vld [vmem:[%s6263_s5 + $0xf8] sm:$0xff]  }
 0x2e7   :  { %v6112_v41 = vpop.f32.mrf.mxu0  ;;  %v3019_v25 = vpop.f32.mrf.mxu1 }
 0x2e8   :  { %v2915_v39 = vadd.f32 %v2899_v63, %v2847_v56  ;;  %v2743_v36 = vadd.f32 %v6084_v54, %v2585_v23  ;;  %v4343_v56 = vld [vmem:[%s6263_s5 + $0xf0] sm:$0xff]  }
 0x2e9   :  { %v6116_v61 = vpop.f32.mrf.mxu0  ;;  %v3021_v7 = vpop.f32.mrf.mxu1 }
 0x2eb   :  { %v6120_v32 = vpop.f32.mrf.mxu0  ;;  %v3025_v9 = vpop.f32.mrf.mxu1 }
 0x2ed   :  { %v2856_v3 = vpop.f32.mrf.mxu0 }
 0x2ee   :  { %v2857_v54 = vadd.f32 %v2856_v3, %v6106_v48  ;;  %v2853_v3 = vadd.f32 %v6116_v61, %v6102_v18 }
 0x2f0   :  { %v2919_v33 = vadd.f32 %v6118_v20, %v2857_v54  ;;  %v2917_v61 = vadd.f32 %v6110_v46, %v2853_v3 }
 0x2ff   :  { %v2954_v26 = vpop.f32.mrf.mxu0 }
 0x300   :  { %v2973_v27 = vadd.f32 %v2954_v26, %v2912_v30  ;;  %v3027_v26 = vpop.f32.mrf.mxu1 }
 0x301   :  { %v2956_v57 = vpop.f32.mrf.mxu0 }
 0x302   :  { %v2974_v42 = vadd.f32 %v2956_v57, %v2913_v12  ;;  %v3034_v51 = vadd.f32 %v3015_v55, %v2973_v27  ;;  %v2750_v55 = vmax.f32 %v2743_v36, %v2744_v59  ;;  %v2855_v27 = vadd.f32 %v6120_v32, %v6104_v58  ;;  %v3029_v28 = vpop.f32.mrf.mxu1  ;;  %v4344_v57 = vld [vmem:[%s6263_s5 + $0xb0] sm:$0xff]   ;;  %v4345_v58 = vld [vmem:[%s6263_s5 + $0xe8] sm:$0xff]  }
 0x303   :  { %v2958_v49 = vpop.f32.mrf.mxu0  ;;  %v2851_v32 = vadd.f32 %v6112_v41, %v6098_v10  ;;  %v4346_v10 = vld [vmem:[%s6263_s5 + $0xa8] sm:$0xff]   ;;  %v4347_v41 = vld [vmem:[%s6263_s5 + $0xe0] sm:$0xff]   ;;  %v4358_v36 = vld [vmem:[%s6265_s7 + $0x10] sm:$0xff]  }
 0x304   :  { %v3035_v11 = vadd.f32 %v3017_v60, %v2974_v42  ;;  %v2975_v62 = vadd.f32 %v2958_v49, %v2914_v24  ;;  %v2918_v31 = vadd.f32 %v6114_v44, %v2855_v27  ;;  %v3031_v42 = vpop.f32.mrf.mxu1  ;;  %v4349_v49 = vld [vmem:[%s6263_s5 + $0xd8] sm:$0xff]   ;;  %v4353_v59 = vld [vmem:[%s6263_s5 + $0xc8] sm:$0xff]  }
 0x305   :  { %v2960_v43 = vpop.f32.mrf.mxu0  ;;  %v2916_v44 = vadd.f32 %v6108_v4, %v2851_v32 }
 0x306   :  { %v3042_v5 = vmax.f32 %v3034_v51, %v3035_v11  ;;  %v2976_v21 = vadd.f32 %v2960_v43, %v2915_v39  ;;  %v3036_v15 = vadd.f32 %v3019_v25, %v2975_v62  ;;  %v4348_v25 = vld [vmem:[%s6263_s5 + $0xa0] sm:$0xff]   ;;  %v4350_v62 = vld [vmem:[%s6263_s5 + $0x98] sm:$0xff]   ;;  %v4351_v39 = vld [vmem:[%s6263_s5 + $0xd0] sm:$0xff]  }
 0x307   :  { %v2964_v2 = vpop.f32.mrf.mxu0 }
 0x308   :  { %v3046_v53 = vmax.f32 %v2749_v0, %v3042_v5  ;;  %v3037_v63 = vadd.f32 %v3021_v7, %v2976_v21  ;;  %v2977_v46 = vadd.f32 %v2964_v2, %v2916_v44  ;;  %v4352_v0 = vld [vmem:[%s6263_s5 + $0x90] sm:$0xff]  }
 0x309   :  { %v2966_v16 = vpop.f32.mrf.mxu0 }
 0x30a   :  { %v3056_v1 = vadd.f32 %v6142_v34, %v3046_v53  ;;  %v3043_v50 = vmax.f32 %v3036_v15, %v3037_v63  ;;  %v2978_v24 = vadd.f32 %v2966_v16, %v2917_v61  ;;  %v3038_v11 = vadd.f32 %v3025_v9, %v2977_v46  ;;  %v4359_v53 = vld [vmem:[%s6265_s7 + $0x8] sm:$0xff]   ;;  %v4360_v15 = vld [vmem:[%s6265_s7] sm:$0xff]  }
 0x30b   :  { %v2968_v52 = vpop.f32.mrf.mxu0 }
 0x30c   :  { %v3060_v14 = vmax.f32 %v3056_v1, 0.0  ;;  %v3047_v35 = vmax.f32 %v2750_v55, %v3043_v50  ;;  %v2979_v20 = vadd.f32 %v2968_v52, %v2918_v31  ;;  %v3039_v51 = vadd.f32 %v3027_v26, %v2978_v24 }
 0x30d   :  { %v2970_v48 = vpop.f32.mrf.mxu0 }
 0x30e   :  { %v3064_v30 = vpack.c.bf16 %v3060_v14, %v3060_v14  ;;  %v3057_v19 = vadd.f32 %v6142_v34, %v3047_v35  ;;  %v2980_v18 = vadd.f32 %v2970_v48, %v2919_v33  ;;  %v3040_v29 = vadd.f32 %v3029_v28, %v2979_v20 }
 0x30f   :  { %v3044_v23 = vmax.f32 %v3038_v11, %v3039_v51  ;;  %v3582_v28 = vlaneseq }
 0x310   :  { %v3061_v60 = vmax.f32 %v3057_v19, 0.0  ;;  %4108 = vmatmul.mubr.bf16.vlgmr.msra.gmra.mxu1 %v3064_v30  ;;  %v3041_v22 = vadd.f32 %v3031_v42, %v2980_v18 }
 0x311   :  { %4132 = vmatpush3.bf16.msra.mxu1 %v4341_v37  ;;  %4147 = vmatprep.mubr.msk.bf16.mxu1 %vm4384_vm2, %v4383_v6  ;;  %v3048_v5 = vmax.f32 %v2751_v38, %v3044_v23 }
 0x312   :  { %v3081_v12 = vpack.c.bf16 %v3061_v60, %v3061_v60  ;;  %4133 = vmatprep.subr.bf16.mxu1 %v4383_v6  ;;  %v3045_v4 = vmax.f32 %v3040_v29, %v3041_v22 }
 0x313   :  { %v3058_v21 = vadd.f32 %v6142_v34, %v3048_v5 }
 0x314   :  { %4088 = vmatmul.mubr.bf16.vlgmr.msra.gmra.mxu0 %v3081_v12  ;;  %v3049_v43 = vmax.f32 %v2752_v13, %v3045_v4  ;;  %v4355_v13 = vld [vmem:[%s6263_s5 + $0xc0] sm:$0xff]  }
 0x315   :  { %4112 = vmatpush3.bf16.msra.mxu0 %v4342_v8  ;;  %4134 = vmatpush3.bf16.msra.mxu1 %v4343_v56  ;;  %v3062_v38 = vmax.f32 %v3058_v21, 0.0 }
 0x316   :  { %4113 = vmatprep.subr.bf16.mxu0 %v4383_v6  ;;  %4135 = vmatprep.subr.bf16.mxu1 %v4383_v6  ;;  %v3059_v17 = vadd.f32 %v6142_v34, %v3049_v43  ;;  %v4357_v34 = vld [vmem:[%s6265_s7 + $0x18] sm:$0xff]  }
 0x317   :  { %4127 = vmatprep.mubr.msk.bf16.mxu0 %vm4384_vm2, %v4383_v6  ;;  %v3275_v2 = vpack.c.bf16 %v3062_v38, %v3062_v38 }
 0x318   :  { %v3063_v40 = vmax.f32 %v3059_v17, 0.0 }
 0x319   :  { %4114 = vmatpush3.bf16.msra.mxu0 %v4344_v57  ;;  %4136 = vmatpush3.bf16.msra.mxu1 %v4345_v58  ;;  %v3583_v57 = vand.u32 127, %v3582_v28  ;;  %v4024_v58 = vld [vmem:[%s6267_s8] ss:$0 sm:$0xff] }
 0x31a   :  { %4115 = vmatprep.subr.bf16.mxu0 %v4383_v6  ;;  %4137 = vmatprep.subr.bf16.mxu1 %v4383_v6  ;;  %v3382_v7 = vpack.c.bf16 %v3063_v40, %v3063_v40 }
 0x31b   :  { %vm3584_vm4 = vcmp.lt.s32.totalorder %v3583_v57, 10 }
 0x31d   :  { %4116 = vmatpush3.bf16.msra.mxu0 %v4346_v10  ;;  %4138 = vmatpush3.bf16.msra.mxu1 %v4347_v41 }
 0x31e   :  { %4117 = vmatprep.subr.bf16.mxu0 %v4383_v6  ;;  %4139 = vmatprep.subr.bf16.mxu1 %v4383_v6 }
 0x321   :  { %4118 = vmatpush3.bf16.msra.mxu0 %v4348_v25  ;;  %4140 = vmatpush3.bf16.msra.mxu1 %v4349_v49 }
 0x322   :  { %4119 = vmatprep.subr.bf16.mxu0 %v4383_v6  ;;  %4141 = vmatprep.subr.bf16.mxu1 %v4383_v6 }
 0x325   :  { %4120 = vmatpush3.bf16.msra.mxu0 %v4350_v62  ;;  %4142 = vmatpush3.bf16.msra.mxu1 %v4351_v39 }
 0x326   :  { %4121 = vmatprep.subr.bf16.mxu0 %v4383_v6  ;;  %4143 = vmatprep.subr.bf16.mxu1 %v4383_v6 }
 0x329   :  { %4122 = vmatpush3.bf16.msra.mxu0 %v4352_v0  ;;  %4144 = vmatpush3.bf16.msra.mxu1 %v4353_v59 }
 0x32a   :  { %4123 = vmatprep.subr.bf16.mxu0 %v4383_v6  ;;  %4145 = vmatprep.subr.bf16.mxu1 %v4383_v6 }
 0x32d   :  { %4124 = vmatpush3.bf16.msra.mxu0 %v4354_v47  ;;  %4146 = vmatpush3.bf16.msra.mxu1 %v4355_v13 }
 0x32e   :  { %4125 = vmatprep.subr.bf16.mxu0 %v4383_v6 }
 0x330   :  { %4148 = vmatmul.mubr.bf16.vlgmr.msra.gmra.mxu1 %v3382_v7 }
 0x331   :  { %4126 = vmatpush3.bf16.msra.mxu0 %v4356_v45 }
 0x332   :  { %4151 = vmatprep.subr.bf16.mxu0 %v4383_v6 }
 0x334   :  { %4128 = vmatmul.mubr.bf16.vlgmr.msra.gmra.mxu0 %v3275_v2 }
 0x335   :  { %4159 = vmatprep.mubr.msk.bf16.mxu0 %vm4384_vm2, %v4383_v6  ;;  %4152 = vmatpush3.bf16.msra.mxu0 %v4357_v34 }
 0x336   :  { %4153 = vmatprep.subr.bf16.mxu0 %v4383_v6 }
 0x339   :  { %4154 = vmatpush3.bf16.msra.mxu0 %v4358_v36 }
 0x33a   :  { %4155 = vmatprep.subr.bf16.mxu0 %v4383_v6 }
 0x33d   :  { %4156 = vmatpush3.bf16.msra.mxu0 %v4359_v53 }
 0x33e   :  { %4157 = vmatprep.subr.bf16.mxu0 %v4383_v6  ;;  %v4023_v6 = vld [vmem:[%s6266_s6] ss:$0 sm:$0xff] }
 0x341   :  { %4158 = vmatpush3.bf16.msra.mxu0 %v4360_v15 }
 0x3d0   :  { %v3269_v63 = vpop.f32.mrf.mxu1 }
 0x3d2   :  { %v4109_v55 = vpop.f32.mrf.mxu1 }
 0x3d4   :  { %v3181_v1 = vpop.f32.mrf.mxu0  ;;  %v3272_v50 = vpop.f32.mrf.mxu1 }
 0x3d5   :  { %v3270_v19 = vadd.f32 %v3269_v63, %v3181_v1 }
 0x3d6   :  { %v4089_v16 = vpop.f32.mrf.mxu0  ;;  %v4110_v14 = vpop.f32.mrf.mxu1 }
 0x3d8   :  { %v3184_v35 = vpop.f32.mrf.mxu0 }
 0x3da   :  { %v4090_v9 = vpop.f32.mrf.mxu0 }
 0x3f0   :  { %v3482_v37 = vpop.f32.mrf.mxu1 }
 0x3f2   :  { %v4149_v30 = vpop.f32.mrf.mxu1 }
 0x3f4   :  { %v3375_v52 = vpop.f32.mrf.mxu0  ;;  %v3485_v54 = vpop.f32.mrf.mxu1 }
 0x3f5   :  { %v3381_v60 = vadd.f32 %v3375_v52, %v3270_v19 }
 0x3f6   :  { %v4129_v26 = vpop.f32.mrf.mxu0  ;;  %v4150_v8 = vpop.f32.mrf.mxu1 }
 0x3f7   :  { %v3488_v56 = vadd.f32 %v3482_v37, %v3381_v60 }
 0x3f8   :  { %v3378_v27 = vpop.f32.mrf.mxu0 }
 0x3f9   :  { %v3496_v12 = vadd.f32 %v4023_v6, %v3488_v56 }
 0x3fa   :  { %v4130_v48 = vpop.f32.mrf.mxu0 }
 0x3fb   :  { %v3497_v3 = vmax.f32 %v3496_v12, 0.0 }
 0x3fd   :  { %v3498_v33 = vpack.c.bf16 %v3497_v3, %v3497_v3 }
 0x3ff   :  { %4160 = vmatmul.mubr.msk.bf16.vlgmr.msra.gmra.mxu0 %vm3538_vm3, %v3498_v33 }
 0x4bf   :  { %v3576_v32 = vpop.f32.mrf.mxu0 }
 0x4c0   :  { %v3577_v31 = vadd.f32 %v4024_v58, %v3576_v32 }
 0x4c1   :  { %v4161_v18 = vpop.f32.mrf.mxu0 }
 0x4c2   :  { %v3585_v61 = vsel %vm3584_vm4, %v3577_v31, -1e+30 }
 0x4c3   :  { %3586 = vmax.xlane.f32.xlu0 %v3585_v61  ;;  %v3579_v20 = vpop.f32.mrf.mxu0 }
 0x4c5   :  { %v4162_v42 = vpop.f32.mrf.mxu0 }
 0x54c   :  { %v3587_v10 = vpop.xlane.xlu0 %3586 }
 0x54d   :  { %v3588_v41 = vsub.f32 %v3577_v31, %v3587_v10 }
 0x54f   :  { %v3589_v44 = vmul.f32 1.442695, %v3588_v41 }
 0x551   :  { %4361 = vpow2.f32 %v3589_v44 }
 0x55e   :  { %v4362_v24 = vpop.eup %4361 }
 0x55f   :  { %v3591_v22 = vsel %vm3584_vm4, %v4362_v24, 0.0 }
 0x560   :  { %3592 = vadd.xlane.f32.xlu0 %v3591_v22 }
 0x5e9   :  { %v3593_v46 = vpop.xlane.xlu0 %3592 }
 0x5ea   :  { %4363 = vlog2.f32 %v3593_v46 }
 0x5f7   :  { %v4364_v29 = vpop.eup %4363 }
 0x5f8   :  { %v3595_v25 = vmul.f32 0.6931472, %v4364_v29 }
 0x5fa   :  { %v3596_v49 = vadd.f32 %v3595_v25, %v3587_v10 }
 0x5fc   :  { %v3597_v51 = vsub.f32 %v3577_v31, %v3596_v49 }
 0x5fe   :  { %3598 = vst [vmem:[%s6268_s9] sm:$0xff] %v3597_v51 }

</bundles_post_ra>
